<compile_context>
chip_gen: v7x
topology: tpu7x:2x2x1
jax: 0.10.0
libtpu: 0.0.40
codegen_flags: <defaults>
</compile_context>

<pallas_src>
import numpy as np
import jax
import jax.numpy as jnp
from jax import lax
from jax.experimental import pallas as pl
from jax.experimental.pallas import tpu as pltpu

# ----------------------- module hyper-parameters -----------------------------
HIDDEN_LAYER_REP_CHANNELS = 8
STATE_CHANNELS = 8
RES_BLOCK_REPS = [STATE_CHANNELS, STATE_CHANNELS]   # two residual blocks
KH = KW = 3                                         # kernel_size=3, stride=1, pad=1
EPS = 1e-5
CPAD = 8        # every layer's channels padded to 8 (= one sublane tile)


def _round_up(x, m):
    return (x + m - 1) // m * m


# ------------------------------ fused Pallas kernel ---------------------------
def _make_fused_kernel(Wp, n_res, width):
    """Fused whole-network kernel body (one image-chunk per grid step).

    Activation layout: (CPAD, width) = channels on sublanes, B_chunk images
    concatenated along lanes, each image a flattened halo-padded (Hp*Wp,
    lane-padded to spp) slab.
    """
    # Lane offset of each conv tap (kh-major, kw-minor) — matches weight packing.
    offs = [(kh - 1) * Wp + (kw - 1) for kh in range(KH) for kw in range(KW)]
    # tap[p] = a[p + off]  <=>  roll by shift = -off (positive-modded for safety).
    shifts = [(-o) % width for o in offs]

    def kernel(x_ref, w_ref, b_ref, m_ref, o_ref):
        # x_ref : (1, CPAD, width)       halo-padded, flattened, chunk-packed input
        # w_ref : (L, 9, CPAD, CPAD)     BN-scale-folded per-tap conv weights
        # b_ref : (L, CPAD, 1)           BN-folded bias per layer
        # m_ref : (CPAD, width)          1.0 at interior pixels, 0.0 at halo/pad
        # o_ref : (1, CPAD, width)
        mask8 = m_ref[...]                               # loaded/hoisted once

        def conv_bn_relu(layer, a, residual=None):
            # a: (CPAD, width) activation with zeroed halo / lane pad.
            y = None
            for k, s in enumerate(shifts):
                tap = a if s == 0 else pltpu.roll(a, shift=s, axis=1)  # XLU
                part = jnp.dot(w_ref[layer, k], tap,                   # MXU
                               preferred_element_type=jnp.float32)
                y = part if y is None else y + part
            y = y + b_ref[layer]                         # BN scale already in W
            if residual is not None:
                y = y + residual
            return jnp.maximum(y, 0.0) * mask8           # ReLU + re-zero halo/pad

        a = conv_bn_relu(0, x_ref[0])                    # conv1 -> bn1 -> relu
        a = conv_bn_relu(1, a)                           # conv2 -> bn2 -> relu
        li = 2
        for _ in range(n_res):                           # residual blocks
            skip = a
            a = conv_bn_relu(li, a)
            a = conv_bn_relu(li + 1, a, residual=skip)
            li += 2
        o_ref[0] = a                                     # lane-dense store

    return kernel


# ------------------------------ kernel wrapper --------------------------------
def representation_forward(x_nchw, wstack, bstack, *, max_chunk=8):
    """Fused Representation.forward.  x_nchw: (N, 2, H, W) -> (N, 8, H, W).

    max_chunk = images packed per grid step (lane-width of the matmuls).
    Sweep per generation; keep modest on v7x (64 MiB VMEM) and >=2 chunks there
    so both TensorCores get work when N is large.
    """
    x_nchw = x_nchw.astype(jnp.float32)
    N, cin, H, W = x_nchw.shape
    assert cin <= CPAD
    Hp, Wp = H + 2, W + 2
    sp = Hp * Wp                          # flattened halo-padded spatial size
    spp = _round_up(sp, 128)              # lane-dense per-image slab width
    # roll wraparound must land in the zeroed lane pad of each image slab:
    assert spp - sp >= Wp + 1, "lane pad too small to absorb roll wraparound"
    L = wstack.shape[0]
    n_res = (L - 2) // 2

    Bc = min(N, max_chunk)                # images per grid step
    Npad = _round_up(N, Bc)
    nc = Npad // Bc
    width = Bc * spp

    # Host glue (cheap XLA, once per forward): pad batch to a chunk multiple,
    # channel-pad to 8, halo-pad spatial, flatten, lane-pad, pack chunks on lanes.
    xp = jnp.pad(x_nchw, ((0, Npad - N), (0, CPAD - cin), (1, 1), (1, 1)))
    xflat = jnp.pad(xp.reshape(Npad, CPAD, sp), ((0, 0), (0, 0), (0, spp - sp)))
    xpk = (xflat.reshape(nc, Bc, CPAD, spp)
                .transpose(0, 2, 1, 3)
                .reshape(nc, CPAD, width))

    # Interior-pixel mask, pre-broadcast to (CPAD, width) on the host.
    m = np.zeros((Hp, Wp), np.float32)
    m[1:H + 1, 1:W + 1] = 1.0
    m = np.pad(m.reshape(sp), (0, spp - sp))
    mask = jnp.asarray(
        np.ascontiguousarray(np.broadcast_to(np.tile(m, Bc), (CPAD, width))))

    kernel = _make_fused_kernel(Wp, n_res, width)

    flops = 2 * L * CPAD * (KH * KW * CPAD) * Npad * spp
    bytes_accessed = 4 * (xpk.size + nc * CPAD * width
                          + wstack.size + bstack.size + mask.size)

    out = pl.pallas_call(
        kernel,
        out_shape=jax.ShapeDtypeStruct((nc, CPAD, width), jnp.float32),
        grid=(nc,),
        in_specs=[
            pl.BlockSpec((1, CPAD, width), lambda c: (c, 0, 0)),
            pl.BlockSpec((L, KH * KW, CPAD, CPAD), lambda c: (0, 0, 0, 0)),
            pl.BlockSpec((L, CPAD, 1), lambda c: (0, 0, 0)),
            pl.BlockSpec((CPAD, width), lambda c: (0, 0)),
        ],
        out_specs=pl.BlockSpec((1, CPAD, width), lambda c: (c, 0, 0)),
        compiler_params=pltpu.CompilerParams(
            dimension_semantics=("parallel",),     # chunk axis -> both v7x TCs
            vmem_limit_bytes=32 * 1024 * 1024,
        ),
        cost_estimate=pl.CostEstimate(
            flops=flops, transcendentals=0, bytes_accessed=bytes_accessed),
    )(xpk, wstack, bstack, mask)

    # Glue: unpack chunks, drop batch/channel padding and spatial halo.
    out = (out.reshape(nc, CPAD, Bc, spp)
              .transpose(0, 2, 1, 3)
              .reshape(Npad, CPAD, spp))
    out = (out[:N, :STATE_CHANNELS, :sp]
           .reshape(N, STATE_CHANNELS, Hp, Wp)[:, :, 1:H + 1, 1:W + 1])
    return out


# ------------------------------ parameter handling -----------------------------
def _make_raw_conv_bn(key, cin, cout):
    k1, k2, k3, k4, k5, k6 = jax.random.split(key, 6)
    w = jax.random.normal(k1, (cout, cin, KH, KW), jnp.float32) / np.sqrt(cin * KH * KW)
    conv_b = 0.05 * jax.random.normal(k2, (cout,), jnp.float32)
    gamma = 1.0 + 0.1 * jax.random.normal(k3, (cout,), jnp.float32)
    beta = 0.1 * jax.random.normal(k4, (cout,), jnp.float32)
    mean = 0.1 * jax.random.normal(k5, (cout,), jnp.float32)
    var = 0.5 + 0.5 * jnp.abs(jax.random.normal(k6, (cout,), jnp.float32))
    return dict(w=w, b=conv_b, gamma=gamma, beta=beta, mean=mean, var=var)


def make_raw_params(key):
    cfgs = [(2, HIDDEN_LAYER_REP_CHANNELS),
            (HIDDEN_LAYER_REP_CHANNELS, STATE_CHANNELS)]
    for ch in RES_BLOCK_REPS:
        cfgs += [(ch, ch), (ch, ch)]
    keys = jax.random.split(key, len(cfgs))
    return [_make_raw_conv_bn(k, ci, co) for k, (ci, co) in zip(keys, cfgs)]


def fold_params(raw):
    """Fold BN (inference mode) into conv weights/bias; pack per-tap for the kernel.

    Returns wstack (L, 9, 8, 8) = per-tap (cout, cin) matrices with the BN scale
    folded in, and bstack (L, 8, 1) = folded bias.
    """
    ws, bs = [], []
    for p in raw:
        cout, cin = p["w"].shape[:2]
        scale = p["gamma"] / jnp.sqrt(p["var"] + EPS)            # (cout,)
        bias = p["beta"] + scale * (p["b"] - p["mean"])          # (cout,)
        w_s = p["w"] * scale[:, None, None, None]                # fold BN scale
        w_p = jnp.pad(w_s, ((0, CPAD - cout), (0, CPAD - cin), (0, 0), (0, 0)))
        w_taps = jnp.transpose(w_p, (2, 3, 0, 1)).reshape(KH * KW, CPAD, CPAD)
        ws.append(w_taps)
        bs.append(jnp.pad(bias, (0, CPAD - cout)).reshape(CPAD, 1))
    return jnp.stack(ws), jnp.stack(bs)


# ------------------------------ pure-JAX reference -----------------------------
def representation_forward_ref(x, raw):
    def cbr(x, p, residual=None):
        y = lax.conv_general_dilated(
            x, p["w"], window_strides=(1, 1), padding=((1, 1), (1, 1)),
            dimension_numbers=("NCHW", "OIHW", "NCHW"))
        y = y + p["b"][None, :, None, None]
        inv = (p["gamma"] / jnp.sqrt(p["var"] + EPS))[None, :, None, None]
        y = (y - p["mean"][None, :, None, None]) * inv + p["beta"][None, :, None, None]
        if residual is not None:
            y = y + residual
        return jnp.maximum(y, 0.0)

    x = cbr(x, raw[0])
    x = cbr(x, raw[1])
    i = 2
    for _ in RES_BLOCK_REPS:
        skip = x
        x = cbr(x, raw[i])
        x = cbr(x, raw[i + 1], residual=skip)
        i += 2
    return x


# ----------------------------------- main --------------------------------------
if __name__ == "__main__":
    root = jax.random.PRNGKey(0)
    kx, kp = jax.random.split(root)

    # PyTorch-convention input: NCHW (batch=2, in_channels=2, 16x16 spatial).
    x_nchw = jax.random.normal(kx, (2, 2, 16, 16), jnp.float32)

    raw = make_raw_params(kp)
    wstack, bstack = fold_params(raw)

    out = representation_forward(x_nchw, wstack, bstack)
    out = jax.block_until_ready(out)

    ref = representation_forward_ref(x_nchw, raw)
    ref = jax.block_until_ready(ref)

    assert out.shape == (2, STATE_CHANNELS, 16, 16), out.shape
    np.testing.assert_allclose(np.asarray(out), np.asarray(ref), rtol=1e-4, atol=1e-4)

    print("KERNEL_OK")
</pallas_src>

<mosaic_0001>
module attributes {stable_mosaic.version = 11 : i64} {
  func.func @kernel(%arg0: i32, %arg1: memref<1x8x768xf32, #tpu.memory_space<vmem>>, %arg2: memref<6x9x8x8xf32, #tpu.memory_space<vmem>>, %arg3: memref<6x8x1xf32, #tpu.memory_space<vmem>>, %arg4: memref<8x768xf32, #tpu.memory_space<vmem>>, %arg5: memref<1x8x768xf32, #tpu.memory_space<vmem>>) attributes {dimension_semantics = [#tpu.dimension_semantics<parallel>], iteration_bounds = array<i64: 1>, scalar_prefetch = 0 : i64, scratch_operands = 0 : i64, tpu.core_type = #tpu.core_type<tc>, window_params = [{transform_indices = @transform_0, window_bounds = array<i64: 1, 8, 768>}, {pipeline_mode = #tpu.pipeline_mode<synchronous>, transform_indices = @transform_1, window_bounds = array<i64: 6, 9, 8, 8>}, {pipeline_mode = #tpu.pipeline_mode<synchronous>, transform_indices = @transform_2, window_bounds = array<i64: 6, 8, 1>}, {pipeline_mode = #tpu.pipeline_mode<synchronous>, transform_indices = @transform_3, window_bounds = array<i64: 8, 768>}, {transform_indices = @transform_4, window_bounds = array<i64: 1, 8, 768>}]} {
    %c0 = arith.constant 0 : index
    %c0_0 = arith.constant 0 : index
    %0 = vector.load %arg4[%c0, %c0_0] : memref<8x768xf32, #tpu.memory_space<vmem>>, vector<8x768xf32>
    %c0_1 = arith.constant 0 : index
    %c0_2 = arith.constant 0 : index
    %c0_3 = arith.constant 0 : index
    %1 = vector.load %arg1[%c0_1, %c0_2, %c0_3] : memref<1x8x768xf32, #tpu.memory_space<vmem>>, vector<1x8x768xf32>
    %2 = vector.shape_cast %1 : vector<1x8x768xf32> to vector<8x768xf32>
    %c19_i32 = arith.constant 19 : i32
    %3 = tpu.dynamic_rotate %2 by %c19_i32 dim 1 : vector<8x768xf32>, i32 -> vector<8x768xf32>
    %c0_4 = arith.constant 0 : index
    %c0_5 = arith.constant 0 : index
    %c0_6 = arith.constant 0 : index
    %c0_7 = arith.constant 0 : index
    %4 = vector.load %arg2[%c0_4, %c0_5, %c0_6, %c0_7] : memref<6x9x8x8xf32, #tpu.memory_space<vmem>>, vector<1x1x8x8xf32>
    %5 = vector.shape_cast %4 : vector<1x1x8x8xf32> to vector<8x8xf32>
    %cst = arith.constant dense<0.000000e+00> : vector<8x768xf32>
    %6 = tpu.matmul %5, %3, %cst {dimension_numbers = #tpu.dot_dimension_numbers<[1], [0], [0], [1], [0, 0, 1, 1], [], []>} : vector<8x8xf32>, vector<8x768xf32>, vector<8x768xf32> -> vector<8x768xf32>
    %c18_i32 = arith.constant 18 : i32
    %7 = tpu.dynamic_rotate %2 by %c18_i32 dim 1 : vector<8x768xf32>, i32 -> vector<8x768xf32>
    %c0_8 = arith.constant 0 : index
    %c1 = arith.constant 1 : index
    %c0_9 = arith.constant 0 : index
    %c0_10 = arith.constant 0 : index
    %8 = vector.load %arg2[%c0_8, %c1, %c0_9, %c0_10] : memref<6x9x8x8xf32, #tpu.memory_space<vmem>>, vector<1x1x8x8xf32>
    %9 = vector.shape_cast %8 : vector<1x1x8x8xf32> to vector<8x8xf32>
    %cst_11 = arith.constant dense<0.000000e+00> : vector<8x768xf32>
    %10 = tpu.matmul %9, %7, %cst_11 {dimension_numbers = #tpu.dot_dimension_numbers<[1], [0], [0], [1], [0, 0, 1, 1], [], []>} : vector<8x8xf32>, vector<8x768xf32>, vector<8x768xf32> -> vector<8x768xf32>
    %11 = arith.addf %6, %10 : vector<8x768xf32>
    %c17_i32 = arith.constant 17 : i32
    %12 = tpu.dynamic_rotate %2 by %c17_i32 dim 1 : vector<8x768xf32>, i32 -> vector<8x768xf32>
    %c0_12 = arith.constant 0 : index
    %c2 = arith.constant 2 : index
    %c0_13 = arith.constant 0 : index
    %c0_14 = arith.constant 0 : index
    %13 = vector.load %arg2[%c0_12, %c2, %c0_13, %c0_14] : memref<6x9x8x8xf32, #tpu.memory_space<vmem>>, vector<1x1x8x8xf32>
    %14 = vector.shape_cast %13 : vector<1x1x8x8xf32> to vector<8x8xf32>
    %cst_15 = arith.constant dense<0.000000e+00> : vector<8x768xf32>
    %15 = tpu.matmul %14, %12, %cst_15 {dimension_numbers = #tpu.dot_dimension_numbers<[1], [0], [0], [1], [0, 0, 1, 1], [], []>} : vector<8x8xf32>, vector<8x768xf32>, vector<8x768xf32> -> vector<8x768xf32>
    %16 = arith.addf %11, %15 : vector<8x768xf32>
    %c1_i32 = arith.constant 1 : i32
    %17 = tpu.dynamic_rotate %2 by %c1_i32 dim 1 : vector<8x768xf32>, i32 -> vector<8x768xf32>
    %c0_16 = arith.constant 0 : index
    %c3 = arith.constant 3 : index
    %c0_17 = arith.constant 0 : index
    %c0_18 = arith.constant 0 : index
    %18 = vector.load %arg2[%c0_16, %c3, %c0_17, %c0_18] : memref<6x9x8x8xf32, #tpu.memory_space<vmem>>, vector<1x1x8x8xf32>
    %19 = vector.shape_cast %18 : vector<1x1x8x8xf32> to vector<8x8xf32>
    %cst_19 = arith.constant dense<0.000000e+00> : vector<8x768xf32>
    %20 = tpu.matmul %19, %17, %cst_19 {dimension_numbers = #tpu.dot_dimension_numbers<[1], [0], [0], [1], [0, 0, 1, 1], [], []>} : vector<8x8xf32>, vector<8x768xf32>, vector<8x768xf32> -> vector<8x768xf32>
    %21 = arith.addf %16, %20 : vector<8x768xf32>
    %c0_20 = arith.constant 0 : index
    %c4 = arith.constant 4 : index
    %c0_21 = arith.constant 0 : index
    %c0_22 = arith.constant 0 : index
    %22 = vector.load %arg2[%c0_20, %c4, %c0_21, %c0_22] : memref<6x9x8x8xf32, #tpu.memory_space<vmem>>, vector<1x1x8x8xf32>
    %23 = vector.shape_cast %22 : vector<1x1x8x8xf32> to vector<8x8xf32>
    %cst_23 = arith.constant dense<0.000000e+00> : vector<8x768xf32>
    %24 = tpu.matmul %23, %2, %cst_23 {dimension_numbers = #tpu.dot_dimension_numbers<[1], [0], [0], [1], [0, 0, 1, 1], [], []>} : vector<8x8xf32>, vector<8x768xf32>, vector<8x768xf32> -> vector<8x768xf32>
    %25 = arith.addf %21, %24 : vector<8x768xf32>
    %c767_i32 = arith.constant 767 : i32
    %26 = tpu.dynamic_rotate %2 by %c767_i32 dim 1 : vector<8x768xf32>, i32 -> vector<8x768xf32>
    %c0_24 = arith.constant 0 : index
    %c5 = arith.constant 5 : index
    %c0_25 = arith.constant 0 : index
    %c0_26 = arith.constant 0 : index
    %27 = vector.load %arg2[%c0_24, %c5, %c0_25, %c0_26] : memref<6x9x8x8xf32, #tpu.memory_space<vmem>>, vector<1x1x8x8xf32>
    %28 = vector.shape_cast %27 : vector<1x1x8x8xf32> to vector<8x8xf32>
    %cst_27 = arith.constant dense<0.000000e+00> : vector<8x768xf32>
    %29 = tpu.matmul %28, %26, %cst_27 {dimension_numbers = #tpu.dot_dimension_numbers<[1], [0], [0], [1], [0, 0, 1, 1], [], []>} : vector<8x8xf32>, vector<8x768xf32>, vector<8x768xf32> -> vector<8x768xf32>
    %30 = arith.addf %25, %29 : vector<8x768xf32>
    %c751_i32 = arith.constant 751 : i32
    %31 = tpu.dynamic_rotate %2 by %c751_i32 dim 1 : vector<8x768xf32>, i32 -> vector<8x768xf32>
    %c0_28 = arith.constant 0 : index
    %c6 = arith.constant 6 : index
    %c0_29 = arith.constant 0 : index
    %c0_30 = arith.constant 0 : index
    %32 = vector.load %arg2[%c0_28, %c6, %c0_29, %c0_30] : memref<6x9x8x8xf32, #tpu.memory_space<vmem>>, vector<1x1x8x8xf32>
    %33 = vector.shape_cast %32 : vector<1x1x8x8xf32> to vector<8x8xf32>
    %cst_31 = arith.constant dense<0.000000e+00> : vector<8x768xf32>
    %34 = tpu.matmul %33, %31, %cst_31 {dimension_numbers = #tpu.dot_dimension_numbers<[1], [0], [0], [1], [0, 0, 1, 1], [], []>} : vector<8x8xf32>, vector<8x768xf32>, vector<8x768xf32> -> vector<8x768xf32>
    %35 = arith.addf %30, %34 : vector<8x768xf32>
    %c750_i32 = arith.constant 750 : i32
    %36 = tpu.dynamic_rotate %2 by %c750_i32 dim 1 : vector<8x768xf32>, i32 -> vector<8x768xf32>
    %c0_32 = arith.constant 0 : index
    %c7 = arith.constant 7 : index
    %c0_33 = arith.constant 0 : index
    %c0_34 = arith.constant 0 : index
    %37 = vector.load %arg2[%c0_32, %c7, %c0_33, %c0_34] : memref<6x9x8x8xf32, #tpu.memory_space<vmem>>, vector<1x1x8x8xf32>
    %38 = vector.shape_cast %37 : vector<1x1x8x8xf32> to vector<8x8xf32>
    %cst_35 = arith.constant dense<0.000000e+00> : vector<8x768xf32>
    %39 = tpu.matmul %38, %36, %cst_35 {dimension_numbers = #tpu.dot_dimension_numbers<[1], [0], [0], [1], [0, 0, 1, 1], [], []>} : vector<8x8xf32>, vector<8x768xf32>, vector<8x768xf32> -> vector<8x768xf32>
    %40 = arith.addf %35, %39 : vector<8x768xf32>
    %c749_i32 = arith.constant 749 : i32
    %41 = tpu.dynamic_rotate %2 by %c749_i32 dim 1 : vector<8x768xf32>, i32 -> vector<8x768xf32>
    %c0_36 = arith.constant 0 : index
    %c8 = arith.constant 8 : index
    %c0_37 = arith.constant 0 : index
    %c0_38 = arith.constant 0 : index
    %42 = vector.load %arg2[%c0_36, %c8, %c0_37, %c0_38] : memref<6x9x8x8xf32, #tpu.memory_space<vmem>>, vector<1x1x8x8xf32>
    %43 = vector.shape_cast %42 : vector<1x1x8x8xf32> to vector<8x8xf32>
    %cst_39 = arith.constant dense<0.000000e+00> : vector<8x768xf32>
    %44 = tpu.matmul %43, %41, %cst_39 {dimension_numbers = #tpu.dot_dimension_numbers<[1], [0], [0], [1], [0, 0, 1, 1], [], []>} : vector<8x8xf32>, vector<8x768xf32>, vector<8x768xf32> -> vector<8x768xf32>
    %45 = arith.addf %40, %44 : vector<8x768xf32>
    %c0_40 = arith.constant 0 : index
    %c0_41 = arith.constant 0 : index
    %c0_42 = arith.constant 0 : index
    %46 = vector.load %arg3[%c0_40, %c0_41, %c0_42] : memref<6x8x1xf32, #tpu.memory_space<vmem>>, vector<1x8x1xf32>
    %47 = vector.shape_cast %46 : vector<1x8x1xf32> to vector<8x1xf32>
    %48 = vector.broadcast %47 : vector<8x1xf32> to vector<8x768xf32>
    %49 = arith.addf %45, %48 : vector<8x768xf32>
    %cst_43 = arith.constant 0.000000e+00 : f32
    %50 = vector.broadcast %cst_43 : f32 to vector<8x768xf32>
    %51 = arith.maximumf %49, %50 : vector<8x768xf32>
    %52 = arith.mulf %51, %0 : vector<8x768xf32>
    %c19_i32_44 = arith.constant 19 : i32
    %53 = tpu.dynamic_rotate %52 by %c19_i32_44 dim 1 : vector<8x768xf32>, i32 -> vector<8x768xf32>
    %c1_45 = arith.constant 1 : index
    %c0_46 = arith.constant 0 : index
    %c0_47 = arith.constant 0 : index
    %c0_48 = arith.constant 0 : index
    %54 = vector.load %arg2[%c1_45, %c0_46, %c0_47, %c0_48] : memref<6x9x8x8xf32, #tpu.memory_space<vmem>>, vector<1x1x8x8xf32>
    %55 = vector.shape_cast %54 : vector<1x1x8x8xf32> to vector<8x8xf32>
    %cst_49 = arith.constant dense<0.000000e+00> : vector<8x768xf32>
    %56 = tpu.matmul %55, %53, %cst_49 {dimension_numbers = #tpu.dot_dimension_numbers<[1], [0], [0], [1], [0, 0, 1, 1], [], []>} : vector<8x8xf32>, vector<8x768xf32>, vector<8x768xf32> -> vector<8x768xf32>
    %c18_i32_50 = arith.constant 18 : i32
    %57 = tpu.dynamic_rotate %52 by %c18_i32_50 dim 1 : vector<8x768xf32>, i32 -> vector<8x768xf32>
    %c1_51 = arith.constant 1 : index
    %c1_52 = arith.constant 1 : index
    %c0_53 = arith.constant 0 : index
    %c0_54 = arith.constant 0 : index
    %58 = vector.load %arg2[%c1_51, %c1_52, %c0_53, %c0_54] : memref<6x9x8x8xf32, #tpu.memory_space<vmem>>, vector<1x1x8x8xf32>
    %59 = vector.shape_cast %58 : vector<1x1x8x8xf32> to vector<8x8xf32>
    %cst_55 = arith.constant dense<0.000000e+00> : vector<8x768xf32>
    %60 = tpu.matmul %59, %57, %cst_55 {dimension_numbers = #tpu.dot_dimension_numbers<[1], [0], [0], [1], [0, 0, 1, 1], [], []>} : vector<8x8xf32>, vector<8x768xf32>, vector<8x768xf32> -> vector<8x768xf32>
    %61 = arith.addf %56, %60 : vector<8x768xf32>
    %c17_i32_56 = arith.constant 17 : i32
    %62 = tpu.dynamic_rotate %52 by %c17_i32_56 dim 1 : vector<8x768xf32>, i32 -> vector<8x768xf32>
    %c1_57 = arith.constant 1 : index
    %c2_58 = arith.constant 2 : index
    %c0_59 = arith.constant 0 : index
    %c0_60 = arith.constant 0 : index
    %63 = vector.load %arg2[%c1_57, %c2_58, %c0_59, %c0_60] : memref<6x9x8x8xf32, #tpu.memory_space<vmem>>, vector<1x1x8x8xf32>
    %64 = vector.shape_cast %63 : vector<1x1x8x8xf32> to vector<8x8xf32>
    %cst_61 = arith.constant dense<0.000000e+00> : vector<8x768xf32>
    %65 = tpu.matmul %64, %62, %cst_61 {dimension_numbers = #tpu.dot_dimension_numbers<[1], [0], [0], [1], [0, 0, 1, 1], [], []>} : vector<8x8xf32>, vector<8x768xf32>, vector<8x768xf32> -> vector<8x768xf32>
    %66 = arith.addf %61, %65 : vector<8x768xf32>
    %c1_i32_62 = arith.constant 1 : i32
    %67 = tpu.dynamic_rotate %52 by %c1_i32_62 dim 1 : vector<8x768xf32>, i32 -> vector<8x768xf32>
    %c1_63 = arith.constant 1 : index
    %c3_64 = arith.constant 3 : index
    %c0_65 = arith.constant 0 : index
    %c0_66 = arith.constant 0 : index
    %68 = vector.load %arg2[%c1_63, %c3_64, %c0_65, %c0_66] : memref<6x9x8x8xf32, #tpu.memory_space<vmem>>, vector<1x1x8x8xf32>
    %69 = vector.shape_cast %68 : vector<1x1x8x8xf32> to vector<8x8xf32>
    %cst_67 = arith.constant dense<0.000000e+00> : vector<8x768xf32>
    %70 = tpu.matmul %69, %67, %cst_67 {dimension_numbers = #tpu.dot_dimension_numbers<[1], [0], [0], [1], [0, 0, 1, 1], [], []>} : vector<8x8xf32>, vector<8x768xf32>, vector<8x768xf32> -> vector<8x768xf32>
    %71 = arith.addf %66, %70 : vector<8x768xf32>
    %c1_68 = arith.constant 1 : index
    %c4_69 = arith.constant 4 : index
    %c0_70 = arith.constant 0 : index
    %c0_71 = arith.constant 0 : index
    %72 = vector.load %arg2[%c1_68, %c4_69, %c0_70, %c0_71] : memref<6x9x8x8xf32, #tpu.memory_space<vmem>>, vector<1x1x8x8xf32>
    %73 = vector.shape_cast %72 : vector<1x1x8x8xf32> to vector<8x8xf32>
    %cst_72 = arith.constant dense<0.000000e+00> : vector<8x768xf32>
    %74 = tpu.matmul %73, %52, %cst_72 {dimension_numbers = #tpu.dot_dimension_numbers<[1], [0], [0], [1], [0, 0, 1, 1], [], []>} : vector<8x8xf32>, vector<8x768xf32>, vector<8x768xf32> -> vector<8x768xf32>
    %75 = arith.addf %71, %74 : vector<8x768xf32>
    %c767_i32_73 = arith.constant 767 : i32
    %76 = tpu.dynamic_rotate %52 by %c767_i32_73 dim 1 : vector<8x768xf32>, i32 -> vector<8x768xf32>
    %c1_74 = arith.constant 1 : index
    %c5_75 = arith.constant 5 : index
    %c0_76 = arith.constant 0 : index
    %c0_77 = arith.constant 0 : index
    %77 = vector.load %arg2[%c1_74, %c5_75, %c0_76, %c0_77] : memref<6x9x8x8xf32, #tpu.memory_space<vmem>>, vector<1x1x8x8xf32>
    %78 = vector.shape_cast %77 : vector<1x1x8x8xf32> to vector<8x8xf32>
    %cst_78 = arith.constant dense<0.000000e+00> : vector<8x768xf32>
    %79 = tpu.matmul %78, %76, %cst_78 {dimension_numbers = #tpu.dot_dimension_numbers<[1], [0], [0], [1], [0, 0, 1, 1], [], []>} : vector<8x8xf32>, vector<8x768xf32>, vector<8x768xf32> -> vector<8x768xf32>
    %80 = arith.addf %75, %79 : vector<8x768xf32>
    %c751_i32_79 = arith.constant 751 : i32
    %81 = tpu.dynamic_rotate %52 by %c751_i32_79 dim 1 : vector<8x768xf32>, i32 -> vector<8x768xf32>
    %c1_80 = arith.constant 1 : index
    %c6_81 = arith.constant 6 : index
    %c0_82 = arith.constant 0 : index
    %c0_83 = arith.constant 0 : index
    %82 = vector.load %arg2[%c1_80, %c6_81, %c0_82, %c0_83] : memref<6x9x8x8xf32, #tpu.memory_space<vmem>>, vector<1x1x8x8xf32>
    %83 = vector.shape_cast %82 : vector<1x1x8x8xf32> to vector<8x8xf32>
    %cst_84 = arith.constant dense<0.000000e+00> : vector<8x768xf32>
    %84 = tpu.matmul %83, %81, %cst_84 {dimension_numbers = #tpu.dot_dimension_numbers<[1], [0], [0], [1], [0, 0, 1, 1], [], []>} : vector<8x8xf32>, vector<8x768xf32>, vector<8x768xf32> -> vector<8x768xf32>
    %85 = arith.addf %80, %84 : vector<8x768xf32>
    %c750_i32_85 = arith.constant 750 : i32
    %86 = tpu.dynamic_rotate %52 by %c750_i32_85 dim 1 : vector<8x768xf32>, i32 -> vector<8x768xf32>
    %c1_86 = arith.constant 1 : index
    %c7_87 = arith.constant 7 : index
    %c0_88 = arith.constant 0 : index
    %c0_89 = arith.constant 0 : index
    %87 = vector.load %arg2[%c1_86, %c7_87, %c0_88, %c0_89] : memref<6x9x8x8xf32, #tpu.memory_space<vmem>>, vector<1x1x8x8xf32>
    %88 = vector.shape_cast %87 : vector<1x1x8x8xf32> to vector<8x8xf32>
    %cst_90 = arith.constant dense<0.000000e+00> : vector<8x768xf32>
    %89 = tpu.matmul %88, %86, %cst_90 {dimension_numbers = #tpu.dot_dimension_numbers<[1], [0], [0], [1], [0, 0, 1, 1], [], []>} : vector<8x8xf32>, vector<8x768xf32>, vector<8x768xf32> -> vector<8x768xf32>
    %90 = arith.addf %85, %89 : vector<8x768xf32>
    %c749_i32_91 = arith.constant 749 : i32
    %91 = tpu.dynamic_rotate %52 by %c749_i32_91 dim 1 : vector<8x768xf32>, i32 -> vector<8x768xf32>
    %c1_92 = arith.constant 1 : index
    %c8_93 = arith.constant 8 : index
    %c0_94 = arith.constant 0 : index
    %c0_95 = arith.constant 0 : index
    %92 = vector.load %arg2[%c1_92, %c8_93, %c0_94, %c0_95] : memref<6x9x8x8xf32, #tpu.memory_space<vmem>>, vector<1x1x8x8xf32>
    %93 = vector.shape_cast %92 : vector<1x1x8x8xf32> to vector<8x8xf32>
    %cst_96 = arith.constant dense<0.000000e+00> : vector<8x768xf32>
    %94 = tpu.matmul %93, %91, %cst_96 {dimension_numbers = #tpu.dot_dimension_numbers<[1], [0], [0], [1], [0, 0, 1, 1], [], []>} : vector<8x8xf32>, vector<8x768xf32>, vector<8x768xf32> -> vector<8x768xf32>
    %95 = arith.addf %90, %94 : vector<8x768xf32>
    %c1_97 = arith.constant 1 : index
    %c0_98 = arith.constant 0 : index
    %c0_99 = arith.constant 0 : index
    %96 = vector.load %arg3[%c1_97, %c0_98, %c0_99] : memref<6x8x1xf32, #tpu.memory_space<vmem>>, vector<1x8x1xf32>
    %97 = vector.shape_cast %96 : vector<1x8x1xf32> to vector<8x1xf32>
    %98 = vector.broadcast %97 : vector<8x1xf32> to vector<8x768xf32>
    %99 = arith.addf %95, %98 : vector<8x768xf32>
    %cst_100 = arith.constant 0.000000e+00 : f32
    %100 = vector.broadcast %cst_100 : f32 to vector<8x768xf32>
    %101 = arith.maximumf %99, %100 : vector<8x768xf32>
    %102 = arith.mulf %101, %0 : vector<8x768xf32>
    %c19_i32_101 = arith.constant 19 : i32
    %103 = tpu.dynamic_rotate %102 by %c19_i32_101 dim 1 : vector<8x768xf32>, i32 -> vector<8x768xf32>
    %c2_102 = arith.constant 2 : index
    %c0_103 = arith.constant 0 : index
    %c0_104 = arith.constant 0 : index
    %c0_105 = arith.constant 0 : index
    %104 = vector.load %arg2[%c2_102, %c0_103, %c0_104, %c0_105] : memref<6x9x8x8xf32, #tpu.memory_space<vmem>>, vector<1x1x8x8xf32>
    %105 = vector.shape_cast %104 : vector<1x1x8x8xf32> to vector<8x8xf32>
    %cst_106 = arith.constant dense<0.000000e+00> : vector<8x768xf32>
    %106 = tpu.matmul %105, %103, %cst_106 {dimension_numbers = #tpu.dot_dimension_numbers<[1], [0], [0], [1], [0, 0, 1, 1], [], []>} : vector<8x8xf32>, vector<8x768xf32>, vector<8x768xf32> -> vector<8x768xf32>
    %c18_i32_107 = arith.constant 18 : i32
    %107 = tpu.dynamic_rotate %102 by %c18_i32_107 dim 1 : vector<8x768xf32>, i32 -> vector<8x768xf32>
    %c2_108 = arith.constant 2 : index
    %c1_109 = arith.constant 1 : index
    %c0_110 = arith.constant 0 : index
    %c0_111 = arith.constant 0 : index
    %108 = vector.load %arg2[%c2_108, %c1_109, %c0_110, %c0_111] : memref<6x9x8x8xf32, #tpu.memory_space<vmem>>, vector<1x1x8x8xf32>
    %109 = vector.shape_cast %108 : vector<1x1x8x8xf32> to vector<8x8xf32>
    %cst_112 = arith.constant dense<0.000000e+00> : vector<8x768xf32>
    %110 = tpu.matmul %109, %107, %cst_112 {dimension_numbers = #tpu.dot_dimension_numbers<[1], [0], [0], [1], [0, 0, 1, 1], [], []>} : vector<8x8xf32>, vector<8x768xf32>, vector<8x768xf32> -> vector<8x768xf32>
    %111 = arith.addf %106, %110 : vector<8x768xf32>
    %c17_i32_113 = arith.constant 17 : i32
    %112 = tpu.dynamic_rotate %102 by %c17_i32_113 dim 1 : vector<8x768xf32>, i32 -> vector<8x768xf32>
    %c2_114 = arith.constant 2 : index
    %c2_115 = arith.constant 2 : index
    %c0_116 = arith.constant 0 : index
    %c0_117 = arith.constant 0 : index
    %113 = vector.load %arg2[%c2_114, %c2_115, %c0_116, %c0_117] : memref<6x9x8x8xf32, #tpu.memory_space<vmem>>, vector<1x1x8x8xf32>
    %114 = vector.shape_cast %113 : vector<1x1x8x8xf32> to vector<8x8xf32>
    %cst_118 = arith.constant dense<0.000000e+00> : vector<8x768xf32>
    %115 = tpu.matmul %114, %112, %cst_118 {dimension_numbers = #tpu.dot_dimension_numbers<[1], [0], [0], [1], [0, 0, 1, 1], [], []>} : vector<8x8xf32>, vector<8x768xf32>, vector<8x768xf32> -> vector<8x768xf32>
    %116 = arith.addf %111, %115 : vector<8x768xf32>
    %c1_i32_119 = arith.constant 1 : i32
    %117 = tpu.dynamic_rotate %102 by %c1_i32_119 dim 1 : vector<8x768xf32>, i32 -> vector<8x768xf32>
    %c2_120 = arith.constant 2 : index
    %c3_121 = arith.constant 3 : index
    %c0_122 = arith.constant 0 : index
    %c0_123 = arith.constant 0 : index
    %118 = vector.load %arg2[%c2_120, %c3_121, %c0_122, %c0_123] : memref<6x9x8x8xf32, #tpu.memory_space<vmem>>, vector<1x1x8x8xf32>
    %119 = vector.shape_cast %118 : vector<1x1x8x8xf32> to vector<8x8xf32>
    %cst_124 = arith.constant dense<0.000000e+00> : vector<8x768xf32>
    %120 = tpu.matmul %119, %117, %cst_124 {dimension_numbers = #tpu.dot_dimension_numbers<[1], [0], [0], [1], [0, 0, 1, 1], [], []>} : vector<8x8xf32>, vector<8x768xf32>, vector<8x768xf32> -> vector<8x768xf32>
    %121 = arith.addf %116, %120 : vector<8x768xf32>
    %c2_125 = arith.constant 2 : index
    %c4_126 = arith.constant 4 : index
    %c0_127 = arith.constant 0 : index
    %c0_128 = arith.constant 0 : index
    %122 = vector.load %arg2[%c2_125, %c4_126, %c0_127, %c0_128] : memref<6x9x8x8xf32, #tpu.memory_space<vmem>>, vector<1x1x8x8xf32>
    %123 = vector.shape_cast %122 : vector<1x1x8x8xf32> to vector<8x8xf32>
    %cst_129 = arith.constant dense<0.000000e+00> : vector<8x768xf32>
    %124 = tpu.matmul %123, %102, %cst_129 {dimension_numbers = #tpu.dot_dimension_numbers<[1], [0], [0], [1], [0, 0, 1, 1], [], []>} : vector<8x8xf32>, vector<8x768xf32>, vector<8x768xf32> -> vector<8x768xf32>
    %125 = arith.addf %121, %124 : vector<8x768xf32>
    %c767_i32_130 = arith.constant 767 : i32
    %126 = tpu.dynamic_rotate %102 by %c767_i32_130 dim 1 : vector<8x768xf32>, i32 -> vector<8x768xf32>
    %c2_131 = arith.constant 2 : index
    %c5_132 = arith.constant 5 : index
    %c0_133 = arith.constant 0 : index
    %c0_134 = arith.constant 0 : index
    %127 = vector.load %arg2[%c2_131, %c5_132, %c0_133, %c0_134] : memref<6x9x8x8xf32, #tpu.memory_space<vmem>>, vector<1x1x8x8xf32>
    %128 = vector.shape_cast %127 : vector<1x1x8x8xf32> to vector<8x8xf32>
    %cst_135 = arith.constant dense<0.000000e+00> : vector<8x768xf32>
    %129 = tpu.matmul %128, %126, %cst_135 {dimension_numbers = #tpu.dot_dimension_numbers<[1], [0], [0], [1], [0, 0, 1, 1], [], []>} : vector<8x8xf32>, vector<8x768xf32>, vector<8x768xf32> -> vector<8x768xf32>
    %130 = arith.addf %125, %129 : vector<8x768xf32>
    %c751_i32_136 = arith.constant 751 : i32
    %131 = tpu.dynamic_rotate %102 by %c751_i32_136 dim 1 : vector<8x768xf32>, i32 -> vector<8x768xf32>
    %c2_137 = arith.constant 2 : index
    %c6_138 = arith.constant 6 : index
    %c0_139 = arith.constant 0 : index
    %c0_140 = arith.constant 0 : index
    %132 = vector.load %arg2[%c2_137, %c6_138, %c0_139, %c0_140] : memref<6x9x8x8xf32, #tpu.memory_space<vmem>>, vector<1x1x8x8xf32>
    %133 = vector.shape_cast %132 : vector<1x1x8x8xf32> to vector<8x8xf32>
    %cst_141 = arith.constant dense<0.000000e+00> : vector<8x768xf32>
    %134 = tpu.matmul %133, %131, %cst_141 {dimension_numbers = #tpu.dot_dimension_numbers<[1], [0], [0], [1], [0, 0, 1, 1], [], []>} : vector<8x8xf32>, vector<8x768xf32>, vector<8x768xf32> -> vector<8x768xf32>
    %135 = arith.addf %130, %134 : vector<8x768xf32>
    %c750_i32_142 = arith.constant 750 : i32
    %136 = tpu.dynamic_rotate %102 by %c750_i32_142 dim 1 : vector<8x768xf32>, i32 -> vector<8x768xf32>
    %c2_143 = arith.constant 2 : index
    %c7_144 = arith.constant 7 : index
    %c0_145 = arith.constant 0 : index
    %c0_146 = arith.constant 0 : index
    %137 = vector.load %arg2[%c2_143, %c7_144, %c0_145, %c0_146] : memref<6x9x8x8xf32, #tpu.memory_space<vmem>>, vector<1x1x8x8xf32>
    %138 = vector.shape_cast %137 : vector<1x1x8x8xf32> to vector<8x8xf32>
    %cst_147 = arith.constant dense<0.000000e+00> : vector<8x768xf32>
    %139 = tpu.matmul %138, %136, %cst_147 {dimension_numbers = #tpu.dot_dimension_numbers<[1], [0], [0], [1], [0, 0, 1, 1], [], []>} : vector<8x8xf32>, vector<8x768xf32>, vector<8x768xf32> -> vector<8x768xf32>
    %140 = arith.addf %135, %139 : vector<8x768xf32>
    %c749_i32_148 = arith.constant 749 : i32
    %141 = tpu.dynamic_rotate %102 by %c749_i32_148 dim 1 : vector<8x768xf32>, i32 -> vector<8x768xf32>
    %c2_149 = arith.constant 2 : index
    %c8_150 = arith.constant 8 : index
    %c0_151 = arith.constant 0 : index
    %c0_152 = arith.constant 0 : index
    %142 = vector.load %arg2[%c2_149, %c8_150, %c0_151, %c0_152] : memref<6x9x8x8xf32, #tpu.memory_space<vmem>>, vector<1x1x8x8xf32>
    %143 = vector.shape_cast %142 : vector<1x1x8x8xf32> to vector<8x8xf32>
    %cst_153 = arith.constant dense<0.000000e+00> : vector<8x768xf32>
    %144 = tpu.matmul %143, %141, %cst_153 {dimension_numbers = #tpu.dot_dimension_numbers<[1], [0], [0], [1], [0, 0, 1, 1], [], []>} : vector<8x8xf32>, vector<8x768xf32>, vector<8x768xf32> -> vector<8x768xf32>
    %145 = arith.addf %140, %144 : vector<8x768xf32>
    %c2_154 = arith.constant 2 : index
    %c0_155 = arith.constant 0 : index
    %c0_156 = arith.constant 0 : index
    %146 = vector.load %arg3[%c2_154, %c0_155, %c0_156] : memref<6x8x1xf32, #tpu.memory_space<vmem>>, vector<1x8x1xf32>
    %147 = vector.shape_cast %146 : vector<1x8x1xf32> to vector<8x1xf32>
    %148 = vector.broadcast %147 : vector<8x1xf32> to vector<8x768xf32>
    %149 = arith.addf %145, %148 : vector<8x768xf32>
    %cst_157 = arith.constant 0.000000e+00 : f32
    %150 = vector.broadcast %cst_157 : f32 to vector<8x768xf32>
    %151 = arith.maximumf %149, %150 : vector<8x768xf32>
    %152 = arith.mulf %151, %0 : vector<8x768xf32>
    %c19_i32_158 = arith.constant 19 : i32
    %153 = tpu.dynamic_rotate %152 by %c19_i32_158 dim 1 : vector<8x768xf32>, i32 -> vector<8x768xf32>
    %c3_159 = arith.constant 3 : index
    %c0_160 = arith.constant 0 : index
    %c0_161 = arith.constant 0 : index
    %c0_162 = arith.constant 0 : index
    %154 = vector.load %arg2[%c3_159, %c0_160, %c0_161, %c0_162] : memref<6x9x8x8xf32, #tpu.memory_space<vmem>>, vector<1x1x8x8xf32>
    %155 = vector.shape_cast %154 : vector<1x1x8x8xf32> to vector<8x8xf32>
    %cst_163 = arith.constant dense<0.000000e+00> : vector<8x768xf32>
    %156 = tpu.matmul %155, %153, %cst_163 {dimension_numbers = #tpu.dot_dimension_numbers<[1], [0], [0], [1], [0, 0, 1, 1], [], []>} : vector<8x8xf32>, vector<8x768xf32>, vector<8x768xf32> -> vector<8x768xf32>
    %c18_i32_164 = arith.constant 18 : i32
    %157 = tpu.dynamic_rotate %152 by %c18_i32_164 dim 1 : vector<8x768xf32>, i32 -> vector<8x768xf32>
    %c3_165 = arith.constant 3 : index
    %c1_166 = arith.constant 1 : index
    %c0_167 = arith.constant 0 : index
    %c0_168 = arith.constant 0 : index
    %158 = vector.load %arg2[%c3_165, %c1_166, %c0_167, %c0_168] : memref<6x9x8x8xf32, #tpu.memory_space<vmem>>, vector<1x1x8x8xf32>
    %159 = vector.shape_cast %158 : vector<1x1x8x8xf32> to vector<8x8xf32>
    %cst_169 = arith.constant dense<0.000000e+00> : vector<8x768xf32>
    %160 = tpu.matmul %159, %157, %cst_169 {dimension_numbers = #tpu.dot_dimension_numbers<[1], [0], [0], [1], [0, 0, 1, 1], [], []>} : vector<8x8xf32>, vector<8x768xf32>, vector<8x768xf32> -> vector<8x768xf32>
    %161 = arith.addf %156, %160 : vector<8x768xf32>
    %c17_i32_170 = arith.constant 17 : i32
    %162 = tpu.dynamic_rotate %152 by %c17_i32_170 dim 1 : vector<8x768xf32>, i32 -> vector<8x768xf32>
    %c3_171 = arith.constant 3 : index
    %c2_172 = arith.constant 2 : index
    %c0_173 = arith.constant 0 : index
    %c0_174 = arith.constant 0 : index
    %163 = vector.load %arg2[%c3_171, %c2_172, %c0_173, %c0_174] : memref<6x9x8x8xf32, #tpu.memory_space<vmem>>, vector<1x1x8x8xf32>
    %164 = vector.shape_cast %163 : vector<1x1x8x8xf32> to vector<8x8xf32>
    %cst_175 = arith.constant dense<0.000000e+00> : vector<8x768xf32>
    %165 = tpu.matmul %164, %162, %cst_175 {dimension_numbers = #tpu.dot_dimension_numbers<[1], [0], [0], [1], [0, 0, 1, 1], [], []>} : vector<8x8xf32>, vector<8x768xf32>, vector<8x768xf32> -> vector<8x768xf32>
    %166 = arith.addf %161, %165 : vector<8x768xf32>
    %c1_i32_176 = arith.constant 1 : i32
    %167 = tpu.dynamic_rotate %152 by %c1_i32_176 dim 1 : vector<8x768xf32>, i32 -> vector<8x768xf32>
    %c3_177 = arith.constant 3 : index
    %c3_178 = arith.constant 3 : index
    %c0_179 = arith.constant 0 : index
    %c0_180 = arith.constant 0 : index
    %168 = vector.load %arg2[%c3_177, %c3_178, %c0_179, %c0_180] : memref<6x9x8x8xf32, #tpu.memory_space<vmem>>, vector<1x1x8x8xf32>
    %169 = vector.shape_cast %168 : vector<1x1x8x8xf32> to vector<8x8xf32>
    %cst_181 = arith.constant dense<0.000000e+00> : vector<8x768xf32>
    %170 = tpu.matmul %169, %167, %cst_181 {dimension_numbers = #tpu.dot_dimension_numbers<[1], [0], [0], [1], [0, 0, 1, 1], [], []>} : vector<8x8xf32>, vector<8x768xf32>, vector<8x768xf32> -> vector<8x768xf32>
    %171 = arith.addf %166, %170 : vector<8x768xf32>
    %c3_182 = arith.constant 3 : index
    %c4_183 = arith.constant 4 : index
    %c0_184 = arith.constant 0 : index
    %c0_185 = arith.constant 0 : index
    %172 = vector.load %arg2[%c3_182, %c4_183, %c0_184, %c0_185] : memref<6x9x8x8xf32, #tpu.memory_space<vmem>>, vector<1x1x8x8xf32>
    %173 = vector.shape_cast %172 : vector<1x1x8x8xf32> to vector<8x8xf32>
    %cst_186 = arith.constant dense<0.000000e+00> : vector<8x768xf32>
    %174 = tpu.matmul %173, %152, %cst_186 {dimension_numbers = #tpu.dot_dimension_numbers<[1], [0], [0], [1], [0, 0, 1, 1], [], []>} : vector<8x8xf32>, vector<8x768xf32>, vector<8x768xf32> -> vector<8x768xf32>
    %175 = arith.addf %171, %174 : vector<8x768xf32>
    %c767_i32_187 = arith.constant 767 : i32
    %176 = tpu.dynamic_rotate %152 by %c767_i32_187 dim 1 : vector<8x768xf32>, i32 -> vector<8x768xf32>
    %c3_188 = arith.constant 3 : index
    %c5_189 = arith.constant 5 : index
    %c0_190 = arith.constant 0 : index
    %c0_191 = arith.constant 0 : index
    %177 = vector.load %arg2[%c3_188, %c5_189, %c0_190, %c0_191] : memref<6x9x8x8xf32, #tpu.memory_space<vmem>>, vector<1x1x8x8xf32>
    %178 = vector.shape_cast %177 : vector<1x1x8x8xf32> to vector<8x8xf32>
    %cst_192 = arith.constant dense<0.000000e+00> : vector<8x768xf32>
    %179 = tpu.matmul %178, %176, %cst_192 {dimension_numbers = #tpu.dot_dimension_numbers<[1], [0], [0], [1], [0, 0, 1, 1], [], []>} : vector<8x8xf32>, vector<8x768xf32>, vector<8x768xf32> -> vector<8x768xf32>
    %180 = arith.addf %175, %179 : vector<8x768xf32>
    %c751_i32_193 = arith.constant 751 : i32
    %181 = tpu.dynamic_rotate %152 by %c751_i32_193 dim 1 : vector<8x768xf32>, i32 -> vector<8x768xf32>
    %c3_194 = arith.constant 3 : index
    %c6_195 = arith.constant 6 : index
    %c0_196 = arith.constant 0 : index
    %c0_197 = arith.constant 0 : index
    %182 = vector.load %arg2[%c3_194, %c6_195, %c0_196, %c0_197] : memref<6x9x8x8xf32, #tpu.memory_space<vmem>>, vector<1x1x8x8xf32>
    %183 = vector.shape_cast %182 : vector<1x1x8x8xf32> to vector<8x8xf32>
    %cst_198 = arith.constant dense<0.000000e+00> : vector<8x768xf32>
    %184 = tpu.matmul %183, %181, %cst_198 {dimension_numbers = #tpu.dot_dimension_numbers<[1], [0], [0], [1], [0, 0, 1, 1], [], []>} : vector<8x8xf32>, vector<8x768xf32>, vector<8x768xf32> -> vector<8x768xf32>
    %185 = arith.addf %180, %184 : vector<8x768xf32>
    %c750_i32_199 = arith.constant 750 : i32
    %186 = tpu.dynamic_rotate %152 by %c750_i32_199 dim 1 : vector<8x768xf32>, i32 -> vector<8x768xf32>
    %c3_200 = arith.constant 3 : index
    %c7_201 = arith.constant 7 : index
    %c0_202 = arith.constant 0 : index
    %c0_203 = arith.constant 0 : index
    %187 = vector.load %arg2[%c3_200, %c7_201, %c0_202, %c0_203] : memref<6x9x8x8xf32, #tpu.memory_space<vmem>>, vector<1x1x8x8xf32>
    %188 = vector.shape_cast %187 : vector<1x1x8x8xf32> to vector<8x8xf32>
    %cst_204 = arith.constant dense<0.000000e+00> : vector<8x768xf32>
    %189 = tpu.matmul %188, %186, %cst_204 {dimension_numbers = #tpu.dot_dimension_numbers<[1], [0], [0], [1], [0, 0, 1, 1], [], []>} : vector<8x8xf32>, vector<8x768xf32>, vector<8x768xf32> -> vector<8x768xf32>
    %190 = arith.addf %185, %189 : vector<8x768xf32>
    %c749_i32_205 = arith.constant 749 : i32
    %191 = tpu.dynamic_rotate %152 by %c749_i32_205 dim 1 : vector<8x768xf32>, i32 -> vector<8x768xf32>
    %c3_206 = arith.constant 3 : index
    %c8_207 = arith.constant 8 : index
    %c0_208 = arith.constant 0 : index
    %c0_209 = arith.constant 0 : index
    %192 = vector.load %arg2[%c3_206, %c8_207, %c0_208, %c0_209] : memref<6x9x8x8xf32, #tpu.memory_space<vmem>>, vector<1x1x8x8xf32>
    %193 = vector.shape_cast %192 : vector<1x1x8x8xf32> to vector<8x8xf32>
    %cst_210 = arith.constant dense<0.000000e+00> : vector<8x768xf32>
    %194 = tpu.matmul %193, %191, %cst_210 {dimension_numbers = #tpu.dot_dimension_numbers<[1], [0], [0], [1], [0, 0, 1, 1], [], []>} : vector<8x8xf32>, vector<8x768xf32>, vector<8x768xf32> -> vector<8x768xf32>
    %195 = arith.addf %190, %194 : vector<8x768xf32>
    %c3_211 = arith.constant 3 : index
    %c0_212 = arith.constant 0 : index
    %c0_213 = arith.constant 0 : index
    %196 = vector.load %arg3[%c3_211, %c0_212, %c0_213] : memref<6x8x1xf32, #tpu.memory_space<vmem>>, vector<1x8x1xf32>
    %197 = vector.shape_cast %196 : vector<1x8x1xf32> to vector<8x1xf32>
    %198 = vector.broadcast %197 : vector<8x1xf32> to vector<8x768xf32>
    %199 = arith.addf %195, %198 : vector<8x768xf32>
    %200 = arith.addf %199, %102 : vector<8x768xf32>
    %cst_214 = arith.constant 0.000000e+00 : f32
    %201 = vector.broadcast %cst_214 : f32 to vector<8x768xf32>
    %202 = arith.maximumf %200, %201 : vector<8x768xf32>
    %203 = arith.mulf %202, %0 : vector<8x768xf32>
    %c19_i32_215 = arith.constant 19 : i32
    %204 = tpu.dynamic_rotate %203 by %c19_i32_215 dim 1 : vector<8x768xf32>, i32 -> vector<8x768xf32>
    %c4_216 = arith.constant 4 : index
    %c0_217 = arith.constant 0 : index
    %c0_218 = arith.constant 0 : index
    %c0_219 = arith.constant 0 : index
    %205 = vector.load %arg2[%c4_216, %c0_217, %c0_218, %c0_219] : memref<6x9x8x8xf32, #tpu.memory_space<vmem>>, vector<1x1x8x8xf32>
    %206 = vector.shape_cast %205 : vector<1x1x8x8xf32> to vector<8x8xf32>
    %cst_220 = arith.constant dense<0.000000e+00> : vector<8x768xf32>
    %207 = tpu.matmul %206, %204, %cst_220 {dimension_numbers = #tpu.dot_dimension_numbers<[1], [0], [0], [1], [0, 0, 1, 1], [], []>} : vector<8x8xf32>, vector<8x768xf32>, vector<8x768xf32> -> vector<8x768xf32>
    %c18_i32_221 = arith.constant 18 : i32
    %208 = tpu.dynamic_rotate %203 by %c18_i32_221 dim 1 : vector<8x768xf32>, i32 -> vector<8x768xf32>
    %c4_222 = arith.constant 4 : index
    %c1_223 = arith.constant 1 : index
    %c0_224 = arith.constant 0 : index
    %c0_225 = arith.constant 0 : index
    %209 = vector.load %arg2[%c4_222, %c1_223, %c0_224, %c0_225] : memref<6x9x8x8xf32, #tpu.memory_space<vmem>>, vector<1x1x8x8xf32>
    %210 = vector.shape_cast %209 : vector<1x1x8x8xf32> to vector<8x8xf32>
    %cst_226 = arith.constant dense<0.000000e+00> : vector<8x768xf32>
    %211 = tpu.matmul %210, %208, %cst_226 {dimension_numbers = #tpu.dot_dimension_numbers<[1], [0], [0], [1], [0, 0, 1, 1], [], []>} : vector<8x8xf32>, vector<8x768xf32>, vector<8x768xf32> -> vector<8x768xf32>
    %212 = arith.addf %207, %211 : vector<8x768xf32>
    %c17_i32_227 = arith.constant 17 : i32
    %213 = tpu.dynamic_rotate %203 by %c17_i32_227 dim 1 : vector<8x768xf32>, i32 -> vector<8x768xf32>
    %c4_228 = arith.constant 4 : index
    %c2_229 = arith.constant 2 : index
    %c0_230 = arith.constant 0 : index
    %c0_231 = arith.constant 0 : index
    %214 = vector.load %arg2[%c4_228, %c2_229, %c0_230, %c0_231] : memref<6x9x8x8xf32, #tpu.memory_space<vmem>>, vector<1x1x8x8xf32>
    %215 = vector.shape_cast %214 : vector<1x1x8x8xf32> to vector<8x8xf32>
    %cst_232 = arith.constant dense<0.000000e+00> : vector<8x768xf32>
    %216 = tpu.matmul %215, %213, %cst_232 {dimension_numbers = #tpu.dot_dimension_numbers<[1], [0], [0], [1], [0, 0, 1, 1], [], []>} : vector<8x8xf32>, vector<8x768xf32>, vector<8x768xf32> -> vector<8x768xf32>
    %217 = arith.addf %212, %216 : vector<8x768xf32>
    %c1_i32_233 = arith.constant 1 : i32
    %218 = tpu.dynamic_rotate %203 by %c1_i32_233 dim 1 : vector<8x768xf32>, i32 -> vector<8x768xf32>
    %c4_234 = arith.constant 4 : index
    %c3_235 = arith.constant 3 : index
    %c0_236 = arith.constant 0 : index
    %c0_237 = arith.constant 0 : index
    %219 = vector.load %arg2[%c4_234, %c3_235, %c0_236, %c0_237] : memref<6x9x8x8xf32, #tpu.memory_space<vmem>>, vector<1x1x8x8xf32>
    %220 = vector.shape_cast %219 : vector<1x1x8x8xf32> to vector<8x8xf32>
    %cst_238 = arith.constant dense<0.000000e+00> : vector<8x768xf32>
    %221 = tpu.matmul %220, %218, %cst_238 {dimension_numbers = #tpu.dot_dimension_numbers<[1], [0], [0], [1], [0, 0, 1, 1], [], []>} : vector<8x8xf32>, vector<8x768xf32>, vector<8x768xf32> -> vector<8x768xf32>
    %222 = arith.addf %217, %221 : vector<8x768xf32>
    %c4_239 = arith.constant 4 : index
    %c4_240 = arith.constant 4 : index
    %c0_241 = arith.constant 0 : index
    %c0_242 = arith.constant 0 : index
    %223 = vector.load %arg2[%c4_239, %c4_240, %c0_241, %c0_242] : memref<6x9x8x8xf32, #tpu.memory_space<vmem>>, vector<1x1x8x8xf32>
    %224 = vector.shape_cast %223 : vector<1x1x8x8xf32> to vector<8x8xf32>
    %cst_243 = arith.constant dense<0.000000e+00> : vector<8x768xf32>
    %225 = tpu.matmul %224, %203, %cst_243 {dimension_numbers = #tpu.dot_dimension_numbers<[1], [0], [0], [1], [0, 0, 1, 1], [], []>} : vector<8x8xf32>, vector<8x768xf32>, vector<8x768xf32> -> vector<8x768xf32>
    %226 = arith.addf %222, %225 : vector<8x768xf32>
    %c767_i32_244 = arith.constant 767 : i32
    %227 = tpu.dynamic_rotate %203 by %c767_i32_244 dim 1 : vector<8x768xf32>, i32 -> vector<8x768xf32>
    %c4_245 = arith.constant 4 : index
    %c5_246 = arith.constant 5 : index
    %c0_247 = arith.constant 0 : index
    %c0_248 = arith.constant 0 : index
    %228 = vector.load %arg2[%c4_245, %c5_246, %c0_247, %c0_248] : memref<6x9x8x8xf32, #tpu.memory_space<vmem>>, vector<1x1x8x8xf32>
    %229 = vector.shape_cast %228 : vector<1x1x8x8xf32> to vector<8x8xf32>
    %cst_249 = arith.constant dense<0.000000e+00> : vector<8x768xf32>
    %230 = tpu.matmul %229, %227, %cst_249 {dimension_numbers = #tpu.dot_dimension_numbers<[1], [0], [0], [1], [0, 0, 1, 1], [], []>} : vector<8x8xf32>, vector<8x768xf32>, vector<8x768xf32> -> vector<8x768xf32>
    %231 = arith.addf %226, %230 : vector<8x768xf32>
    %c751_i32_250 = arith.constant 751 : i32
    %232 = tpu.dynamic_rotate %203 by %c751_i32_250 dim 1 : vector<8x768xf32>, i32 -> vector<8x768xf32>
    %c4_251 = arith.constant 4 : index
    %c6_252 = arith.constant 6 : index
    %c0_253 = arith.constant 0 : index
    %c0_254 = arith.constant 0 : index
    %233 = vector.load %arg2[%c4_251, %c6_252, %c0_253, %c0_254] : memref<6x9x8x8xf32, #tpu.memory_space<vmem>>, vector<1x1x8x8xf32>
    %234 = vector.shape_cast %233 : vector<1x1x8x8xf32> to vector<8x8xf32>
    %cst_255 = arith.constant dense<0.000000e+00> : vector<8x768xf32>
    %235 = tpu.matmul %234, %232, %cst_255 {dimension_numbers = #tpu.dot_dimension_numbers<[1], [0], [0], [1], [0, 0, 1, 1], [], []>} : vector<8x8xf32>, vector<8x768xf32>, vector<8x768xf32> -> vector<8x768xf32>
    %236 = arith.addf %231, %235 : vector<8x768xf32>
    %c750_i32_256 = arith.constant 750 : i32
    %237 = tpu.dynamic_rotate %203 by %c750_i32_256 dim 1 : vector<8x768xf32>, i32 -> vector<8x768xf32>
    %c4_257 = arith.constant 4 : index
    %c7_258 = arith.constant 7 : index
    %c0_259 = arith.constant 0 : index
    %c0_260 = arith.constant 0 : index
    %238 = vector.load %arg2[%c4_257, %c7_258, %c0_259, %c0_260] : memref<6x9x8x8xf32, #tpu.memory_space<vmem>>, vector<1x1x8x8xf32>
    %239 = vector.shape_cast %238 : vector<1x1x8x8xf32> to vector<8x8xf32>
    %cst_261 = arith.constant dense<0.000000e+00> : vector<8x768xf32>
    %240 = tpu.matmul %239, %237, %cst_261 {dimension_numbers = #tpu.dot_dimension_numbers<[1], [0], [0], [1], [0, 0, 1, 1], [], []>} : vector<8x8xf32>, vector<8x768xf32>, vector<8x768xf32> -> vector<8x768xf32>
    %241 = arith.addf %236, %240 : vector<8x768xf32>
    %c749_i32_262 = arith.constant 749 : i32
    %242 = tpu.dynamic_rotate %203 by %c749_i32_262 dim 1 : vector<8x768xf32>, i32 -> vector<8x768xf32>
    %c4_263 = arith.constant 4 : index
    %c8_264 = arith.constant 8 : index
    %c0_265 = arith.constant 0 : index
    %c0_266 = arith.constant 0 : index
    %243 = vector.load %arg2[%c4_263, %c8_264, %c0_265, %c0_266] : memref<6x9x8x8xf32, #tpu.memory_space<vmem>>, vector<1x1x8x8xf32>
    %244 = vector.shape_cast %243 : vector<1x1x8x8xf32> to vector<8x8xf32>
    %cst_267 = arith.constant dense<0.000000e+00> : vector<8x768xf32>
    %245 = tpu.matmul %244, %242, %cst_267 {dimension_numbers = #tpu.dot_dimension_numbers<[1], [0], [0], [1], [0, 0, 1, 1], [], []>} : vector<8x8xf32>, vector<8x768xf32>, vector<8x768xf32> -> vector<8x768xf32>
    %246 = arith.addf %241, %245 : vector<8x768xf32>
    %c4_268 = arith.constant 4 : index
    %c0_269 = arith.constant 0 : index
    %c0_270 = arith.constant 0 : index
    %247 = vector.load %arg3[%c4_268, %c0_269, %c0_270] : memref<6x8x1xf32, #tpu.memory_space<vmem>>, vector<1x8x1xf32>
    %248 = vector.shape_cast %247 : vector<1x8x1xf32> to vector<8x1xf32>
    %249 = vector.broadcast %248 : vector<8x1xf32> to vector<8x768xf32>
    %250 = arith.addf %246, %249 : vector<8x768xf32>
    %cst_271 = arith.constant 0.000000e+00 : f32
    %251 = vector.broadcast %cst_271 : f32 to vector<8x768xf32>
    %252 = arith.maximumf %250, %251 : vector<8x768xf32>
    %253 = arith.mulf %252, %0 : vector<8x768xf32>
    %c19_i32_272 = arith.constant 19 : i32
    %254 = tpu.dynamic_rotate %253 by %c19_i32_272 dim 1 : vector<8x768xf32>, i32 -> vector<8x768xf32>
    %c5_273 = arith.constant 5 : index
    %c0_274 = arith.constant 0 : index
    %c0_275 = arith.constant 0 : index
    %c0_276 = arith.constant 0 : index
    %255 = vector.load %arg2[%c5_273, %c0_274, %c0_275, %c0_276] : memref<6x9x8x8xf32, #tpu.memory_space<vmem>>, vector<1x1x8x8xf32>
    %256 = vector.shape_cast %255 : vector<1x1x8x8xf32> to vector<8x8xf32>
    %cst_277 = arith.constant dense<0.000000e+00> : vector<8x768xf32>
    %257 = tpu.matmul %256, %254, %cst_277 {dimension_numbers = #tpu.dot_dimension_numbers<[1], [0], [0], [1], [0, 0, 1, 1], [], []>} : vector<8x8xf32>, vector<8x768xf32>, vector<8x768xf32> -> vector<8x768xf32>
    %c18_i32_278 = arith.constant 18 : i32
    %258 = tpu.dynamic_rotate %253 by %c18_i32_278 dim 1 : vector<8x768xf32>, i32 -> vector<8x768xf32>
    %c5_279 = arith.constant 5 : index
    %c1_280 = arith.constant 1 : index
    %c0_281 = arith.constant 0 : index
    %c0_282 = arith.constant 0 : index
    %259 = vector.load %arg2[%c5_279, %c1_280, %c0_281, %c0_282] : memref<6x9x8x8xf32, #tpu.memory_space<vmem>>, vector<1x1x8x8xf32>
    %260 = vector.shape_cast %259 : vector<1x1x8x8xf32> to vector<8x8xf32>
    %cst_283 = arith.constant dense<0.000000e+00> : vector<8x768xf32>
    %261 = tpu.matmul %260, %258, %cst_283 {dimension_numbers = #tpu.dot_dimension_numbers<[1], [0], [0], [1], [0, 0, 1, 1], [], []>} : vector<8x8xf32>, vector<8x768xf32>, vector<8x768xf32> -> vector<8x768xf32>
    %262 = arith.addf %257, %261 : vector<8x768xf32>
    %c17_i32_284 = arith.constant 17 : i32
    %263 = tpu.dynamic_rotate %253 by %c17_i32_284 dim 1 : vector<8x768xf32>, i32 -> vector<8x768xf32>
    %c5_285 = arith.constant 5 : index
    %c2_286 = arith.constant 2 : index
    %c0_287 = arith.constant 0 : index
    %c0_288 = arith.constant 0 : index
    %264 = vector.load %arg2[%c5_285, %c2_286, %c0_287, %c0_288] : memref<6x9x8x8xf32, #tpu.memory_space<vmem>>, vector<1x1x8x8xf32>
    %265 = vector.shape_cast %264 : vector<1x1x8x8xf32> to vector<8x8xf32>
    %cst_289 = arith.constant dense<0.000000e+00> : vector<8x768xf32>
    %266 = tpu.matmul %265, %263, %cst_289 {dimension_numbers = #tpu.dot_dimension_numbers<[1], [0], [0], [1], [0, 0, 1, 1], [], []>} : vector<8x8xf32>, vector<8x768xf32>, vector<8x768xf32> -> vector<8x768xf32>
    %267 = arith.addf %262, %266 : vector<8x768xf32>
    %c1_i32_290 = arith.constant 1 : i32
    %268 = tpu.dynamic_rotate %253 by %c1_i32_290 dim 1 : vector<8x768xf32>, i32 -> vector<8x768xf32>
    %c5_291 = arith.constant 5 : index
    %c3_292 = arith.constant 3 : index
    %c0_293 = arith.constant 0 : index
    %c0_294 = arith.constant 0 : index
    %269 = vector.load %arg2[%c5_291, %c3_292, %c0_293, %c0_294] : memref<6x9x8x8xf32, #tpu.memory_space<vmem>>, vector<1x1x8x8xf32>
    %270 = vector.shape_cast %269 : vector<1x1x8x8xf32> to vector<8x8xf32>
    %cst_295 = arith.constant dense<0.000000e+00> : vector<8x768xf32>
    %271 = tpu.matmul %270, %268, %cst_295 {dimension_numbers = #tpu.dot_dimension_numbers<[1], [0], [0], [1], [0, 0, 1, 1], [], []>} : vector<8x8xf32>, vector<8x768xf32>, vector<8x768xf32> -> vector<8x768xf32>
    %272 = arith.addf %267, %271 : vector<8x768xf32>
    %c5_296 = arith.constant 5 : index
    %c4_297 = arith.constant 4 : index
    %c0_298 = arith.constant 0 : index
    %c0_299 = arith.constant 0 : index
    %273 = vector.load %arg2[%c5_296, %c4_297, %c0_298, %c0_299] : memref<6x9x8x8xf32, #tpu.memory_space<vmem>>, vector<1x1x8x8xf32>
    %274 = vector.shape_cast %273 : vector<1x1x8x8xf32> to vector<8x8xf32>
    %cst_300 = arith.constant dense<0.000000e+00> : vector<8x768xf32>
    %275 = tpu.matmul %274, %253, %cst_300 {dimension_numbers = #tpu.dot_dimension_numbers<[1], [0], [0], [1], [0, 0, 1, 1], [], []>} : vector<8x8xf32>, vector<8x768xf32>, vector<8x768xf32> -> vector<8x768xf32>
    %276 = arith.addf %272, %275 : vector<8x768xf32>
    %c767_i32_301 = arith.constant 767 : i32
    %277 = tpu.dynamic_rotate %253 by %c767_i32_301 dim 1 : vector<8x768xf32>, i32 -> vector<8x768xf32>
    %c5_302 = arith.constant 5 : index
    %c5_303 = arith.constant 5 : index
    %c0_304 = arith.constant 0 : index
    %c0_305 = arith.constant 0 : index
    %278 = vector.load %arg2[%c5_302, %c5_303, %c0_304, %c0_305] : memref<6x9x8x8xf32, #tpu.memory_space<vmem>>, vector<1x1x8x8xf32>
    %279 = vector.shape_cast %278 : vector<1x1x8x8xf32> to vector<8x8xf32>
    %cst_306 = arith.constant dense<0.000000e+00> : vector<8x768xf32>
    %280 = tpu.matmul %279, %277, %cst_306 {dimension_numbers = #tpu.dot_dimension_numbers<[1], [0], [0], [1], [0, 0, 1, 1], [], []>} : vector<8x8xf32>, vector<8x768xf32>, vector<8x768xf32> -> vector<8x768xf32>
    %281 = arith.addf %276, %280 : vector<8x768xf32>
    %c751_i32_307 = arith.constant 751 : i32
    %282 = tpu.dynamic_rotate %253 by %c751_i32_307 dim 1 : vector<8x768xf32>, i32 -> vector<8x768xf32>
    %c5_308 = arith.constant 5 : index
    %c6_309 = arith.constant 6 : index
    %c0_310 = arith.constant 0 : index
    %c0_311 = arith.constant 0 : index
    %283 = vector.load %arg2[%c5_308, %c6_309, %c0_310, %c0_311] : memref<6x9x8x8xf32, #tpu.memory_space<vmem>>, vector<1x1x8x8xf32>
    %284 = vector.shape_cast %283 : vector<1x1x8x8xf32> to vector<8x8xf32>
    %cst_312 = arith.constant dense<0.000000e+00> : vector<8x768xf32>
    %285 = tpu.matmul %284, %282, %cst_312 {dimension_numbers = #tpu.dot_dimension_numbers<[1], [0], [0], [1], [0, 0, 1, 1], [], []>} : vector<8x8xf32>, vector<8x768xf32>, vector<8x768xf32> -> vector<8x768xf32>
    %286 = arith.addf %281, %285 : vector<8x768xf32>
    %c750_i32_313 = arith.constant 750 : i32
    %287 = tpu.dynamic_rotate %253 by %c750_i32_313 dim 1 : vector<8x768xf32>, i32 -> vector<8x768xf32>
    %c5_314 = arith.constant 5 : index
    %c7_315 = arith.constant 7 : index
    %c0_316 = arith.constant 0 : index
    %c0_317 = arith.constant 0 : index
    %288 = vector.load %arg2[%c5_314, %c7_315, %c0_316, %c0_317] : memref<6x9x8x8xf32, #tpu.memory_space<vmem>>, vector<1x1x8x8xf32>
    %289 = vector.shape_cast %288 : vector<1x1x8x8xf32> to vector<8x8xf32>
    %cst_318 = arith.constant dense<0.000000e+00> : vector<8x768xf32>
    %290 = tpu.matmul %289, %287, %cst_318 {dimension_numbers = #tpu.dot_dimension_numbers<[1], [0], [0], [1], [0, 0, 1, 1], [], []>} : vector<8x8xf32>, vector<8x768xf32>, vector<8x768xf32> -> vector<8x768xf32>
    %291 = arith.addf %286, %290 : vector<8x768xf32>
    %c749_i32_319 = arith.constant 749 : i32
    %292 = tpu.dynamic_rotate %253 by %c749_i32_319 dim 1 : vector<8x768xf32>, i32 -> vector<8x768xf32>
    %c5_320 = arith.constant 5 : index
    %c8_321 = arith.constant 8 : index
    %c0_322 = arith.constant 0 : index
    %c0_323 = arith.constant 0 : index
    %293 = vector.load %arg2[%c5_320, %c8_321, %c0_322, %c0_323] : memref<6x9x8x8xf32, #tpu.memory_space<vmem>>, vector<1x1x8x8xf32>
    %294 = vector.shape_cast %293 : vector<1x1x8x8xf32> to vector<8x8xf32>
    %cst_324 = arith.constant dense<0.000000e+00> : vector<8x768xf32>
    %295 = tpu.matmul %294, %292, %cst_324 {dimension_numbers = #tpu.dot_dimension_numbers<[1], [0], [0], [1], [0, 0, 1, 1], [], []>} : vector<8x8xf32>, vector<8x768xf32>, vector<8x768xf32> -> vector<8x768xf32>
    %296 = arith.addf %291, %295 : vector<8x768xf32>
    %c5_325 = arith.constant 5 : index
    %c0_326 = arith.constant 0 : index
    %c0_327 = arith.constant 0 : index
    %297 = vector.load %arg3[%c5_325, %c0_326, %c0_327] : memref<6x8x1xf32, #tpu.memory_space<vmem>>, vector<1x8x1xf32>
    %298 = vector.shape_cast %297 : vector<1x8x1xf32> to vector<8x1xf32>
    %299 = vector.broadcast %298 : vector<8x1xf32> to vector<8x768xf32>
    %300 = arith.addf %296, %299 : vector<8x768xf32>
    %301 = arith.addf %300, %203 : vector<8x768xf32>
    %cst_328 = arith.constant 0.000000e+00 : f32
    %302 = vector.broadcast %cst_328 : f32 to vector<8x768xf32>
    %303 = arith.maximumf %301, %302 : vector<8x768xf32>
    %304 = arith.mulf %303, %0 : vector<8x768xf32>
    %c0_329 = arith.constant 0 : index
    %c0_330 = arith.constant 0 : index
    %c0_331 = arith.constant 0 : index
    %305 = vector.load %arg5[%c0_329, %c0_330, %c0_331] : memref<1x8x768xf32, #tpu.memory_space<vmem>>, vector<1x8x768xf32>
    %306 = vector.shape_cast %305 : vector<1x8x768xf32> to vector<8x768xf32>
    %307 = vector.shape_cast %304 : vector<8x768xf32> to vector<1x8x768xf32>
    tpu.vector_store %arg5[%c0_329, %c0_330, %c0_331], %307 {strides = array<i32>} : memref<1x8x768xf32, #tpu.memory_space<vmem>>, vector<1x8x768xf32>,
    return
  }
  func.func @transform_0(%arg0: i32) -> (i32, i32, i32) {
    %c0_i32 = arith.constant 0 : i32
    %c0_i32_0 = arith.constant 0 : i32
    %c0_i32_1 = arith.constant 0 : i32
    return %arg0, %c0_i32, %c0_i32_0 : i32, i32, i32
  }
  func.func @transform_1(%arg0: i32) -> (i32, i32, i32, i32) {
    %c0_i32 = arith.constant 0 : i32
    %c0_i32_0 = arith.constant 0 : i32
    %c0_i32_1 = arith.constant 0 : i32
    %c0_i32_2 = arith.constant 0 : i32
    %c0_i32_3 = arith.constant 0 : i32
    return %c0_i32, %c0_i32_0, %c0_i32_1, %c0_i32_2 : i32, i32, i32, i32
  }
  func.func @transform_2(%arg0: i32) -> (i32, i32, i32) {
    %c0_i32 = arith.constant 0 : i32
    %c0_i32_0 = arith.constant 0 : i32
    %c0_i32_1 = arith.constant 0 : i32
    %c0_i32_2 = arith.constant 0 : i32
    return %c0_i32, %c0_i32_0, %c0_i32_1 : i32, i32, i32
  }
  func.func @transform_3(%arg0: i32) -> (i32, i32) {
    %c0_i32 = arith.constant 0 : i32
    %c0_i32_0 = arith.constant 0 : i32
    %c0_i32_1 = arith.constant 0 : i32
    return %c0_i32, %c0_i32_0 : i32, i32
  }
  func.func @transform_4(%arg0: i32) -> (i32, i32, i32) {
    %c0_i32 = arith.constant 0 : i32
    %c0_i32_0 = arith.constant 0 : i32
    %c0_i32_1 = arith.constant 0 : i32
    return %arg0, %c0_i32, %c0_i32_0 : i32, i32, i32
  }
}

</mosaic_0001>

<bundles_post_ra>
// kernel: tpu_custom_call.1
= control target key start
LH: loop header
LB: loop body
LE: loop exit
PB: predicated region body
PF: predicated region fallthrough
CT: control target
= control target key end

     0   :  { %s13666_s19 = smov 18   ;;  %v13667_v4 = vmov 0.0   ;;  %s15644_s0 = inlined_call_operand.vmem [shape: f32[1,8,768], index: 0, kind: input, shape index: {}]   ;;  %s15645_s1 = inlined_call_operand.vmem [shape: f32[6,9,8,8], index: 1, kind: input, shape index: {}]   ;;  %s15646_s2 = inlined_call_operand.vmem [shape: f32[6,8,1], index: 2, kind: input, shape index: {}]   ;;  %s15647_s3 = inlined_call_operand.vmem [shape: f32[8,768], index: 3, kind: input, shape index: {}]   ;;  %s15648_s4 = inlined_call_operand.hbm [shape: f32[1,8,768], index: 4, kind: output, shape index: {}]  }
   0x1   :  { %v13705_v0 = vld [vmem:[%s15644_s0 + $0x28] sm:$0xff]  ;;  %v13710_v1 = vld [vmem:[%s15644_s0] sm:$0xff]  ;;  %v13719_v2 = vld [vmem:[%s15644_s0 + $0x10] sm:$0xff]  ;;  %141 = vmatprep.mubr.f32.mxu0 %v13667_v4  ;;  %2319 = vmatprep.mubr.f32.mxu1 %v13667_v4 }
   0x2   :  { %62 = vrot.lane.b32.xlu1 %v13705_v0, %s13666_s19  ;;  %52 = vrot.lane.b32.xlu0 %v13710_v1, %s13666_s19  ;;  %v13724_v3 = vld [vmem:[%s15644_s0 + $0x8] sm:$0xff] }
   0x3   :  { %9 = vsyncpa [#allocation3], 0  ;;  %v13735_v5 = vld [vmem:[%s15644_s0 + $0x20] sm:$0xff]  ;;  %v13740_v6 = vld [vmem:[%s15644_s0 + $0x18] sm:$0xff]  ;;  %s13668_s28 = smov 19   ;;  %s13669_s0 = smov 17   ;;  %v42_v9 = vlaneseq }
   0x4   :  { %s13670_s29 = smov 1   ;;  %s13671_s30 = smov 127   ;;  %v2188_v7 = vld [vmem:[%s15646_s2] sm:$0xff]  ;;  %v13675_v8 = vmov 0   ;;  %v13109_v16 = vld [vmem:[%s15645_s1 + $0x8] sm:$0xff]  ;;  %vm73_vm1 = vcmask 64512  }
   0x5   :  { %s13672_s5 = smov 111   ;;  %s13673_s6 = smov 110   ;;  %13628 = vset.pattern.permute.xlu0 %v13675_v8  ;;  %13629 = vset.pattern.permute.xlu1 %v13675_v8  ;;  %v13833_v10 = vand.u32 127, %v42_v9  ;;  %v51_v30 = vld [vmem:[%s15645_s1] sm:$0xff]  ;;  %v13116_v43 = vld [vmem:[%s15645_s1 + $0x10] sm:$0xff]  ;;  %v13120_v56 = vld [vmem:[%s15645_s1 + $0x18] sm:$0xff] }
   0x6   :  { %56 = vrot.lane.b32.xlu1 %v13719_v2, %s13666_s19  ;;  %54 = vrot.lane.b32.xlu0 %v13724_v3, %s13666_s19  ;;  %s13674_s7 = smov 109  }
   0x7   :  { %vm64_vm0 = vcmp.lt.s32.totalorder %v13833_v10, 18  ;;  %vm44_vm2 = vcmp.lt.s32.totalorder %v13833_v10, 19  ;;  %vm518_vm3 = vcmp.lt.s32.totalorder %v13833_v10, 17  ;;  %vm761_vm4 = vcmp.lt.s32.totalorder %v13833_v10, 1 }
   0x8   :  { %vm1228_vm5 = vcmp.lt.s32.totalorder %v13833_v10, 127  ;;  %vm1471_vm6 = vcmp.lt.s32.totalorder %v13833_v10, 111  ;;  %vm1714_vm7 = vcmp.lt.s32.totalorder %v13833_v10, 110  ;;  %vm1957_vm8 = vcmp.lt.s32.totalorder %v13833_v10, 109 }
   0xa   :  { %60 = vrot.lane.b32.xlu1 %v13735_v5, %s13666_s19  ;;  %58 = vrot.lane.b32.xlu0 %v13740_v6, %s13666_s19 }
   0xe   :  { %32 = vrot.lane.b32.xlu1 %v13724_v3, %s13668_s28  ;;  %30 = vrot.lane.b32.xlu0 %v13710_v1, %s13668_s28 }
  0x12   :  { %34 = vrot.lane.b32.xlu1 %v13719_v2, %s13668_s28  ;;  %40 = vrot.lane.b32.xlu0 %v13705_v0, %s13668_s28 }
  0x16   :  { %38 = vrot.lane.b32.xlu1 %v13735_v5, %s13668_s28  ;;  %36 = vrot.lane.b32.xlu0 %v13740_v6, %s13668_s28 }
  0x1a   :  { %508 = vrot.lane.b32.xlu1 %v13724_v3, %s13669_s0  ;;  %506 = vrot.lane.b32.xlu0 %v13710_v1, %s13669_s0 }
  0x1e   :  { %510 = vrot.lane.b32.xlu1 %v13719_v2, %s13669_s0  ;;  %516 = vrot.lane.b32.xlu0 %v13705_v0, %s13669_s0 }
  0x22   :  { %514 = vrot.lane.b32.xlu1 %v13735_v5, %s13669_s0  ;;  %512 = vrot.lane.b32.xlu0 %v13740_v6, %s13669_s0 }
  0x26   :  { %751 = vrot.lane.b32.xlu1 %v13724_v3, %s13670_s29  ;;  %749 = vrot.lane.b32.xlu0 %v13710_v1, %s13670_s29 }
  0x2a   :  { %753 = vrot.lane.b32.xlu1 %v13719_v2, %s13670_s29  ;;  %759 = vrot.lane.b32.xlu0 %v13705_v0, %s13670_s29 }
  0x2e   :  { %757 = vrot.lane.b32.xlu1 %v13735_v5, %s13670_s29  ;;  %755 = vrot.lane.b32.xlu0 %v13740_v6, %s13670_s29 }
  0x32   :  { %1220 = vrot.lane.b32.xlu1 %v13719_v2, %s13671_s30  ;;  %1218 = vrot.lane.b32.xlu0 %v13724_v3, %s13671_s30 }
  0x36   :  { %1222 = vrot.lane.b32.xlu1 %v13740_v6, %s13671_s30  ;;  %1216 = vrot.lane.b32.xlu0 %v13710_v1, %s13671_s30 }
  0x3a   :  { %1226 = vrot.lane.b32.xlu1 %v13705_v0, %s13671_s30  ;;  %1224 = vrot.lane.b32.xlu0 %v13735_v5, %s13671_s30 }
  0x3e   :  { %1463 = vrot.lane.b32.xlu1 %v13719_v2, %s13672_s5  ;;  %1461 = vrot.lane.b32.xlu0 %v13724_v3, %s13672_s5 }
  0x42   :  { %1465 = vrot.lane.b32.xlu1 %v13740_v6, %s13672_s5  ;;  %1459 = vrot.lane.b32.xlu0 %v13710_v1, %s13672_s5 }
  0x46   :  { %1469 = vrot.lane.b32.xlu1 %v13705_v0, %s13672_s5  ;;  %1467 = vrot.lane.b32.xlu0 %v13735_v5, %s13672_s5 }
  0x4a   :  { %1706 = vrot.lane.b32.xlu1 %v13719_v2, %s13673_s6  ;;  %1704 = vrot.lane.b32.xlu0 %v13724_v3, %s13673_s6 }
  0x4e   :  { %1708 = vrot.lane.b32.xlu1 %v13740_v6, %s13673_s6  ;;  %1702 = vrot.lane.b32.xlu0 %v13710_v1, %s13673_s6 }
  0x52   :  { %1712 = vrot.lane.b32.xlu1 %v13705_v0, %s13673_s6  ;;  %1710 = vrot.lane.b32.xlu0 %v13735_v5, %s13673_s6 }
  0x56   :  { %1949 = vrot.lane.b32.xlu1 %v13719_v2, %s13674_s7  ;;  %1947 = vrot.lane.b32.xlu0 %v13724_v3, %s13674_s7 }
  0x5a   :  { %1951 = vrot.lane.b32.xlu1 %v13740_v6, %s13674_s7  ;;  %1945 = vrot.lane.b32.xlu0 %v13710_v1, %s13674_s7 }
  0x5e   :  { %1955 = vrot.lane.b32.xlu1 %v13705_v0, %s13674_s7  ;;  %1953 = vrot.lane.b32.xlu0 %v13735_v5, %s13674_s7 }
  0x62   :  { %2191 = vperm.xlu0 %13628, %v2188_v7  }
  0x74   :  { %v63_v11 = vpop.permute.xlu1 %62  ;;  %v53_v12 = vpop.permute.xlu0 %52 }
  0x75   :  { %v70_v17 = vsel %vm64_vm0, %v63_v11, %v53_v12 }
  0x78   :  { %v57_v13 = vpop.permute.xlu1 %56  ;;  %v55_v14 = vpop.permute.xlu0 %54 }
  0x79   :  { %v69_v15 = vsel %vm64_vm0, %v53_v12, %v55_v14  ;;  %v68_v21 = vsel %vm64_vm0, %v55_v14, %v57_v13 }
  0x7a   :  { %77 = vmatprep.subr.mxu0 %v69_v15 }
  0x7b   :  { %78 = vmatpush1.msra.mxu0 %v70_v17 }
  0x7c   :  { %v61_v18 = vpop.permute.xlu1 %60  ;;  %13110 = vmatmul.mubr.msk.f32.vlgmr.msra.gmra.mrb[0].mxu0 %vm73_vm1, %v13109_v16  ;;  %v59_v19 = vpop.permute.xlu0 %58 }
  0x7d   :  { %v67_v20 = vsel %vm64_vm0, %v57_v13, %v59_v19  ;;  %212 = vmatprep.mubr.f32.mxu0 %v13667_v4  ;;  %v65_v22 = vsel %vm64_vm0, %v61_v18, %v63_v11  ;;  %v66_v25 = vsel %vm64_vm0, %v59_v19, %v61_v18  ;;  %v13124_v11 = vld [vmem:[%s15645_s1 + $0x20] sm:$0xff] }
  0x7e   :  { %148 = vmatprep.subr.mxu0 %v67_v20 }
  0x7f   :  { %149 = vmatpush1.msra.mxu0 %v68_v21 }
  0x80   :  { %v33_v23 = vpop.permute.xlu1 %32  ;;  %13111 = vmatmul.mubr.msk.f32.vlgmr.msra.gmra.mrb[2].mxu0 %vm73_vm1, %v13109_v16  ;;  %219 = vmatprep.subr.mxu0 %v65_v22  ;;  %v31_v24 = vpop.permute.xlu0 %30 }
  0x81   :  { %220 = vmatpush1.msra.mxu0 %v66_v25  ;;  %v49_v26 = vsel %vm44_vm2, %v31_v24, %v33_v23  ;;  %283 = vmatprep.mubr.f32.mxu0 %v13667_v4 }
  0x82   :  { %293 = vmatprep.subr.mxu0 %v49_v26 }
  0x84   :  { %v35_v27 = vpop.permute.xlu1 %34  ;;  %13112 = vmatmul.mubr.msk.f32.vlgmr.msra.gmra.mrb[4].mxu0 %vm73_vm1, %v13109_v16  ;;  %v41_v28 = vpop.permute.xlu0 %40 }
  0x85   :  { %v50_v29 = vsel %vm44_vm2, %v41_v28, %v31_v24  ;;  %357 = vmatprep.mubr.f32.mxu0 %v13667_v4  ;;  %v48_v34 = vsel %vm44_vm2, %v33_v23, %v35_v27 }
  0x86   :  { %294 = vmatpush1.msra.mxu0 %v50_v29 }
  0x88   :  { %v39_v31 = vpop.permute.xlu1 %38  ;;  %13113 = vmatmul.mubr.msk.f32.vlgmr.msra.gmra.mrb[0].mxu0 %vm73_vm1, %v51_v30  ;;  %v37_v32 = vpop.permute.xlu0 %36 }
  0x89   :  { %v47_v33 = vsel %vm44_vm2, %v35_v27, %v37_v32  ;;  %428 = vmatprep.mubr.f32.mxu0 %v13667_v4  ;;  %v45_v35 = vsel %vm44_vm2, %v39_v31, %v41_v28  ;;  %v46_v38 = vsel %vm44_vm2, %v37_v32, %v39_v31  ;;  %v13132_v27 = vld [vmem:[%s15645_s1 + $0x30] sm:$0xff] }
  0x8a   :  { %364 = vmatprep.subr.mxu0 %v47_v33 }
  0x8b   :  { %365 = vmatpush1.msra.mxu0 %v48_v34 }
  0x8c   :  { %v509_v36 = vpop.permute.xlu1 %508  ;;  %13114 = vmatmul.mubr.msk.f32.vlgmr.msra.gmra.mrb[2].mxu0 %vm73_vm1, %v51_v30  ;;  %435 = vmatprep.subr.mxu0 %v45_v35  ;;  %v507_v37 = vpop.permute.xlu0 %506 }
  0x8d   :  { %436 = vmatpush1.msra.mxu0 %v46_v38  ;;  %v523_v39 = vsel %vm518_vm3, %v507_v37, %v509_v36  ;;  %499 = vmatprep.mubr.f32.mxu0 %v13667_v4  ;;  %v13136_v38 = vld [vmem:[%s15645_s1 + $0x38] sm:$0xff] }
  0x8e   :  { %530 = vmatprep.subr.mxu0 %v523_v39 }
  0x90   :  { %v511_v40 = vpop.permute.xlu1 %510  ;;  %13115 = vmatmul.mubr.msk.f32.vlgmr.msra.gmra.mrb[4].mxu0 %vm73_vm1, %v51_v30  ;;  %v517_v41 = vpop.permute.xlu0 %516 }
  0x91   :  { %v524_v42 = vsel %vm518_vm3, %v517_v41, %v507_v37  ;;  %594 = vmatprep.mubr.f32.mxu0 %v13667_v4  ;;  %v522_v47 = vsel %vm518_vm3, %v509_v36, %v511_v40 }
  0x92   :  { %531 = vmatpush1.msra.mxu0 %v524_v42 }
  0x94   :  { %v515_v44 = vpop.permute.xlu1 %514  ;;  %13117 = vmatmul.mubr.msk.f32.vlgmr.msra.gmra.mrb[0].mxu0 %vm73_vm1, %v13116_v43  ;;  %v513_v45 = vpop.permute.xlu0 %512 }
  0x95   :  { %v521_v46 = vsel %vm518_vm3, %v511_v40, %v513_v45  ;;  %665 = vmatprep.mubr.f32.mxu0 %v13667_v4  ;;  %v519_v48 = vsel %vm518_vm3, %v515_v44, %v517_v41  ;;  %v520_v51 = vsel %vm518_vm3, %v513_v45, %v515_v44 }
  0x96   :  { %601 = vmatprep.subr.mxu0 %v521_v46 }
  0x97   :  { %602 = vmatpush1.msra.mxu0 %v522_v47 }
  0x98   :  { %v752_v49 = vpop.permute.xlu1 %751  ;;  %13118 = vmatmul.mubr.msk.f32.vlgmr.msra.gmra.mrb[2].mxu0 %vm73_vm1, %v13116_v43  ;;  %672 = vmatprep.subr.mxu0 %v519_v48  ;;  %v750_v50 = vpop.permute.xlu0 %749 }
  0x99   :  { %673 = vmatpush1.msra.mxu0 %v520_v51  ;;  %v766_v52 = vsel %vm761_vm4, %v750_v50, %v752_v49  ;;  %736 = vmatprep.mubr.f32.mxu0 %v13667_v4 }
  0x9a   :  { %773 = vmatprep.subr.mxu0 %v766_v52 }
  0x9c   :  { %v754_v53 = vpop.permute.xlu1 %753  ;;  %13119 = vmatmul.mubr.msk.f32.vlgmr.msra.gmra.mrb[4].mxu0 %vm73_vm1, %v13116_v43  ;;  %v760_v54 = vpop.permute.xlu0 %759 }
  0x9d   :  { %v767_v55 = vsel %vm761_vm4, %v760_v54, %v750_v50  ;;  %837 = vmatprep.mubr.f32.mxu0 %v13667_v4  ;;  %v765_v60 = vsel %vm761_vm4, %v752_v49, %v754_v53  ;;  %v13140_v49 = vld [vmem:[%s15645_s1 + $0x40] sm:$0xff] }
  0x9e   :  { %774 = vmatpush1.msra.mxu0 %v767_v55 }
  0xa0   :  { %v758_v57 = vpop.permute.xlu1 %757  ;;  %13121 = vmatmul.mubr.msk.f32.vlgmr.msra.gmra.mrb[0].mxu0 %vm73_vm1, %v13120_v56  ;;  %v756_v58 = vpop.permute.xlu0 %755 }
  0xa1   :  { %v764_v59 = vsel %vm761_vm4, %v754_v53, %v756_v58  ;;  %908 = vmatprep.mubr.f32.mxu0 %v13667_v4  ;;  %v762_v61 = vsel %vm761_vm4, %v758_v57, %v760_v54  ;;  %v763_v62 = vsel %vm761_vm4, %v756_v58, %v758_v57  ;;  %v14029_v58 = vld [vmem:[%s15647_s3] sm:$0xff] }
  0xa2   :  { %844 = vmatprep.subr.mxu0 %v764_v59 }
  0xa3   :  { %845 = vmatpush1.msra.mxu0 %v765_v60 }
  0xa4   :  { %13122 = vmatmul.mubr.msk.f32.vlgmr.msra.gmra.mrb[2].mxu0 %vm73_vm1, %v13120_v56  ;;  %915 = vmatprep.subr.mxu0 %v762_v61  ;;  %v1221_v63 = vpop.permute.xlu1 %1220  ;;  %v1219_v7 = vpop.permute.xlu0 %1218 }
  0xa5   :  { %916 = vmatpush1.msra.mxu0 %v763_v62  ;;  %979 = vmatprep.mubr.f32.mxu0 %v13667_v4 }
  0xa6   :  { %997 = vmatprep.subr.mxu0 %v13724_v3 }
  0xa8   :  { %13123 = vmatmul.mubr.msk.f32.vlgmr.msra.gmra.mrb[4].mxu0 %vm73_vm1, %v13120_v56  ;;  %v1223_v8 = vpop.permute.xlu1 %1222  ;;  %v1217_v9 = vpop.permute.xlu0 %1216 }
  0xa9   :  { %998 = vmatpush1.msra.mxu0 %v13710_v1  ;;  %1061 = vmatprep.mubr.f32.mxu0 %v13667_v4  ;;  %v1232_v1 = vsel %vm1228_vm5, %v1219_v7, %v1221_v63  ;;  %v1231_v16 = vsel %vm1228_vm5, %v1221_v63, %v1223_v8 }
  0xaa   :  { %1068 = vmatprep.subr.mxu0 %v13740_v6 }
  0xac   :  { %13125 = vmatmul.mubr.msk.f32.vlgmr.msra.gmra.mrb[0].mxu0 %vm73_vm1, %v13124_v11  ;;  %v1227_v12 = vpop.permute.xlu1 %1226  ;;  %v1225_v3 = vpop.permute.xlu0 %1224 }
  0xad   :  { %1069 = vmatpush1.msra.mxu0 %v13719_v2  ;;  %1132 = vmatprep.mubr.f32.mxu0 %v13667_v4  ;;  %v1230_v6 = vsel %vm1228_vm5, %v1223_v8, %v1225_v3  ;;  %v1234_v19 = vsel %vm1228_vm5, %v1227_v12, %v1217_v9  ;;  %v1229_v21 = vsel %vm1228_vm5, %v1225_v3, %v1227_v12 }
  0xae   :  { %1139 = vmatprep.subr.mxu0 %v13705_v0  ;;  %v1233_v0 = vsel %vm1228_vm5, %v1217_v9, %v1219_v7  ;;  %v14037_v9 = vld [vmem:[%s15647_s3 + $0x8] sm:$0xff] }
  0xb0   :  { %13126 = vmatmul.mubr.msk.f32.vlgmr.msra.gmra.mrb[2].mxu0 %vm73_vm1, %v13124_v11  ;;  %v1464_v13 = vpop.permute.xlu1 %1463  ;;  %v1462_v14 = vpop.permute.xlu0 %1461 }
  0xb1   :  { %1140 = vmatpush1.msra.mxu0 %v13735_v5  ;;  %1203 = vmatprep.mubr.f32.mxu0 %v13667_v4  ;;  %v13128_v5 = vld [vmem:[%s15645_s1 + $0x28] sm:$0xff]  ;;  %v1475_v20 = vsel %vm1471_vm6, %v1462_v14, %v1464_v13 }
  0xb2   :  { %1240 = vmatprep.subr.mxu0 %v1232_v1 }
  0xb4   :  { %13127 = vmatmul.mubr.msk.f32.vlgmr.msra.gmra.mrb[4].mxu0 %vm73_vm1, %v13124_v11  ;;  %v1466_v2 = vpop.permute.xlu1 %1465  ;;  %v1460_v15 = vpop.permute.xlu0 %1459 }
  0xb5   :  { %1241 = vmatpush1.msra.mxu0 %v1233_v0  ;;  %1304 = vmatprep.mubr.f32.mxu0 %v13667_v4  ;;  %v1476_v25 = vsel %vm1471_vm6, %v1460_v15, %v1462_v14  ;;  %v1474_v29 = vsel %vm1471_vm6, %v1464_v13, %v1466_v2  ;;  %v14047_v14 = vld [vmem:[%s15647_s3 + $0x10] sm:$0xff] }
  0xb6   :  { %1311 = vmatprep.subr.mxu0 %v1230_v6 }
  0xb8   :  { %13129 = vmatmul.mubr.msk.f32.vlgmr.msra.gmra.mrb[0].mxu0 %vm73_vm1, %v13128_v5  ;;  %v1470_v17 = vpop.permute.xlu1 %1469  ;;  %v1468_v18 = vpop.permute.xlu0 %1467 }
  0xb9   :  { %1312 = vmatpush1.msra.mxu0 %v1231_v16  ;;  %1375 = vmatprep.mubr.f32.mxu0 %v13667_v4  ;;  %v1473_v24 = vsel %vm1471_vm6, %v1466_v2, %v1468_v18  ;;  %v1477_v31 = vsel %vm1471_vm6, %v1470_v17, %v1460_v15  ;;  %v1472_v33 = vsel %vm1471_vm6, %v1468_v18, %v1470_v17  ;;  %v14052_v2 = vld [vmem:[%s15647_s3 + $0x28] sm:$0xff]  ;;  %v14062_v18 = vld [vmem:[%s15647_s3 + $0x20] sm:$0xff] }
  0xba   :  { %1382 = vmatprep.subr.mxu0 %v1234_v19 }
  0xbc   :  { %13130 = vmatmul.mubr.msk.f32.vlgmr.msra.gmra.mrb[2].mxu0 %vm73_vm1, %v13128_v5  ;;  %v1707_v22 = vpop.permute.xlu1 %1706  ;;  %v1705_v23 = vpop.permute.xlu0 %1704 }
  0xbd   :  { %1383 = vmatpush1.msra.mxu0 %v1229_v21  ;;  %1446 = vmatprep.mubr.f32.mxu0 %v13667_v4  ;;  %v1718_v32 = vsel %vm1714_vm7, %v1705_v23, %v1707_v22 }
  0xbe   :  { %1483 = vmatprep.subr.mxu0 %v1475_v20  ;;  %v14070_v20 = vld [vmem:[%s15647_s3 + $0x18] sm:$0xff] }
  0xc0   :  { %13131 = vmatmul.mubr.msk.f32.vlgmr.msra.gmra.mrb[4].mxu0 %vm73_vm1, %v13128_v5  ;;  %v1703_v26 = vpop.permute.xlu0 %1702  ;;  %v1709_v28 = vpop.permute.xlu1 %1708 }
  0xc1   :  { %1484 = vmatpush1.msra.mxu0 %v1476_v25  ;;  %1547 = vmatprep.mubr.f32.mxu0 %v13667_v4  ;;  %v1719_v37 = vsel %vm1714_vm7, %v1703_v26, %v1705_v23  ;;  %v1717_v41 = vsel %vm1714_vm7, %v1707_v22, %v1709_v28  ;;  %v13180_v23 = vld [vmem:[%s15646_s2 + $0x8] sm:$0xff] }
  0xc2   :  { %1554 = vmatprep.subr.mxu0 %v1473_v24 }
  0xc4   :  { %13133 = vmatmul.mubr.msk.f32.vlgmr.msra.gmra.mrb[0].mxu0 %vm73_vm1, %v13132_v27  ;;  %v1711_v30 = vpop.permute.xlu0 %1710  ;;  %v1713_v34 = vpop.permute.xlu1 %1712 }
  0xc5   :  { %1555 = vmatpush1.msra.mxu0 %v1474_v29  ;;  %1618 = vmatprep.mubr.f32.mxu0 %v13667_v4  ;;  %v1716_v36 = vsel %vm1714_vm7, %v1709_v28, %v1711_v30  ;;  %v1720_v42 = vsel %vm1714_vm7, %v1713_v34, %v1703_v26  ;;  %v1715_v45 = vsel %vm1714_vm7, %v1711_v30, %v1713_v34  ;;  %v13145_v29 = vld [vmem:[%s15645_s1 + $0x50] sm:$0xff] }
  0xc6   :  { %1625 = vmatprep.subr.mxu0 %v1477_v31 }
  0xc8   :  { %13134 = vmatmul.mubr.msk.f32.vlgmr.msra.gmra.mrb[2].mxu0 %vm73_vm1, %v13132_v27  ;;  %v1948_v35 = vpop.permute.xlu0 %1947  ;;  %v1950_v39 = vpop.permute.xlu1 %1949 }
  0xc9   :  { %1626 = vmatpush1.msra.mxu0 %v1472_v33  ;;  %1689 = vmatprep.mubr.f32.mxu0 %v13667_v4  ;;  %v1961_v43 = vsel %vm1957_vm8, %v1948_v35, %v1950_v39 }
  0xca   :  { %1726 = vmatprep.subr.mxu0 %v1718_v32 }
  0xcc   :  { %13135 = vmatmul.mubr.msk.f32.vlgmr.msra.gmra.mrb[4].mxu0 %vm73_vm1, %v13132_v27  ;;  %v1946_v40 = vpop.permute.xlu0 %1945  ;;  %v1952_v44 = vpop.permute.xlu1 %1951 }
  0xcd   :  { %1727 = vmatpush1.msra.mxu0 %v1719_v37  ;;  %1790 = vmatprep.mubr.f32.mxu0 %v13667_v4  ;;  %v1962_v48 = vsel %vm1957_vm8, %v1946_v40, %v1948_v35  ;;  %v1960_v51 = vsel %vm1957_vm8, %v1950_v39, %v1952_v44 }
  0xce   :  { %1797 = vmatprep.subr.mxu0 %v1716_v36 }
  0xd0   :  { %13137 = vmatmul.mubr.msk.f32.vlgmr.msra.gmra.mrb[0].mxu0 %vm73_vm1, %v13136_v38  ;;  %v1954_v46 = vpop.permute.xlu0 %1953  ;;  %v1956_v50 = vpop.permute.xlu1 %1955 }
  0xd1   :  { %1798 = vmatpush1.msra.mxu0 %v1717_v41  ;;  %1861 = vmatprep.mubr.f32.mxu0 %v13667_v4  ;;  %v1959_v47 = vsel %vm1957_vm8, %v1952_v44, %v1954_v46  ;;  %v1963_v52 = vsel %vm1957_vm8, %v1956_v50, %v1946_v40  ;;  %v1958_v53 = vsel %vm1957_vm8, %v1954_v46, %v1956_v50 }
  0xd2   :  { %1868 = vmatprep.subr.mxu0 %v1720_v42 }
  0xd4   :  { %13138 = vmatmul.mubr.msk.f32.vlgmr.msra.gmra.mrb[2].mxu0 %vm73_vm1, %v13136_v38 }
  0xd5   :  { %1869 = vmatpush1.msra.mxu0 %v1715_v45  ;;  %1932 = vmatprep.mubr.f32.mxu0 %v13667_v4 }
  0xd6   :  { %1969 = vmatprep.subr.mxu0 %v1961_v43  ;;  %v13144_v43 = vld [vmem:[%s15645_s1 + $0x48] sm:$0xff] }
  0xd8   :  { %13139 = vmatmul.mubr.msk.f32.vlgmr.msra.gmra.mrb[4].mxu0 %vm73_vm1, %v13136_v38 }
  0xd9   :  { %1970 = vmatpush1.msra.mxu0 %v1962_v48  ;;  %2033 = vmatprep.mubr.f32.mxu0 %v13667_v4 }
  0xda   :  { %2040 = vmatprep.subr.mxu0 %v1959_v47 }
  0xdc   :  { %13141 = vmatmul.mubr.msk.f32.vlgmr.msra.gmra.mrb[0].mxu0 %vm73_vm1, %v13140_v49 }
  0xdd   :  { %2041 = vmatpush1.msra.mxu0 %v1960_v51  ;;  %2104 = vmatprep.mubr.f32.mxu0 %v13667_v4 }
  0xde   :  { %2111 = vmatprep.subr.mxu0 %v1963_v52 }
  0xe0   :  { %13142 = vmatmul.mubr.msk.f32.vlgmr.msra.gmra.mrb[2].mxu0 %vm73_vm1, %v13140_v49 }
  0xe1   :  { %2112 = vmatpush1.msra.mxu0 %v1958_v53  ;;  %2175 = vmatprep.mubr.f32.mxu0 %v13667_v4  ;;  %v2192_v54 = vpop.permute.xlu0 %2191 }
  0xe4   :  { %13143 = vmatmul.mubr.msk.f32.vlgmr.msra.gmra.mrb[4].mxu0 %vm73_vm1, %v13140_v49 }
  0xe5   :  { %4492 = vmatprep.mubr.f32.mxu0 %v13667_v4 }
 0x1af   :  { %v2035_v55 = vpop.f32.mrb[0].mxu0 }
 0x1b0   :  { %v2194_v56 = vadd.f32 %v2192_v54, %v2035_v55  ;;  %v2037_v57 = vpop.f32.mrb[1].mxu0 }
 0x1b1   :  { %v2195_v59 = vadd.f32 %v2192_v54, %v2037_v57 }
 0x1b2   :  { %v2200_v60 = vmax.f32 %v2194_v56, 0.0  ;;  %v13152_v56 = vld [vmem:[%s15645_s1 + $0x58] sm:$0xff] }
 0x1b3   :  { %v2106_v61 = vpop.f32.mrb[2].mxu0  ;;  %v2201_v63 = vmax.f32 %v2195_v59, 0.0 }
 0x1b4   :  { %v14032_v62 = vmul.f32 %v2200_v60, %v14029_v58  ;;  %v2196_v7 = vadd.f32 %v2192_v54, %v2106_v61  ;;  %v2108_v8 = vpop.f32.mrb[3].mxu0 }
 0x1b5   :  { %v14042_v12 = vmul.f32 %v2201_v63, %v14037_v9  ;;  %v2197_v6 = vadd.f32 %v2192_v54, %v2108_v8 }
 0x1b6   :  { %2232 = vrot.lane.b32.xlu1 %v14032_v62, %s13666_s19  ;;  %v2202_v3 = vmax.f32 %v2196_v7, 0.0 }
 0x1b7   :  { %v2177_v11 = vpop.f32.mrb[4].mxu0  ;;  %v2203_v17 = vmax.f32 %v2197_v6, 0.0 }
 0x1b8   :  { %v2198_v1 = vadd.f32 %v2192_v54, %v2177_v11  ;;  %v2179_v13 = vpop.f32.mrb[5].mxu0  ;;  %v14057_v5 = vmul.f32 %v2202_v3, %v14047_v14 }
 0x1b9   :  { %v2199_v0 = vadd.f32 %v2192_v54, %v2179_v13  ;;  %v14080_v22 = vmul.f32 %v2203_v17, %v14070_v20 }
 0x1ba   :  { %2234 = vrot.lane.b32.xlu1 %v14042_v12, %s13666_s19  ;;  %v2204_v16 = vmax.f32 %v2198_v1, 0.0 }
 0x1bb   :  { %v2205_v15 = vmax.f32 %v2199_v0, 0.0  ;;  %v13156_v0 = vld [vmem:[%s15645_s1 + $0x60] sm:$0xff] }
 0x1bc   :  { %v14077_v21 = vmul.f32 %v2204_v16, %v14062_v18 }
 0x1bd   :  { %v14065_v19 = vmul.f32 %v2205_v15, %v14052_v2 }
 0x1be   :  { %2236 = vrot.lane.b32.xlu1 %v14057_v5, %s13666_s19 }
 0x1bf   :  { %2242 = vrot.lane.b32.xlu0 %v14065_v19, %s13666_s19 }
 0x1c2   :  { %2240 = vrot.lane.b32.xlu1 %v14077_v21, %s13666_s19 }
 0x1c3   :  { %2238 = vrot.lane.b32.xlu0 %v14080_v22, %s13666_s19 }
 0x1c6   :  { %2214 = vrot.lane.b32.xlu1 %v14042_v12, %s13668_s28 }
 0x1c7   :  { %2212 = vrot.lane.b32.xlu0 %v14032_v62, %s13668_s28 }
 0x1ca   :  { %2216 = vrot.lane.b32.xlu1 %v14057_v5, %s13668_s28 }
 0x1cb   :  { %2222 = vrot.lane.b32.xlu0 %v14065_v19, %s13668_s28 }
 0x1ce   :  { %2220 = vrot.lane.b32.xlu1 %v14077_v21, %s13668_s28 }
 0x1cf   :  { %2218 = vrot.lane.b32.xlu0 %v14080_v22, %s13668_s28 }
 0x1d2   :  { %2686 = vrot.lane.b32.xlu1 %v14042_v12, %s13669_s0 }
 0x1d3   :  { %2684 = vrot.lane.b32.xlu0 %v14032_v62, %s13669_s0 }
 0x1d6   :  { %2688 = vrot.lane.b32.xlu1 %v14057_v5, %s13669_s0 }
 0x1d7   :  { %2694 = vrot.lane.b32.xlu0 %v14065_v19, %s13669_s0 }
 0x1da   :  { %2692 = vrot.lane.b32.xlu1 %v14077_v21, %s13669_s0 }
 0x1db   :  { %2690 = vrot.lane.b32.xlu0 %v14080_v22, %s13669_s0 }
 0x1de   :  { %2928 = vrot.lane.b32.xlu1 %v14042_v12, %s13670_s29 }
 0x1df   :  { %2926 = vrot.lane.b32.xlu0 %v14032_v62, %s13670_s29 }
 0x1e2   :  { %2930 = vrot.lane.b32.xlu1 %v14057_v5, %s13670_s29 }
 0x1e3   :  { %2936 = vrot.lane.b32.xlu0 %v14065_v19, %s13670_s29 }
 0x1e6   :  { %2934 = vrot.lane.b32.xlu1 %v14077_v21, %s13670_s29 }
 0x1e7   :  { %2932 = vrot.lane.b32.xlu0 %v14080_v22, %s13670_s29 }
 0x1ea   :  { %3396 = vrot.lane.b32.xlu1 %v14057_v5, %s13671_s30 }
 0x1eb   :  { %3394 = vrot.lane.b32.xlu0 %v14042_v12, %s13671_s30 }
 0x1ee   :  { %3398 = vrot.lane.b32.xlu1 %v14080_v22, %s13671_s30 }
 0x1ef   :  { %3392 = vrot.lane.b32.xlu0 %v14032_v62, %s13671_s30 }
 0x1f2   :  { %3402 = vrot.lane.b32.xlu1 %v14065_v19, %s13671_s30 }
 0x1f3   :  { %3400 = vrot.lane.b32.xlu0 %v14077_v21, %s13671_s30 }
 0x1f6   :  { %3638 = vrot.lane.b32.xlu1 %v14057_v5, %s13672_s5 }
 0x1f7   :  { %3636 = vrot.lane.b32.xlu0 %v14042_v12, %s13672_s5 }
 0x1fa   :  { %3640 = vrot.lane.b32.xlu1 %v14080_v22, %s13672_s5 }
 0x1fb   :  { %3634 = vrot.lane.b32.xlu0 %v14032_v62, %s13672_s5 }
 0x1fe   :  { %3644 = vrot.lane.b32.xlu1 %v14065_v19, %s13672_s5 }
 0x1ff   :  { %3642 = vrot.lane.b32.xlu0 %v14077_v21, %s13672_s5 }
 0x202   :  { %3880 = vrot.lane.b32.xlu1 %v14057_v5, %s13673_s6 }
 0x203   :  { %3878 = vrot.lane.b32.xlu0 %v14042_v12, %s13673_s6 }
 0x206   :  { %3882 = vrot.lane.b32.xlu1 %v14080_v22, %s13673_s6 }
 0x207   :  { %3876 = vrot.lane.b32.xlu0 %v14032_v62, %s13673_s6 }
 0x20a   :  { %3886 = vrot.lane.b32.xlu1 %v14065_v19, %s13673_s6 }
 0x20b   :  { %3884 = vrot.lane.b32.xlu0 %v14077_v21, %s13673_s6 }
 0x20e   :  { %4122 = vrot.lane.b32.xlu1 %v14057_v5, %s13674_s7 }
 0x20f   :  { %4120 = vrot.lane.b32.xlu0 %v14042_v12, %s13674_s7 }
 0x212   :  { %4124 = vrot.lane.b32.xlu1 %v14080_v22, %s13674_s7 }
 0x213   :  { %4118 = vrot.lane.b32.xlu0 %v14032_v62, %s13674_s7 }
 0x216   :  { %4128 = vrot.lane.b32.xlu1 %v14065_v19, %s13674_s7 }
 0x217   :  { %4126 = vrot.lane.b32.xlu0 %v14077_v21, %s13674_s7 }
 0x21b   :  { %4364 = vperm.xlu0 %13628, %v13180_v23  }
 0x228   :  { %v2233_v24 = vpop.permute.xlu1 %2232 }
 0x22c   :  { %v2235_v25 = vpop.permute.xlu1 %2234 }
 0x22d   :  { %v2248_v26 = vsel %vm64_vm0, %v2233_v24, %v2235_v25 }
 0x22e   :  { %2255 = vmatprep.subr.mxu1 %v2248_v26 }
 0x230   :  { %v2237_v27 = vpop.permute.xlu1 %2236 }
 0x231   :  { %v2243_v28 = vpop.permute.xlu0 %2242  ;;  %v2247_v34 = vsel %vm64_vm0, %v2235_v25, %v2237_v27 }
 0x232   :  { %v2249_v30 = vsel %vm64_vm0, %v2243_v28, %v2233_v24 }
 0x233   :  { %2256 = vmatpush1.msra.mxu1 %v2249_v30  ;;  %v13160_v30 = vld [vmem:[%s15645_s1 + $0x68] sm:$0xff] }
 0x234   :  { %v2241_v31 = vpop.permute.xlu1 %2240  ;;  %13146 = vmatmul.mubr.msk.f32.vlgmr.msra.gmra.mrb[0].mxu1 %vm73_vm1, %v13145_v29 }
 0x235   :  { %v2239_v32 = vpop.permute.xlu0 %2238  ;;  %2390 = vmatprep.mubr.f32.mxu1 %v13667_v4  ;;  %v2244_v36 = vsel %vm64_vm0, %v2241_v31, %v2243_v28 }
 0x236   :  { %v2246_v33 = vsel %vm64_vm0, %v2237_v27, %v2239_v32  ;;  %v2245_v38 = vsel %vm64_vm0, %v2239_v32, %v2241_v31 }
 0x237   :  { %2326 = vmatprep.subr.mxu1 %v2246_v33 }
 0x238   :  { %2327 = vmatpush1.msra.mxu1 %v2247_v34  ;;  %v2215_v35 = vpop.permute.xlu1 %2214 }
 0x239   :  { %v2213_v37 = vpop.permute.xlu0 %2212  ;;  %13147 = vmatmul.mubr.msk.f32.vlgmr.msra.gmra.mrb[2].mxu1 %vm73_vm1, %v13145_v29  ;;  %2397 = vmatprep.subr.mxu1 %v2244_v36 }
 0x23a   :  { %2398 = vmatpush1.msra.mxu1 %v2245_v38  ;;  %v2228_v39 = vsel %vm44_vm2, %v2213_v37, %v2215_v35  ;;  %2461 = vmatprep.mubr.f32.mxu1 %v13667_v4 }
 0x23b   :  { %2471 = vmatprep.subr.mxu1 %v2228_v39 }
 0x23c   :  { %v2217_v40 = vpop.permute.xlu1 %2216 }
 0x23d   :  { %v2223_v41 = vpop.permute.xlu0 %2222  ;;  %13148 = vmatmul.mubr.msk.f32.vlgmr.msra.gmra.mrb[4].mxu1 %vm73_vm1, %v13145_v29  ;;  %v2227_v47 = vsel %vm44_vm2, %v2215_v35, %v2217_v40 }
 0x23e   :  { %v2229_v42 = vsel %vm44_vm2, %v2223_v41, %v2213_v37  ;;  %2535 = vmatprep.mubr.f32.mxu1 %v13667_v4 }
 0x23f   :  { %2472 = vmatpush1.msra.mxu1 %v2229_v42 }
 0x240   :  { %v2221_v44 = vpop.permute.xlu1 %2220 }
 0x241   :  { %v2219_v45 = vpop.permute.xlu0 %2218  ;;  %13149 = vmatmul.mubr.msk.f32.vlgmr.msra.gmra.mrb[0].mxu1 %vm73_vm1, %v13144_v43  ;;  %v2224_v49 = vsel %vm44_vm2, %v2221_v44, %v2223_v41 }
 0x242   :  { %v2226_v46 = vsel %vm44_vm2, %v2217_v40, %v2219_v45  ;;  %2606 = vmatprep.mubr.f32.mxu1 %v13667_v4  ;;  %v2225_v51 = vsel %vm44_vm2, %v2219_v45, %v2221_v44 }
 0x243   :  { %2542 = vmatprep.subr.mxu1 %v2226_v46  ;;  %v13168_v46 = vld [vmem:[%s15645_s1 + $0x78] sm:$0xff] }
 0x244   :  { %2543 = vmatpush1.msra.mxu1 %v2227_v47  ;;  %v2687_v48 = vpop.permute.xlu1 %2686 }
 0x245   :  { %v2685_v50 = vpop.permute.xlu0 %2684  ;;  %13150 = vmatmul.mubr.msk.f32.vlgmr.msra.gmra.mrb[2].mxu1 %vm73_vm1, %v13144_v43  ;;  %2613 = vmatprep.subr.mxu1 %v2224_v49 }
 0x246   :  { %2614 = vmatpush1.msra.mxu1 %v2225_v51  ;;  %v2700_v52 = vsel %vm518_vm3, %v2685_v50, %v2687_v48  ;;  %2677 = vmatprep.mubr.f32.mxu1 %v13667_v4 }
 0x247   :  { %2707 = vmatprep.subr.mxu1 %v2700_v52 }
 0x248   :  { %v2689_v53 = vpop.permute.xlu1 %2688 }
 0x249   :  { %v2695_v54 = vpop.permute.xlu0 %2694  ;;  %13151 = vmatmul.mubr.msk.f32.vlgmr.msra.gmra.mrb[4].mxu1 %vm73_vm1, %v13144_v43  ;;  %v2699_v61 = vsel %vm518_vm3, %v2687_v48, %v2689_v53 }
 0x24a   :  { %v2701_v55 = vsel %vm518_vm3, %v2695_v54, %v2685_v50  ;;  %2771 = vmatprep.mubr.f32.mxu1 %v13667_v4 }
 0x24b   :  { %2708 = vmatpush1.msra.mxu1 %v2701_v55 }
 0x24c   :  { %v2693_v57 = vpop.permute.xlu1 %2692 }
 0x24d   :  { %v2691_v59 = vpop.permute.xlu0 %2690  ;;  %13153 = vmatmul.mubr.msk.f32.vlgmr.msra.gmra.mrb[0].mxu1 %vm73_vm1, %v13152_v56  ;;  %v2696_v7 = vsel %vm518_vm3, %v2693_v57, %v2695_v54 }
 0x24e   :  { %v2698_v60 = vsel %vm518_vm3, %v2689_v53, %v2691_v59  ;;  %2842 = vmatprep.mubr.f32.mxu1 %v13667_v4  ;;  %v2697_v11 = vsel %vm518_vm3, %v2691_v59, %v2693_v57  ;;  %v13172_v57 = vld [vmem:[%s15645_s1 + $0x80] sm:$0xff] }
 0x24f   :  { %2778 = vmatprep.subr.mxu1 %v2698_v60 }
 0x250   :  { %2779 = vmatpush1.msra.mxu1 %v2699_v61  ;;  %v2929_v63 = vpop.permute.xlu1 %2928 }
 0x251   :  { %v2927_v8 = vpop.permute.xlu0 %2926  ;;  %13154 = vmatmul.mubr.msk.f32.vlgmr.msra.gmra.mrb[2].mxu1 %vm73_vm1, %v13152_v56  ;;  %2849 = vmatprep.subr.mxu1 %v2696_v7 }
 0x252   :  { %2850 = vmatpush1.msra.mxu1 %v2697_v11  ;;  %v2942_v3 = vsel %vm761_vm4, %v2927_v8, %v2929_v63  ;;  %2913 = vmatprep.mubr.f32.mxu1 %v13667_v4 }
 0x253   :  { %2949 = vmatprep.subr.mxu1 %v2942_v3 }
 0x254   :  { %v2931_v1 = vpop.permute.xlu1 %2930 }
 0x255   :  { %v2937_v13 = vpop.permute.xlu0 %2936  ;;  %13155 = vmatmul.mubr.msk.f32.vlgmr.msra.gmra.mrb[4].mxu1 %vm73_vm1, %v13152_v56  ;;  %v2941_v23 = vsel %vm761_vm4, %v2929_v63, %v2931_v1 }
 0x256   :  { %v2943_v6 = vsel %vm761_vm4, %v2937_v13, %v2927_v8  ;;  %3013 = vmatprep.mubr.f32.mxu1 %v13667_v4 }
 0x257   :  { %2950 = vmatpush1.msra.mxu1 %v2943_v6  ;;  %v13176_v6 = vld [vmem:[%s15645_s1 + $0x88] sm:$0xff] }
 0x258   :  { %v2935_v15 = vpop.permute.xlu1 %2934 }
 0x259   :  { %v2933_v16 = vpop.permute.xlu0 %2932  ;;  %13157 = vmatmul.mubr.msk.f32.vlgmr.msra.gmra.mrb[0].mxu1 %vm73_vm1, %v13156_v0  ;;  %v2938_v25 = vsel %vm761_vm4, %v2935_v15, %v2937_v13 }
 0x25a   :  { %v2940_v17 = vsel %vm761_vm4, %v2931_v1, %v2933_v16  ;;  %3084 = vmatprep.mubr.f32.mxu1 %v13667_v4  ;;  %v2939_v27 = vsel %vm761_vm4, %v2933_v16, %v2935_v15 }
 0x25b   :  { %3020 = vmatprep.subr.mxu1 %v2940_v17 }
 0x25c   :  { %3021 = vmatpush1.msra.mxu1 %v2941_v23  ;;  %v3397_v24 = vpop.permute.xlu1 %3396 }
 0x25d   :  { %v3395_v26 = vpop.permute.xlu0 %3394  ;;  %13158 = vmatmul.mubr.msk.f32.vlgmr.msra.gmra.mrb[2].mxu1 %vm73_vm1, %v13156_v0  ;;  %3091 = vmatprep.subr.mxu1 %v2938_v25 }
 0x25e   :  { %3092 = vmatpush1.msra.mxu1 %v2939_v27  ;;  %3155 = vmatprep.mubr.f32.mxu1 %v13667_v4  ;;  %v3407_v33 = vsel %vm1228_vm5, %v3395_v26, %v3397_v24 }
 0x25f   :  { %3173 = vmatprep.subr.mxu1 %v14042_v12 }
 0x260   :  { %v3399_v28 = vpop.permute.xlu1 %3398 }
 0x261   :  { %v3393_v29 = vpop.permute.xlu0 %3392  ;;  %13159 = vmatmul.mubr.msk.f32.vlgmr.msra.gmra.mrb[4].mxu1 %vm73_vm1, %v13156_v0  ;;  %v3406_v37 = vsel %vm1228_vm5, %v3397_v24, %v3399_v28 }
 0x262   :  { %3174 = vmatpush1.msra.mxu1 %v14032_v62  ;;  %3237 = vmatprep.mubr.f32.mxu1 %v13667_v4 }
 0x263   :  { %3244 = vmatprep.subr.mxu1 %v14080_v22 }
 0x264   :  { %v3403_v31 = vpop.permute.xlu1 %3402 }
 0x265   :  { %v3401_v32 = vpop.permute.xlu0 %3400  ;;  %13161 = vmatmul.mubr.msk.f32.vlgmr.msra.gmra.mrb[0].mxu1 %vm73_vm1, %v13160_v30  ;;  %v3409_v38 = vsel %vm1228_vm5, %v3403_v31, %v3393_v29 }
 0x266   :  { %3245 = vmatpush1.msra.mxu1 %v14057_v5  ;;  %3308 = vmatprep.mubr.f32.mxu1 %v13667_v4  ;;  %v3408_v5 = vsel %vm1228_vm5, %v3393_v29, %v3395_v26  ;;  %v3404_v41 = vsel %vm1228_vm5, %v3401_v32, %v3403_v31 }
 0x267   :  { %3315 = vmatprep.subr.mxu1 %v14065_v19  ;;  %v3405_v19 = vsel %vm1228_vm5, %v3399_v28, %v3401_v32 }
 0x268   :  { %v3639_v12 = vpop.permute.xlu1 %3638 }
 0x269   :  { %v3637_v62 = vpop.permute.xlu0 %3636  ;;  %13162 = vmatmul.mubr.msk.f32.vlgmr.msra.gmra.mrb[2].mxu1 %vm73_vm1, %v13160_v30 }
 0x26a   :  { %3316 = vmatpush1.msra.mxu1 %v14077_v21  ;;  %3379 = vmatprep.mubr.f32.mxu1 %v13667_v4  ;;  %v13164_v21 = vld [vmem:[%s15645_s1 + $0x70] sm:$0xff]  ;;  %v3649_v42 = vsel %vm1471_vm6, %v3637_v62, %v3639_v12 }
 0x26b   :  { %3415 = vmatprep.subr.mxu1 %v3407_v33 }
 0x26c   :  { %v3641_v22 = vpop.permute.xlu1 %3640 }
 0x26d   :  { %v3635_v34 = vpop.permute.xlu0 %3634  ;;  %13163 = vmatmul.mubr.msk.f32.vlgmr.msra.gmra.mrb[4].mxu1 %vm73_vm1, %v13160_v30  ;;  %v3648_v49 = vsel %vm1471_vm6, %v3639_v12, %v3641_v22 }
 0x26e   :  { %3416 = vmatpush1.msra.mxu1 %v3408_v5  ;;  %3479 = vmatprep.mubr.f32.mxu1 %v13667_v4  ;;  %v3650_v44 = vsel %vm1471_vm6, %v3635_v34, %v3637_v62 }
 0x26f   :  { %3486 = vmatprep.subr.mxu1 %v3405_v19 }
 0x270   :  { %v3645_v35 = vpop.permute.xlu1 %3644 }
 0x271   :  { %v3643_v36 = vpop.permute.xlu0 %3642  ;;  %13165 = vmatmul.mubr.msk.f32.vlgmr.msra.gmra.mrb[0].mxu1 %vm73_vm1, %v13164_v21  ;;  %v3651_v50 = vsel %vm1471_vm6, %v3645_v35, %v3635_v34 }
 0x272   :  { %3487 = vmatpush1.msra.mxu1 %v3406_v37  ;;  %3550 = vmatprep.mubr.f32.mxu1 %v13667_v4  ;;  %v3647_v45 = vsel %vm1471_vm6, %v3641_v22, %v3643_v36  ;;  %v3646_v52 = vsel %vm1471_vm6, %v3643_v36, %v3645_v35 }
 0x273   :  { %3557 = vmatprep.subr.mxu1 %v3409_v38 }
 0x274   :  { %v3881_v39 = vpop.permute.xlu1 %3880 }
 0x275   :  { %v3879_v40 = vpop.permute.xlu0 %3878  ;;  %13166 = vmatmul.mubr.msk.f32.vlgmr.msra.gmra.mrb[2].mxu1 %vm73_vm1, %v13164_v21 }
 0x276   :  { %3558 = vmatpush1.msra.mxu1 %v3404_v41  ;;  %3621 = vmatprep.mubr.f32.mxu1 %v13667_v4  ;;  %v3891_v53 = vsel %vm1714_vm7, %v3879_v40, %v3881_v39 }
 0x277   :  { %3657 = vmatprep.subr.mxu1 %v3649_v42 }
 0x278   :  { %v3883_v47 = vpop.permute.xlu1 %3882 }
 0x279   :  { %v3877_v43 = vpop.permute.xlu0 %3876  ;;  %13167 = vmatmul.mubr.msk.f32.vlgmr.msra.gmra.mrb[4].mxu1 %vm73_vm1, %v13164_v21  ;;  %v3890_v61 = vsel %vm1714_vm7, %v3881_v39, %v3883_v47 }
 0x27a   :  { %3658 = vmatpush1.msra.mxu1 %v3650_v44  ;;  %3721 = vmatprep.mubr.f32.mxu1 %v13667_v4  ;;  %v3892_v55 = vsel %vm1714_vm7, %v3877_v43, %v3879_v40 }
 0x27b   :  { %3728 = vmatprep.subr.mxu1 %v3647_v45 }
 0x27c   :  { %v3887_v51 = vpop.permute.xlu1 %3886 }
 0x27d   :  { %v3885_v48 = vpop.permute.xlu0 %3884  ;;  %13169 = vmatmul.mubr.msk.f32.vlgmr.msra.gmra.mrb[0].mxu1 %vm73_vm1, %v13168_v46  ;;  %v3893_v63 = vsel %vm1714_vm7, %v3887_v51, %v3877_v43  ;;  %v13182_v43 = vld [vmem:[%s15645_s1 + $0x98] sm:$0xff] }
 0x27e   :  { %3729 = vmatpush1.msra.mxu1 %v3648_v49  ;;  %3792 = vmatprep.mubr.f32.mxu1 %v13667_v4  ;;  %v3889_v56 = vsel %vm1714_vm7, %v3883_v47, %v3885_v48  ;;  %v3888_v8 = vsel %vm1714_vm7, %v3885_v48, %v3887_v51 }
 0x27f   :  { %3799 = vmatprep.subr.mxu1 %v3651_v50 }
 0x280   :  { %v4123_v59 = vpop.permute.xlu1 %4122 }
 0x281   :  { %13170 = vmatmul.mubr.msk.f32.vlgmr.msra.gmra.mrb[2].mxu1 %vm73_vm1, %v13168_v46  ;;  %v4121_v54 = vpop.permute.xlu0 %4120 }
 0x282   :  { %3800 = vmatpush1.msra.mxu1 %v3646_v52  ;;  %3863 = vmatprep.mubr.f32.mxu1 %v13667_v4  ;;  %v4133_v11 = vsel %vm1957_vm8, %v4121_v54, %v4123_v59 }
 0x283   :  { %3899 = vmatprep.subr.mxu1 %v3891_v53 }
 0x284   :  { %v4125_v7 = vpop.permute.xlu1 %4124 }
 0x285   :  { %13171 = vmatmul.mubr.msk.f32.vlgmr.msra.gmra.mrb[4].mxu1 %vm73_vm1, %v13168_v46  ;;  %v4119_v60 = vpop.permute.xlu0 %4118  ;;  %v4132_v15 = vsel %vm1957_vm8, %v4123_v59, %v4125_v7 }
 0x286   :  { %3900 = vmatpush1.msra.mxu1 %v3892_v55  ;;  %3963 = vmatprep.mubr.f32.mxu1 %v13667_v4  ;;  %v4134_v1 = vsel %vm1957_vm8, %v4119_v60, %v4121_v54 }
 0x287   :  { %3970 = vmatprep.subr.mxu1 %v3889_v56 }
 0x288   :  { %v4129_v0 = vpop.permute.xlu1 %4128 }
 0x289   :  { %13173 = vmatmul.mubr.msk.f32.vlgmr.msra.gmra.mrb[0].mxu1 %vm73_vm1, %v13172_v57  ;;  %v4127_v3 = vpop.permute.xlu0 %4126  ;;  %v4135_v16 = vsel %vm1957_vm8, %v4129_v0, %v4119_v60 }
 0x28a   :  { %3971 = vmatpush1.msra.mxu1 %v3890_v61  ;;  %4034 = vmatprep.mubr.f32.mxu1 %v13667_v4  ;;  %v4131_v13 = vsel %vm1957_vm8, %v4125_v7, %v4127_v3  ;;  %v4130_v17 = vsel %vm1957_vm8, %v4127_v3, %v4129_v0 }
 0x28b   :  { %4041 = vmatprep.subr.mxu1 %v3893_v63 }
 0x28d   :  { %13174 = vmatmul.mubr.msk.f32.vlgmr.msra.gmra.mrb[2].mxu1 %vm73_vm1, %v13172_v57 }
 0x28e   :  { %4042 = vmatpush1.msra.mxu1 %v3888_v8  ;;  %4105 = vmatprep.mubr.f32.mxu1 %v13667_v4 }
 0x28f   :  { %4141 = vmatprep.subr.mxu1 %v4133_v11 }
 0x291   :  { %13175 = vmatmul.mubr.msk.f32.vlgmr.msra.gmra.mrb[4].mxu1 %vm73_vm1, %v13172_v57  ;;  %v13181_v57 = vld [vmem:[%s15645_s1 + $0x90] sm:$0xff] }
 0x292   :  { %4142 = vmatpush1.msra.mxu1 %v4134_v1  ;;  %4205 = vmatprep.mubr.f32.mxu1 %v13667_v4 }
 0x293   :  { %4212 = vmatprep.subr.mxu1 %v4131_v13 }
 0x295   :  { %13177 = vmatmul.mubr.msk.f32.vlgmr.msra.gmra.mrb[0].mxu1 %vm73_vm1, %v13176_v6 }
 0x296   :  { %4213 = vmatpush1.msra.mxu1 %v4132_v15  ;;  %4276 = vmatprep.mubr.f32.mxu1 %v13667_v4  ;;  %v13189_v15 = vld [vmem:[%s15645_s1 + $0xa0] sm:$0xff] }
 0x297   :  { %4283 = vmatprep.subr.mxu1 %v4135_v16 }
 0x299   :  { %13178 = vmatmul.mubr.msk.f32.vlgmr.msra.gmra.mrb[2].mxu1 %vm73_vm1, %v13176_v6 }
 0x29a   :  { %4284 = vmatpush1.msra.mxu1 %v4130_v17  ;;  %4347 = vmatprep.mubr.f32.mxu1 %v13667_v4  ;;  %v4365_v23 = vpop.permute.xlu0 %4364 }
 0x29d   :  { %13179 = vmatmul.mubr.msk.f32.vlgmr.msra.gmra.mrb[4].mxu1 %vm73_vm1, %v13176_v6 }
 0x29e   :  { %6665 = vmatprep.mubr.f32.mxu1 %v13667_v4 }
 0x368   :  { %v4207_v24 = vpop.f32.mrb[0].mxu1 }
 0x369   :  { %v4367_v25 = vadd.f32 %v4365_v23, %v4207_v24  ;;  %v4209_v26 = vpop.f32.mrb[1].mxu1 }
 0x36a   :  { %v4368_v27 = vadd.f32 %v4365_v23, %v4209_v26 }
 0x36b   :  { %v4373_v28 = vmax.f32 %v4367_v25, 0.0 }
 0x36c   :  { %v4374_v29 = vmax.f32 %v4368_v27, 0.0  ;;  %v4278_v30 = vpop.f32.mrb[2].mxu1 }
 0x36d   :  { %v14357_v31 = vmul.f32 %v4373_v28, %v14029_v58  ;;  %v4369_v32 = vadd.f32 %v4365_v23, %v4278_v30  ;;  %v4280_v12 = vpop.f32.mrb[3].mxu1 }
 0x36e   :  { %v14360_v62 = vmul.f32 %v4374_v29, %v14037_v9  ;;  %v4370_v58 = vadd.f32 %v4365_v23, %v4280_v12 }
 0x36f   :  { %v4375_v33 = vmax.f32 %v4369_v32, 0.0  ;;  %4405 = vrot.lane.b32.xlu1 %v14357_v31, %s13666_s19 }
 0x370   :  { %4407 = vrot.lane.b32.xlu0 %v14360_v62, %s13666_s19  ;;  %v4349_v22 = vpop.f32.mrb[4].mxu1  ;;  %v4376_v37 = vmax.f32 %v4370_v58, 0.0 }
 0x371   :  { %v14367_v34 = vmul.f32 %v4375_v33, %v14047_v14  ;;  %v4371_v5 = vadd.f32 %v4365_v23, %v4349_v22  ;;  %v4351_v19 = vpop.f32.mrb[5].mxu1  ;;  %v13193_v33 = vld [vmem:[%s15645_s1 + $0xa8] sm:$0xff] }
 0x372   :  { %v4372_v21 = vadd.f32 %v4365_v23, %v4351_v19  ;;  %v14382_v14 = vmul.f32 %v4376_v37, %v14070_v20 }
 0x373   :  { %v4377_v35 = vmax.f32 %v4371_v5, 0.0 }
 0x374   :  { %v4378_v36 = vmax.f32 %v4372_v21, 0.0  ;;  %4409 = vrot.lane.b32.xlu0 %v14367_v34, %s13666_s19 }
 0x375   :  { %v14372_v9 = vmul.f32 %v4377_v35, %v14062_v18 }
 0x376   :  { %v14375_v38 = vmul.f32 %v4378_v36, %v14052_v2  ;;  %v13217_v2 = vld [vmem:[%s15646_s2 + $0x10] sm:$0xff] }
 0x378   :  { %4413 = vrot.lane.b32.xlu0 %v14372_v9, %s13666_s19  ;;  %4415 = vrot.lane.b32.xlu1 %v14375_v38, %s13666_s19 }
 0x37c   :  { %4387 = vrot.lane.b32.xlu0 %v14360_v62, %s13668_s28  ;;  %4411 = vrot.lane.b32.xlu1 %v14382_v14, %s13666_s19 }
 0x380   :  { %4389 = vrot.lane.b32.xlu0 %v14367_v34, %s13668_s28  ;;  %4385 = vrot.lane.b32.xlu1 %v14357_v31, %s13668_s28 }
 0x384   :  { %4393 = vrot.lane.b32.xlu0 %v14372_v9, %s13668_s28  ;;  %4395 = vrot.lane.b32.xlu1 %v14375_v38, %s13668_s28 }
 0x388   :  { %4859 = vrot.lane.b32.xlu0 %v14360_v62, %s13669_s0  ;;  %4391 = vrot.lane.b32.xlu1 %v14382_v14, %s13668_s28 }
 0x38c   :  { %4861 = vrot.lane.b32.xlu0 %v14367_v34, %s13669_s0  ;;  %4857 = vrot.lane.b32.xlu1 %v14357_v31, %s13669_s0 }
 0x390   :  { %4865 = vrot.lane.b32.xlu0 %v14372_v9, %s13669_s0  ;;  %4867 = vrot.lane.b32.xlu1 %v14375_v38, %s13669_s0 }
 0x394   :  { %5101 = vrot.lane.b32.xlu0 %v14360_v62, %s13670_s29  ;;  %4863 = vrot.lane.b32.xlu1 %v14382_v14, %s13669_s0 }
 0x398   :  { %5103 = vrot.lane.b32.xlu0 %v14367_v34, %s13670_s29  ;;  %5099 = vrot.lane.b32.xlu1 %v14357_v31, %s13670_s29 }
 0x39c   :  { %5107 = vrot.lane.b32.xlu0 %v14372_v9, %s13670_s29  ;;  %5109 = vrot.lane.b32.xlu1 %v14375_v38, %s13670_s29 }
 0x3a0   :  { %5569 = vrot.lane.b32.xlu0 %v14367_v34, %s13671_s30  ;;  %5105 = vrot.lane.b32.xlu1 %v14382_v14, %s13670_s29 }
 0x3a4   :  { %5571 = vrot.lane.b32.xlu0 %v14382_v14, %s13671_s30  ;;  %5567 = vrot.lane.b32.xlu1 %v14360_v62, %s13671_s30 }
 0x3a8   :  { %5575 = vrot.lane.b32.xlu0 %v14375_v38, %s13671_s30  ;;  %5565 = vrot.lane.b32.xlu1 %v14357_v31, %s13671_s30 }
 0x3ac   :  { %5811 = vrot.lane.b32.xlu0 %v14367_v34, %s13672_s5  ;;  %5573 = vrot.lane.b32.xlu1 %v14372_v9, %s13671_s30 }
 0x3b0   :  { %5813 = vrot.lane.b32.xlu0 %v14382_v14, %s13672_s5  ;;  %5809 = vrot.lane.b32.xlu1 %v14360_v62, %s13672_s5 }
 0x3b4   :  { %5817 = vrot.lane.b32.xlu0 %v14375_v38, %s13672_s5  ;;  %5807 = vrot.lane.b32.xlu1 %v14357_v31, %s13672_s5 }
 0x3b8   :  { %6053 = vrot.lane.b32.xlu0 %v14367_v34, %s13673_s6  ;;  %5815 = vrot.lane.b32.xlu1 %v14372_v9, %s13672_s5 }
 0x3bc   :  { %6055 = vrot.lane.b32.xlu0 %v14382_v14, %s13673_s6  ;;  %6051 = vrot.lane.b32.xlu1 %v14360_v62, %s13673_s6 }
 0x3c0   :  { %6059 = vrot.lane.b32.xlu0 %v14375_v38, %s13673_s6  ;;  %6049 = vrot.lane.b32.xlu1 %v14357_v31, %s13673_s6 }
 0x3c4   :  { %6295 = vrot.lane.b32.xlu0 %v14367_v34, %s13674_s7  ;;  %6057 = vrot.lane.b32.xlu1 %v14372_v9, %s13673_s6 }
 0x3c8   :  { %6297 = vrot.lane.b32.xlu0 %v14382_v14, %s13674_s7  ;;  %6293 = vrot.lane.b32.xlu1 %v14360_v62, %s13674_s7 }
 0x3cc   :  { %6301 = vrot.lane.b32.xlu0 %v14375_v38, %s13674_s7  ;;  %6291 = vrot.lane.b32.xlu1 %v14357_v31, %s13674_s7 }
 0x3d0   :  { %6299 = vrot.lane.b32.xlu1 %v14372_v9, %s13674_s7 }
 0x3d4   :  { %6537 = vperm.xlu1 %13629, %v13217_v2  }
 0x3e1   :  { %v4406_v18 = vpop.permute.xlu1 %4405 }
 0x3e2   :  { %v4408_v20 = vpop.permute.xlu0 %4407 }
 0x3e3   :  { %v4421_v39 = vsel %vm64_vm0, %v4406_v18, %v4408_v20 }
 0x3e4   :  { %4428 = vmatprep.subr.mxu0 %v4421_v39 }
 0x3e6   :  { %v4410_v40 = vpop.permute.xlu0 %4409 }
 0x3e7   :  { %v4420_v48 = vsel %vm64_vm0, %v4408_v20, %v4410_v40  ;;  %v13197_v20 = vld [vmem:[%s15645_s1 + $0xb0] sm:$0xff] }
 0x3ea   :  { %v4414_v41 = vpop.permute.xlu0 %4413  ;;  %v4416_v42 = vpop.permute.xlu1 %4415 }
 0x3eb   :  { %v4422_v44 = vsel %vm64_vm0, %v4416_v42, %v4406_v18  ;;  %v4417_v49 = vsel %vm64_vm0, %v4414_v41, %v4416_v42 }
 0x3ec   :  { %4429 = vmatpush1.msra.mxu0 %v4422_v44 }
 0x3ed   :  { %13183 = vmatmul.mubr.msk.f32.vlgmr.msra.gmra.mrb[6].mxu0 %vm73_vm1, %v13182_v43 }
 0x3ee   :  { %v4388_v45 = vpop.permute.xlu0 %4387  ;;  %v4412_v46 = vpop.permute.xlu1 %4411  ;;  %4563 = vmatprep.mubr.f32.mxu0 %v13667_v4 }
 0x3ef   :  { %v4419_v47 = vsel %vm64_vm0, %v4410_v40, %v4412_v46  ;;  %v4418_v52 = vsel %vm64_vm0, %v4412_v46, %v4414_v41 }
 0x3f0   :  { %4499 = vmatprep.subr.mxu0 %v4419_v47  ;;  %v13201_v47 = vld [vmem:[%s15645_s1 + $0xb8] sm:$0xff] }
 0x3f1   :  { %4500 = vmatpush1.msra.mxu0 %v4420_v48 }
 0x3f2   :  { %v4390_v50 = vpop.permute.xlu0 %4389  ;;  %13184 = vmatmul.mubr.msk.f32.vlgmr.msra.gmra.mrb[8].mxu0 %vm73_vm1, %v13182_v43  ;;  %4570 = vmatprep.subr.mxu0 %v4417_v49  ;;  %v4386_v51 = vpop.permute.xlu1 %4385 }
 0x3f3   :  { %4571 = vmatpush1.msra.mxu0 %v4418_v52  ;;  %v4401_v53 = vsel %vm44_vm2, %v4386_v51, %v4388_v45  ;;  %4634 = vmatprep.mubr.f32.mxu0 %v13667_v4  ;;  %v4400_v63 = vsel %vm44_vm2, %v4388_v45, %v4390_v50 }
 0x3f4   :  { %4644 = vmatprep.subr.mxu0 %v4401_v53 }
 0x3f6   :  { %v4394_v54 = vpop.permute.xlu0 %4393  ;;  %13185 = vmatmul.mubr.msk.f32.vlgmr.msra.gmra.mrb[10].mxu0 %vm73_vm1, %v13182_v43  ;;  %v4396_v55 = vpop.permute.xlu1 %4395 }
 0x3f7   :  { %v4402_v56 = vsel %vm44_vm2, %v4396_v55, %v4386_v51  ;;  %4708 = vmatprep.mubr.f32.mxu0 %v13667_v4  ;;  %v4397_v7 = vsel %vm44_vm2, %v4394_v54, %v4396_v55 }
 0x3f8   :  { %4645 = vmatpush1.msra.mxu0 %v4402_v56 }
 0x3fa   :  { %v4860_v59 = vpop.permute.xlu0 %4859  ;;  %13186 = vmatmul.mubr.msk.f32.vlgmr.msra.gmra.mrb[6].mxu0 %vm73_vm1, %v13181_v57  ;;  %v4392_v60 = vpop.permute.xlu1 %4391 }
 0x3fb   :  { %v4399_v61 = vsel %vm44_vm2, %v4390_v50, %v4392_v60  ;;  %4779 = vmatprep.mubr.f32.mxu0 %v13667_v4  ;;  %v4398_v3 = vsel %vm44_vm2, %v4392_v60, %v4394_v54  ;;  %v13205_v60 = vld [vmem:[%s15645_s1 + $0xc0] sm:$0xff] }
 0x3fc   :  { %4715 = vmatprep.subr.mxu0 %v4399_v61 }
 0x3fd   :  { %4716 = vmatpush1.msra.mxu0 %v4400_v63 }
 0x3fe   :  { %v4862_v8 = vpop.permute.xlu0 %4861  ;;  %13187 = vmatmul.mubr.msk.f32.vlgmr.msra.gmra.mrb[8].mxu0 %vm73_vm1, %v13181_v57  ;;  %4786 = vmatprep.subr.mxu0 %v4397_v7  ;;  %v4858_v11 = vpop.permute.xlu1 %4857 }
 0x3ff   :  { %4787 = vmatpush1.msra.mxu0 %v4398_v3  ;;  %v4873_v1 = vsel %vm518_vm3, %v4858_v11, %v4860_v59  ;;  %4850 = vmatprep.mubr.f32.mxu0 %v13667_v4  ;;  %v4872_v24 = vsel %vm518_vm3, %v4860_v59, %v4862_v8 }
 0x400   :  { %4880 = vmatprep.subr.mxu0 %v4873_v1 }
 0x402   :  { %v4866_v13 = vpop.permute.xlu0 %4865  ;;  %13188 = vmatmul.mubr.msk.f32.vlgmr.msra.gmra.mrb[10].mxu0 %vm73_vm1, %v13181_v57  ;;  %v4868_v6 = vpop.permute.xlu1 %4867 }
 0x403   :  { %v4874_v0 = vsel %vm518_vm3, %v4868_v6, %v4858_v11  ;;  %4944 = vmatprep.mubr.f32.mxu0 %v13667_v4  ;;  %v4869_v25 = vsel %vm518_vm3, %v4866_v13, %v4868_v6 }
 0x404   :  { %4881 = vmatpush1.msra.mxu0 %v4874_v0 }
 0x406   :  { %v5102_v16 = vpop.permute.xlu0 %5101  ;;  %13190 = vmatmul.mubr.msk.f32.vlgmr.msra.gmra.mrb[6].mxu0 %vm73_vm1, %v13189_v15  ;;  %v4864_v17 = vpop.permute.xlu1 %4863 }
 0x407   :  { %v4871_v23 = vsel %vm518_vm3, %v4862_v8, %v4864_v17  ;;  %5015 = vmatprep.mubr.f32.mxu0 %v13667_v4  ;;  %v4870_v28 = vsel %vm518_vm3, %v4864_v17, %v4866_v13 }
 0x408   :  { %4951 = vmatprep.subr.mxu0 %v4871_v23 }
 0x409   :  { %4952 = vmatpush1.msra.mxu0 %v4872_v24 }
 0x40a   :  { %v5104_v26 = vpop.permute.xlu0 %5103  ;;  %13191 = vmatmul.mubr.msk.f32.vlgmr.msra.gmra.mrb[8].mxu0 %vm73_vm1, %v13189_v15  ;;  %5022 = vmatprep.subr.mxu0 %v4869_v25  ;;  %v5100_v27 = vpop.permute.xlu1 %5099 }
 0x40b   :  { %5023 = vmatpush1.msra.mxu0 %v4870_v28  ;;  %v5115_v29 = vsel %vm761_vm4, %v5100_v27, %v5102_v16  ;;  %5086 = vmatprep.mubr.f32.mxu0 %v13667_v4  ;;  %v5114_v58 = vsel %vm761_vm4, %v5102_v16, %v5104_v26 }
 0x40c   :  { %5122 = vmatprep.subr.mxu0 %v5115_v29 }
 0x40e   :  { %v5108_v30 = vpop.permute.xlu0 %5107  ;;  %13192 = vmatmul.mubr.msk.f32.vlgmr.msra.gmra.mrb[10].mxu0 %vm73_vm1, %v13189_v15  ;;  %v5110_v32 = vpop.permute.xlu1 %5109  ;;  %v13209_v15 = vld [vmem:[%s15645_s1 + $0xc8] sm:$0xff] }
 0x40f   :  { %v5116_v12 = vsel %vm761_vm4, %v5110_v32, %v5100_v27  ;;  %5186 = vmatprep.mubr.f32.mxu0 %v13667_v4  ;;  %v5111_v21 = vsel %vm761_vm4, %v5108_v30, %v5110_v32  ;;  %v13213_v32 = vld [vmem:[%s15645_s1 + $0xd0] sm:$0xff] }
 0x410   :  { %5123 = vmatpush1.msra.mxu0 %v5116_v12 }
 0x412   :  { %v5570_v22 = vpop.permute.xlu0 %5569  ;;  %13194 = vmatmul.mubr.msk.f32.vlgmr.msra.gmra.mrb[6].mxu0 %vm73_vm1, %v13193_v33  ;;  %v5106_v5 = vpop.permute.xlu1 %5105 }
 0x413   :  { %v5113_v19 = vsel %vm761_vm4, %v5104_v26, %v5106_v5  ;;  %5257 = vmatprep.mubr.f32.mxu0 %v13667_v4  ;;  %v5112_v37 = vsel %vm761_vm4, %v5106_v5, %v5108_v30 }
 0x414   :  { %5193 = vmatprep.subr.mxu0 %v5113_v19 }
 0x415   :  { %5194 = vmatpush1.msra.mxu0 %v5114_v58 }
 0x416   :  { %v5572_v35 = vpop.permute.xlu0 %5571  ;;  %13195 = vmatmul.mubr.msk.f32.vlgmr.msra.gmra.mrb[8].mxu0 %vm73_vm1, %v13193_v33  ;;  %5264 = vmatprep.subr.mxu0 %v5111_v21  ;;  %v5568_v36 = vpop.permute.xlu1 %5567 }
 0x417   :  { %5265 = vmatpush1.msra.mxu0 %v5112_v37  ;;  %5328 = vmatprep.mubr.f32.mxu0 %v13667_v4  ;;  %v5580_v43 = vsel %vm1228_vm5, %v5568_v36, %v5570_v22  ;;  %v5579_v49 = vsel %vm1228_vm5, %v5570_v22, %v5572_v35 }
 0x418   :  { %5346 = vmatprep.subr.mxu0 %v14360_v62 }
 0x41a   :  { %v5576_v2 = vpop.permute.xlu0 %5575  ;;  %13196 = vmatmul.mubr.msk.f32.vlgmr.msra.gmra.mrb[10].mxu0 %vm73_vm1, %v13193_v33  ;;  %v5566_v18 = vpop.permute.xlu1 %5565 }
 0x41b   :  { %5347 = vmatpush1.msra.mxu0 %v14357_v31  ;;  %5410 = vmatprep.mubr.f32.mxu0 %v13667_v4  ;;  %v5581_v44 = vsel %vm1228_vm5, %v5566_v18, %v5568_v36  ;;  %v5582_v51 = vsel %vm1228_vm5, %v5576_v2, %v5566_v18 }
 0x41c   :  { %5417 = vmatprep.subr.mxu0 %v14382_v14 }
 0x41e   :  { %v5812_v39 = vpop.permute.xlu0 %5811  ;;  %13198 = vmatmul.mubr.msk.f32.vlgmr.msra.gmra.mrb[6].mxu0 %vm73_vm1, %v13197_v20  ;;  %v5574_v40 = vpop.permute.xlu1 %5573 }
 0x41f   :  { %5418 = vmatpush1.msra.mxu0 %v14367_v34  ;;  %5481 = vmatprep.mubr.f32.mxu0 %v13667_v4  ;;  %v5578_v46 = vsel %vm1228_vm5, %v5572_v35, %v5574_v40  ;;  %v5577_v53 = vsel %vm1228_vm5, %v5574_v40, %v5576_v2 }
 0x420   :  { %5488 = vmatprep.subr.mxu0 %v14375_v38 }
 0x422   :  { %v5814_v41 = vpop.permute.xlu0 %5813  ;;  %13199 = vmatmul.mubr.msk.f32.vlgmr.msra.gmra.mrb[8].mxu0 %vm73_vm1, %v13197_v20  ;;  %v5810_v42 = vpop.permute.xlu1 %5809 }
 0x423   :  { %5489 = vmatpush1.msra.mxu0 %v14372_v9  ;;  %5552 = vmatprep.mubr.f32.mxu0 %v13667_v4  ;;  %v5822_v55 = vsel %vm1471_vm6, %v5810_v42, %v5812_v39  ;;  %v5821_v63 = vsel %vm1471_vm6, %v5812_v39, %v5814_v41 }
 0x424   :  { %5588 = vmatprep.subr.mxu0 %v5580_v43 }
 0x426   :  { %13200 = vmatmul.mubr.msk.f32.vlgmr.msra.gmra.mrb[10].mxu0 %vm73_vm1, %v13197_v20  ;;  %v5808_v45 = vpop.permute.xlu1 %5807  ;;  %v5818_v48 = vpop.permute.xlu0 %5817  ;;  %v14659_v20 = vld [vmem:[%s15647_s3] sm:$0xff] }
 0x427   :  { %5589 = vmatpush1.msra.mxu0 %v5581_v44  ;;  %5652 = vmatprep.mubr.f32.mxu0 %v13667_v4  ;;  %v5823_v56 = vsel %vm1471_vm6, %v5808_v45, %v5810_v42  ;;  %v5824_v8 = vsel %vm1471_vm6, %v5818_v48, %v5808_v45  ;;  %v14667_v42 = vld [vmem:[%s15647_s3 + $0x8] sm:$0xff] }
 0x428   :  { %5659 = vmatprep.subr.mxu0 %v5578_v46  ;;  %v14679_v46 = vld [vmem:[%s15647_s3 + $0x10] sm:$0xff] }
 0x42a   :  { %13202 = vmatmul.mubr.msk.f32.vlgmr.msra.gmra.mrb[6].mxu0 %vm73_vm1, %v13201_v47  ;;  %v5816_v50 = vpop.permute.xlu1 %5815  ;;  %v6054_v52 = vpop.permute.xlu0 %6053 }
 0x42b   :  { %5660 = vmatpush1.msra.mxu0 %v5579_v49  ;;  %5723 = vmatprep.mubr.f32.mxu0 %v13667_v4  ;;  %v5820_v59 = vsel %vm1471_vm6, %v5814_v41, %v5816_v50  ;;  %v5819_v3 = vsel %vm1471_vm6, %v5816_v50, %v5818_v48 }
 0x42c   :  { %5730 = vmatprep.subr.mxu0 %v5582_v51 }
 0x42e   :  { %13203 = vmatmul.mubr.msk.f32.vlgmr.msra.gmra.mrb[8].mxu0 %vm73_vm1, %v13201_v47  ;;  %v6052_v54 = vpop.permute.xlu1 %6051  ;;  %v6056_v61 = vpop.permute.xlu0 %6055 }
 0x42f   :  { %5731 = vmatpush1.msra.mxu0 %v5577_v53  ;;  %5794 = vmatprep.mubr.f32.mxu0 %v13667_v4  ;;  %v6064_v1 = vsel %vm1714_vm7, %v6052_v54, %v6054_v52  ;;  %v6063_v23 = vsel %vm1714_vm7, %v6054_v52, %v6056_v61 }
 0x430   :  { %5830 = vmatprep.subr.mxu0 %v5822_v55 }
 0x432   :  { %13204 = vmatmul.mubr.msk.f32.vlgmr.msra.gmra.mrb[10].mxu0 %vm73_vm1, %v13201_v47  ;;  %v6050_v57 = vpop.permute.xlu1 %6049  ;;  %v6060_v11 = vpop.permute.xlu0 %6059 }
 0x433   :  { %5831 = vmatpush1.msra.mxu0 %v5823_v56  ;;  %5894 = vmatprep.mubr.f32.mxu0 %v13667_v4  ;;  %v6065_v6 = vsel %vm1714_vm7, %v6050_v57, %v6052_v54  ;;  %v6066_v24 = vsel %vm1714_vm7, %v6060_v11, %v6050_v57  ;;  %v14689_v54 = vld [vmem:[%s15647_s3 + $0x20] sm:$0xff]  ;;  %v14697_v57 = vld [vmem:[%s15647_s3 + $0x28] sm:$0xff] }
 0x434   :  { %5901 = vmatprep.subr.mxu0 %v5820_v59 }
 0x436   :  { %13206 = vmatmul.mubr.msk.f32.vlgmr.msra.gmra.mrb[6].mxu0 %vm73_vm1, %v13205_v60  ;;  %v6058_v7 = vpop.permute.xlu1 %6057  ;;  %v6296_v16 = vpop.permute.xlu0 %6295 }
 0x437   :  { %5902 = vmatpush1.msra.mxu0 %v5821_v63  ;;  %5965 = vmatprep.mubr.f32.mxu0 %v13667_v4  ;;  %v6062_v0 = vsel %vm1714_vm7, %v6056_v61, %v6058_v7  ;;  %v6061_v26 = vsel %vm1714_vm7, %v6058_v7, %v6060_v11  ;;  %v13254_v63 = vld [vmem:[%s15646_s2 + $0x18] sm:$0xff] }
 0x438   :  { %5972 = vmatprep.subr.mxu0 %v5824_v8 }
 0x43a   :  { %13207 = vmatmul.mubr.msk.f32.vlgmr.msra.gmra.mrb[8].mxu0 %vm73_vm1, %v13205_v60  ;;  %v6294_v13 = vpop.permute.xlu1 %6293  ;;  %v6298_v25 = vpop.permute.xlu0 %6297 }
 0x43b   :  { %5973 = vmatpush1.msra.mxu0 %v5819_v3  ;;  %6036 = vmatprep.mubr.f32.mxu0 %v13667_v4  ;;  %v6306_v27 = vsel %vm1957_vm8, %v6294_v13, %v6296_v16  ;;  %v6305_v33 = vsel %vm1957_vm8, %v6296_v16, %v6298_v25 }
 0x43c   :  { %6072 = vmatprep.subr.mxu0 %v6064_v1 }
 0x43e   :  { %13208 = vmatmul.mubr.msk.f32.vlgmr.msra.gmra.mrb[10].mxu0 %vm73_vm1, %v13205_v60  ;;  %v6292_v17 = vpop.permute.xlu1 %6291  ;;  %v6302_v12 = vpop.permute.xlu0 %6301  ;;  %v14709_v60 = vld [vmem:[%s15647_s3 + $0x18] sm:$0xff] }
 0x43f   :  { %6073 = vmatpush1.msra.mxu0 %v6065_v6  ;;  %6136 = vmatprep.mubr.f32.mxu0 %v13667_v4  ;;  %v6307_v29 = vsel %vm1957_vm8, %v6292_v17, %v6294_v13  ;;  %v6308_v22 = vsel %vm1957_vm8, %v6302_v12, %v6292_v17  ;;  %v13219_v6 = vld [vmem:[%s15645_s1 + $0xe0] sm:$0xff] }
 0x440   :  { %6143 = vmatprep.subr.mxu0 %v6062_v0 }
 0x442   :  { %13210 = vmatmul.mubr.msk.f32.vlgmr.msra.gmra.mrb[6].mxu0 %vm73_vm1, %v13209_v15  ;;  %v6300_v28 = vpop.permute.xlu1 %6299 }
 0x443   :  { %6144 = vmatpush1.msra.mxu0 %v6063_v23  ;;  %6207 = vmatprep.mubr.f32.mxu0 %v13667_v4  ;;  %v6304_v30 = vsel %vm1957_vm8, %v6298_v25, %v6300_v28  ;;  %v6303_v5 = vsel %vm1957_vm8, %v6300_v28, %v6302_v12  ;;  %v13218_v12 = vld [vmem:[%s15645_s1 + $0xd8] sm:$0xff] }
 0x444   :  { %6214 = vmatprep.subr.mxu0 %v6066_v24 }
 0x446   :  { %13211 = vmatmul.mubr.msk.f32.vlgmr.msra.gmra.mrb[8].mxu0 %vm73_vm1, %v13209_v15 }
 0x447   :  { %6215 = vmatpush1.msra.mxu0 %v6061_v26  ;;  %6278 = vmatprep.mubr.f32.mxu0 %v13667_v4 }
 0x448   :  { %6314 = vmatprep.subr.mxu0 %v6306_v27 }
 0x44a   :  { %13212 = vmatmul.mubr.msk.f32.vlgmr.msra.gmra.mrb[10].mxu0 %vm73_vm1, %v13209_v15 }
 0x44b   :  { %6315 = vmatpush1.msra.mxu0 %v6307_v29  ;;  %6378 = vmatprep.mubr.f32.mxu0 %v13667_v4 }
 0x44c   :  { %6385 = vmatprep.subr.mxu0 %v6304_v30 }
 0x44e   :  { %13214 = vmatmul.mubr.msk.f32.vlgmr.msra.gmra.mrb[6].mxu0 %vm73_vm1, %v13213_v32 }
 0x44f   :  { %6386 = vmatpush1.msra.mxu0 %v6305_v33  ;;  %6449 = vmatprep.mubr.f32.mxu0 %v13667_v4 }
 0x450   :  { %6456 = vmatprep.subr.mxu0 %v6308_v22 }
 0x452   :  { %13215 = vmatmul.mubr.msk.f32.vlgmr.msra.gmra.mrb[8].mxu0 %vm73_vm1, %v13213_v32 }
 0x453   :  { %6457 = vmatpush1.msra.mxu0 %v6303_v5  ;;  %6520 = vmatprep.mubr.f32.mxu0 %v13667_v4  ;;  %v6538_v19 = vpop.permute.xlu1 %6537 }
 0x456   :  { %13216 = vmatmul.mubr.msk.f32.vlgmr.msra.gmra.mrb[10].mxu0 %vm73_vm1, %v13213_v32 }
 0x457   :  { %8844 = vmatprep.mubr.f32.mxu0 %v13667_v4 }
 0x521   :  { %v6380_v58 = vpop.f32.mrb[6].mxu0 }
 0x522   :  { %v6540_v21 = vadd.f32 %v6538_v19, %v6380_v58  ;;  %v6382_v35 = vpop.f32.mrb[7].mxu0 }
 0x523   :  { %v6541_v36 = vadd.f32 %v6538_v19, %v6382_v35 }
 0x524   :  { %v6546_v37 = vmax.f32 %v6540_v21, 0.0 }
 0x525   :  { %v6547_v2 = vmax.f32 %v6541_v36, 0.0  ;;  %v6451_v18 = vpop.f32.mrb[8].mxu0 }
 0x526   :  { %v14662_v39 = vmul.f32 %v14659_v20, %v6546_v37  ;;  %v6542_v40 = vadd.f32 %v6538_v19, %v6451_v18  ;;  %v6453_v41 = vpop.f32.mrb[9].mxu0 }
 0x527   :  { %v14670_v43 = vmul.f32 %v14667_v42, %v6547_v2  ;;  %v6543_v50 = vadd.f32 %v6538_v19, %v6453_v41  ;;  %v13226_v41 = vld [vmem:[%s15645_s1 + $0xe8] sm:$0xff] }
 0x528   :  { %v6548_v44 = vmax.f32 %v6542_v40, 0.0  ;;  %6578 = vrot.lane.b32.xlu0 %v14662_v39, %s13666_s19 }
 0x529   :  { %v6522_v45 = vpop.f32.mrb[10].mxu0  ;;  %6580 = vrot.lane.b32.xlu1 %v14670_v43, %s13666_s19  ;;  %v6549_v56 = vmax.f32 %v6543_v50, 0.0 }
 0x52a   :  { %v14682_v47 = vmul.f32 %v14679_v46, %v6548_v44  ;;  %v6544_v48 = vadd.f32 %v6538_v19, %v6522_v45  ;;  %v6524_v49 = vpop.f32.mrb[11].mxu0 }
 0x52b   :  { %v6545_v51 = vadd.f32 %v6538_v19, %v6524_v49  ;;  %v14712_v61 = vmul.f32 %v14709_v60, %v6549_v56 }
 0x52c   :  { %v6550_v52 = vmax.f32 %v6544_v48, 0.0 }
 0x52d   :  { %v6551_v53 = vmax.f32 %v6545_v51, 0.0  ;;  %6582 = vrot.lane.b32.xlu1 %v14682_v47, %s13666_s19 }
 0x52e   :  { %v14692_v55 = vmul.f32 %v14689_v54, %v6550_v52 }
 0x52f   :  { %v14700_v59 = vmul.f32 %v14697_v57, %v6551_v53 }
 0x531   :  { %6586 = vrot.lane.b32.xlu1 %v14692_v55, %s13666_s19  ;;  %6588 = vrot.lane.b32.xlu0 %v14700_v59, %s13666_s19 }
 0x535   :  { %6560 = vrot.lane.b32.xlu1 %v14670_v43, %s13668_s28  ;;  %6584 = vrot.lane.b32.xlu0 %v14712_v61, %s13666_s19 }
 0x539   :  { %6562 = vrot.lane.b32.xlu1 %v14682_v47, %s13668_s28  ;;  %6558 = vrot.lane.b32.xlu0 %v14662_v39, %s13668_s28 }
 0x53d   :  { %6566 = vrot.lane.b32.xlu1 %v14692_v55, %s13668_s28  ;;  %6568 = vrot.lane.b32.xlu0 %v14700_v59, %s13668_s28 }
 0x541   :  { %7032 = vrot.lane.b32.xlu1 %v14670_v43, %s13669_s0  ;;  %6564 = vrot.lane.b32.xlu0 %v14712_v61, %s13668_s28 }
 0x545   :  { %7034 = vrot.lane.b32.xlu1 %v14682_v47, %s13669_s0  ;;  %7030 = vrot.lane.b32.xlu0 %v14662_v39, %s13669_s0 }
 0x549   :  { %7038 = vrot.lane.b32.xlu1 %v14692_v55, %s13669_s0  ;;  %7040 = vrot.lane.b32.xlu0 %v14700_v59, %s13669_s0 }
 0x54d   :  { %7274 = vrot.lane.b32.xlu1 %v14670_v43, %s13670_s29  ;;  %7036 = vrot.lane.b32.xlu0 %v14712_v61, %s13669_s0 }
 0x551   :  { %7276 = vrot.lane.b32.xlu1 %v14682_v47, %s13670_s29  ;;  %7272 = vrot.lane.b32.xlu0 %v14662_v39, %s13670_s29 }
 0x555   :  { %7280 = vrot.lane.b32.xlu1 %v14692_v55, %s13670_s29  ;;  %7282 = vrot.lane.b32.xlu0 %v14700_v59, %s13670_s29 }
 0x559   :  { %7742 = vrot.lane.b32.xlu1 %v14682_v47, %s13671_s30  ;;  %7278 = vrot.lane.b32.xlu0 %v14712_v61, %s13670_s29 }
 0x55d   :  { %7744 = vrot.lane.b32.xlu1 %v14712_v61, %s13671_s30  ;;  %7740 = vrot.lane.b32.xlu0 %v14670_v43, %s13671_s30 }
 0x561   :  { %7748 = vrot.lane.b32.xlu1 %v14700_v59, %s13671_s30  ;;  %7738 = vrot.lane.b32.xlu0 %v14662_v39, %s13671_s30 }
 0x565   :  { %7984 = vrot.lane.b32.xlu1 %v14682_v47, %s13672_s5  ;;  %7746 = vrot.lane.b32.xlu0 %v14692_v55, %s13671_s30 }
 0x569   :  { %7986 = vrot.lane.b32.xlu1 %v14712_v61, %s13672_s5  ;;  %7982 = vrot.lane.b32.xlu0 %v14670_v43, %s13672_s5 }
 0x56d   :  { %7990 = vrot.lane.b32.xlu1 %v14700_v59, %s13672_s5  ;;  %7980 = vrot.lane.b32.xlu0 %v14662_v39, %s13672_s5 }
 0x571   :  { %8226 = vrot.lane.b32.xlu1 %v14682_v47, %s13673_s6  ;;  %7988 = vrot.lane.b32.xlu0 %v14692_v55, %s13672_s5 }
 0x575   :  { %8228 = vrot.lane.b32.xlu1 %v14712_v61, %s13673_s6  ;;  %8224 = vrot.lane.b32.xlu0 %v14670_v43, %s13673_s6 }
 0x579   :  { %8232 = vrot.lane.b32.xlu1 %v14700_v59, %s13673_s6  ;;  %8222 = vrot.lane.b32.xlu0 %v14662_v39, %s13673_s6 }
 0x57d   :  { %8468 = vrot.lane.b32.xlu1 %v14682_v47, %s13674_s7  ;;  %8230 = vrot.lane.b32.xlu0 %v14692_v55, %s13673_s6 }
 0x581   :  { %8470 = vrot.lane.b32.xlu1 %v14712_v61, %s13674_s7  ;;  %8466 = vrot.lane.b32.xlu0 %v14670_v43, %s13674_s7 }
 0x585   :  { %8474 = vrot.lane.b32.xlu1 %v14700_v59, %s13674_s7  ;;  %8464 = vrot.lane.b32.xlu0 %v14662_v39, %s13674_s7 }
 0x589   :  { %8472 = vrot.lane.b32.xlu0 %v14692_v55, %s13674_s7 }
 0x58d   :  { %8710 = vperm.xlu0 %13628, %v13254_v63  }
 0x59a   :  { %v6579_v7 = vpop.permute.xlu0 %6578 }
 0x59b   :  { %v6581_v8 = vpop.permute.xlu1 %6580 }
 0x59c   :  { %v6594_v11 = vsel %vm64_vm0, %v6579_v7, %v6581_v8 }
 0x59d   :  { %6601 = vmatprep.subr.mxu1 %v6594_v11  ;;  %v13230_v11 = vld [vmem:[%s15645_s1 + $0xf0] sm:$0xff] }
 0x59f   :  { %v6583_v3 = vpop.permute.xlu1 %6582 }
 0x5a0   :  { %v6593_v23 = vsel %vm64_vm0, %v6581_v8, %v6583_v3 }
 0x5a3   :  { %v6587_v1 = vpop.permute.xlu1 %6586  ;;  %v6589_v13 = vpop.permute.xlu0 %6588 }
 0x5a4   :  { %v6595_v0 = vsel %vm64_vm0, %v6589_v13, %v6579_v7  ;;  %v6590_v24 = vsel %vm64_vm0, %v6587_v1, %v6589_v13 }
 0x5a5   :  { %6602 = vmatpush1.msra.mxu1 %v6595_v0 }
 0x5a6   :  { %13220 = vmatmul.mubr.msk.f32.vlgmr.msra.gmra.mrb[6].mxu1 %vm73_vm1, %v13219_v6 }
 0x5a7   :  { %v6561_v15 = vpop.permute.xlu1 %6560  ;;  %v6585_v16 = vpop.permute.xlu0 %6584  ;;  %6736 = vmatprep.mubr.f32.mxu1 %v13667_v4 }
 0x5a8   :  { %v6592_v17 = vsel %vm64_vm0, %v6583_v3, %v6585_v16  ;;  %v6591_v27 = vsel %vm64_vm0, %v6585_v16, %v6587_v1 }
 0x5a9   :  { %6672 = vmatprep.subr.mxu1 %v6592_v17 }
 0x5aa   :  { %6673 = vmatpush1.msra.mxu1 %v6593_v23 }
 0x5ab   :  { %v6563_v25 = vpop.permute.xlu1 %6562  ;;  %13221 = vmatmul.mubr.msk.f32.vlgmr.msra.gmra.mrb[8].mxu1 %vm73_vm1, %v13219_v6  ;;  %6743 = vmatprep.subr.mxu1 %v6590_v24  ;;  %v6559_v26 = vpop.permute.xlu0 %6558 }
 0x5ac   :  { %6744 = vmatpush1.msra.mxu1 %v6591_v27  ;;  %v6574_v28 = vsel %vm44_vm2, %v6559_v26, %v6561_v15  ;;  %6807 = vmatprep.mubr.f32.mxu1 %v13667_v4  ;;  %v6573_v19 = vsel %vm44_vm2, %v6561_v15, %v6563_v25 }
 0x5ad   :  { %6817 = vmatprep.subr.mxu1 %v6574_v28 }
 0x5af   :  { %v6567_v29 = vpop.permute.xlu1 %6566  ;;  %13222 = vmatmul.mubr.msk.f32.vlgmr.msra.gmra.mrb[10].mxu1 %vm73_vm1, %v13219_v6  ;;  %v6569_v30 = vpop.permute.xlu0 %6568 }
 0x5b0   :  { %v6575_v32 = vsel %vm44_vm2, %v6569_v30, %v6559_v26  ;;  %6881 = vmatprep.mubr.f32.mxu1 %v13667_v4  ;;  %v6570_v58 = vsel %vm44_vm2, %v6567_v29, %v6569_v30 }
 0x5b1   :  { %6818 = vmatpush1.msra.mxu1 %v6575_v32 }
 0x5b3   :  { %v7033_v33 = vpop.permute.xlu1 %7032  ;;  %13223 = vmatmul.mubr.msk.f32.vlgmr.msra.gmra.mrb[6].mxu1 %vm73_vm1, %v13218_v12  ;;  %v6565_v22 = vpop.permute.xlu0 %6564 }
 0x5b4   :  { %v6572_v5 = vsel %vm44_vm2, %v6563_v25, %v6565_v22  ;;  %6952 = vmatprep.mubr.f32.mxu1 %v13667_v4  ;;  %v6571_v36 = vsel %vm44_vm2, %v6565_v22, %v6567_v29  ;;  %v13234_v25 = vld [vmem:[%s15645_s1 + $0xf8] sm:$0xff] }
 0x5b5   :  { %6888 = vmatprep.subr.mxu1 %v6572_v5 }
 0x5b6   :  { %6889 = vmatpush1.msra.mxu1 %v6573_v19 }
 0x5b7   :  { %v7035_v21 = vpop.permute.xlu1 %7034  ;;  %13224 = vmatmul.mubr.msk.f32.vlgmr.msra.gmra.mrb[8].mxu1 %vm73_vm1, %v13218_v12  ;;  %6959 = vmatprep.subr.mxu1 %v6570_v58  ;;  %v7031_v35 = vpop.permute.xlu0 %7030 }
 0x5b8   :  { %6960 = vmatpush1.msra.mxu1 %v6571_v36  ;;  %v7046_v37 = vsel %vm518_vm3, %v7031_v35, %v7033_v33  ;;  %7023 = vmatprep.mubr.f32.mxu1 %v13667_v4  ;;  %v7045_v49 = vsel %vm518_vm3, %v7033_v33, %v7035_v21  ;;  %v13242_v36 = vld [vmem:[%s15645_s1 + $0x108] sm:$0xff] }
 0x5b9   :  { %7053 = vmatprep.subr.mxu1 %v7046_v37 }
 0x5bb   :  { %v7039_v2 = vpop.permute.xlu1 %7038  ;;  %13225 = vmatmul.mubr.msk.f32.vlgmr.msra.gmra.mrb[10].mxu1 %vm73_vm1, %v13218_v12  ;;  %v7041_v18 = vpop.permute.xlu0 %7040 }
 0x5bc   :  { %v7047_v40 = vsel %vm518_vm3, %v7041_v18, %v7031_v35  ;;  %7117 = vmatprep.mubr.f32.mxu1 %v13667_v4  ;;  %v7042_v50 = vsel %vm518_vm3, %v7039_v2, %v7041_v18 }
 0x5bd   :  { %7054 = vmatpush1.msra.mxu1 %v7047_v40 }
 0x5bf   :  { %v7275_v44 = vpop.permute.xlu1 %7274  ;;  %13227 = vmatmul.mubr.msk.f32.vlgmr.msra.gmra.mrb[6].mxu1 %vm73_vm1, %v13226_v41  ;;  %v7037_v45 = vpop.permute.xlu0 %7036 }
 0x5c0   :  { %v7044_v48 = vsel %vm518_vm3, %v7035_v21, %v7037_v45  ;;  %7188 = vmatprep.mubr.f32.mxu1 %v13667_v4  ;;  %v7043_v53 = vsel %vm518_vm3, %v7037_v45, %v7039_v2 }
 0x5c1   :  { %7124 = vmatprep.subr.mxu1 %v7044_v48 }
 0x5c2   :  { %7125 = vmatpush1.msra.mxu1 %v7045_v49 }
 0x5c3   :  { %v7277_v51 = vpop.permute.xlu1 %7276  ;;  %13228 = vmatmul.mubr.msk.f32.vlgmr.msra.gmra.mrb[8].mxu1 %vm73_vm1, %v13226_v41  ;;  %7195 = vmatprep.subr.mxu1 %v7042_v50  ;;  %v7273_v52 = vpop.permute.xlu0 %7272 }
 0x5c4   :  { %7196 = vmatpush1.msra.mxu1 %v7043_v53  ;;  %v7288_v56 = vsel %vm761_vm4, %v7273_v52, %v7275_v44  ;;  %7259 = vmatprep.mubr.f32.mxu1 %v13667_v4  ;;  %v7287_v6 = vsel %vm761_vm4, %v7275_v44, %v7277_v51 }
 0x5c5   :  { %7295 = vmatprep.subr.mxu1 %v7288_v56 }
 0x5c7   :  { %v7281_v63 = vpop.permute.xlu1 %7280  ;;  %13229 = vmatmul.mubr.msk.f32.vlgmr.msra.gmra.mrb[10].mxu1 %vm73_vm1, %v13226_v41  ;;  %v7283_v7 = vpop.permute.xlu0 %7282 }
 0x5c8   :  { %v7289_v8 = vsel %vm761_vm4, %v7283_v7, %v7273_v52  ;;  %7359 = vmatprep.mubr.f32.mxu1 %v13667_v4  ;;  %v7284_v0 = vsel %vm761_vm4, %v7281_v63, %v7283_v7 }
 0x5c9   :  { %7296 = vmatpush1.msra.mxu1 %v7289_v8 }
 0x5cb   :  { %v7743_v3 = vpop.permute.xlu1 %7742  ;;  %13231 = vmatmul.mubr.msk.f32.vlgmr.msra.gmra.mrb[6].mxu1 %vm73_vm1, %v13230_v11  ;;  %v7279_v1 = vpop.permute.xlu0 %7278 }
 0x5cc   :  { %v7286_v13 = vsel %vm761_vm4, %v7277_v51, %v7279_v1  ;;  %7430 = vmatprep.mubr.f32.mxu1 %v13667_v4  ;;  %v7285_v17 = vsel %vm761_vm4, %v7279_v1, %v7281_v63  ;;  %v13246_v51 = vld [vmem:[%s15645_s1 + $0x110] sm:$0xff] }
 0x5cd   :  { %7366 = vmatprep.subr.mxu1 %v7286_v13 }
 0x5ce   :  { %7367 = vmatpush1.msra.mxu1 %v7287_v6  ;;  %v13250_v6 = vld [vmem:[%s15645_s1 + $0x118] sm:$0xff] }
 0x5cf   :  { %v7745_v15 = vpop.permute.xlu1 %7744  ;;  %13232 = vmatmul.mubr.msk.f32.vlgmr.msra.gmra.mrb[8].mxu1 %vm73_vm1, %v13230_v11  ;;  %7437 = vmatprep.subr.mxu1 %v7284_v0  ;;  %v7741_v16 = vpop.permute.xlu0 %7740 }
 0x5d0   :  { %7438 = vmatpush1.msra.mxu1 %v7285_v17  ;;  %7501 = vmatprep.mubr.f32.mxu1 %v13667_v4  ;;  %v7753_v28 = vsel %vm1228_vm5, %v7741_v16, %v7743_v3  ;;  %v7752_v30 = vsel %vm1228_vm5, %v7743_v3, %v7745_v15 }
 0x5d1   :  { %7519 = vmatprep.subr.mxu1 %v14670_v43 }
 0x5d3   :  { %v7749_v23 = vpop.permute.xlu1 %7748  ;;  %13233 = vmatmul.mubr.msk.f32.vlgmr.msra.gmra.mrb[10].mxu1 %vm73_vm1, %v13230_v11  ;;  %v7739_v24 = vpop.permute.xlu0 %7738 }
 0x5d4   :  { %7520 = vmatpush1.msra.mxu1 %v14662_v39  ;;  %7583 = vmatprep.mubr.f32.mxu1 %v13667_v4  ;;  %v7755_v12 = vsel %vm1228_vm5, %v7749_v23, %v7739_v24 }
 0x5d5   :  { %7590 = vmatprep.subr.mxu1 %v14712_v61 }
 0x5d7   :  { %v7985_v26 = vpop.permute.xlu1 %7984  ;;  %13235 = vmatmul.mubr.msk.f32.vlgmr.msra.gmra.mrb[6].mxu1 %vm73_vm1, %v13234_v25  ;;  %v7747_v27 = vpop.permute.xlu0 %7746 }
 0x5d8   :  { %7591 = vmatpush1.msra.mxu1 %v14682_v47  ;;  %7654 = vmatprep.mubr.f32.mxu1 %v13667_v4  ;;  %v7754_v47 = vsel %vm1228_vm5, %v7739_v24, %v7741_v16  ;;  %v7750_v22 = vsel %vm1228_vm5, %v7747_v27, %v7749_v23 }
 0x5d9   :  { %7661 = vmatprep.subr.mxu1 %v14700_v59  ;;  %v7751_v59 = vsel %vm1228_vm5, %v7745_v15, %v7747_v27 }
 0x5db   :  { %v7987_v43 = vpop.permute.xlu1 %7986  ;;  %13236 = vmatmul.mubr.msk.f32.vlgmr.msra.gmra.mrb[8].mxu1 %vm73_vm1, %v13234_v25  ;;  %v7983_v39 = vpop.permute.xlu0 %7982 }
 0x5dc   :  { %7662 = vmatpush1.msra.mxu1 %v14692_v55  ;;  %7725 = vmatprep.mubr.f32.mxu1 %v13667_v4  ;;  %v13238_v55 = vld [vmem:[%s15645_s1 + $0x100] sm:$0xff]  ;;  %v7995_v19 = vsel %vm1471_vm6, %v7983_v39, %v7985_v26  ;;  %v7994_v2 = vsel %vm1471_vm6, %v7985_v26, %v7987_v43 }
 0x5dd   :  { %7761 = vmatprep.subr.mxu1 %v7753_v28 }
 0x5df   :  { %13237 = vmatmul.mubr.msk.f32.vlgmr.msra.gmra.mrb[10].mxu1 %vm73_vm1, %v13234_v25  ;;  %v7981_v61 = vpop.permute.xlu0 %7980  ;;  %v7991_v29 = vpop.permute.xlu1 %7990 }
 0x5e0   :  { %7762 = vmatpush1.msra.mxu1 %v7754_v47  ;;  %7825 = vmatprep.mubr.f32.mxu1 %v13667_v4  ;;  %v7996_v58 = vsel %vm1471_vm6, %v7981_v61, %v7983_v39  ;;  %v7997_v40 = vsel %vm1471_vm6, %v7991_v29, %v7981_v61 }
 0x5e1   :  { %7832 = vmatprep.subr.mxu1 %v7751_v59 }
 0x5e3   :  { %13239 = vmatmul.mubr.msk.f32.vlgmr.msra.gmra.mrb[6].mxu1 %vm73_vm1, %v13238_v55  ;;  %v7989_v32 = vpop.permute.xlu0 %7988  ;;  %v8227_v33 = vpop.permute.xlu1 %8226 }
 0x5e4   :  { %7833 = vmatpush1.msra.mxu1 %v7752_v30  ;;  %7896 = vmatprep.mubr.f32.mxu1 %v13667_v4  ;;  %v7993_v35 = vsel %vm1471_vm6, %v7987_v43, %v7989_v32  ;;  %v7992_v44 = vsel %vm1471_vm6, %v7989_v32, %v7991_v29 }
 0x5e5   :  { %7903 = vmatprep.subr.mxu1 %v7755_v12 }
 0x5e7   :  { %13240 = vmatmul.mubr.msk.f32.vlgmr.msra.gmra.mrb[8].mxu1 %vm73_vm1, %v13238_v55  ;;  %v8225_v5 = vpop.permute.xlu0 %8224  ;;  %v8229_v37 = vpop.permute.xlu1 %8228 }
 0x5e8   :  { %7904 = vmatpush1.msra.mxu1 %v7750_v22  ;;  %7967 = vmatprep.mubr.f32.mxu1 %v13667_v4  ;;  %v8237_v45 = vsel %vm1714_vm7, %v8225_v5, %v8227_v33  ;;  %v8236_v56 = vsel %vm1714_vm7, %v8227_v33, %v8229_v37 }
 0x5e9   :  { %8003 = vmatprep.subr.mxu1 %v7995_v19 }
 0x5eb   :  { %13241 = vmatmul.mubr.msk.f32.vlgmr.msra.gmra.mrb[10].mxu1 %vm73_vm1, %v13238_v55  ;;  %v8223_v21 = vpop.permute.xlu0 %8222  ;;  %v8233_v41 = vpop.permute.xlu1 %8232 }
 0x5ec   :  { %8004 = vmatpush1.msra.mxu1 %v7996_v58  ;;  %8067 = vmatprep.mubr.f32.mxu1 %v13667_v4  ;;  %v8238_v49 = vsel %vm1714_vm7, %v8223_v21, %v8225_v5  ;;  %v8239_v63 = vsel %vm1714_vm7, %v8233_v41, %v8223_v21 }
 0x5ed   :  { %8074 = vmatprep.subr.mxu1 %v7993_v35 }
 0x5ef   :  { %13243 = vmatmul.mubr.msk.f32.vlgmr.msra.gmra.mrb[6].mxu1 %vm73_vm1, %v13242_v36  ;;  %v8231_v18 = vpop.permute.xlu0 %8230  ;;  %v8469_v52 = vpop.permute.xlu1 %8468 }
 0x5f0   :  { %8075 = vmatpush1.msra.mxu1 %v7994_v2  ;;  %8138 = vmatprep.mubr.f32.mxu1 %v13667_v4  ;;  %v8235_v50 = vsel %vm1714_vm7, %v8229_v37, %v8231_v18  ;;  %v8234_v8 = vsel %vm1714_vm7, %v8231_v18, %v8233_v41  ;;  %v13256_v18 = vld [vmem:[%s15645_s1 + $0x128] sm:$0xff] }
 0x5f1   :  { %8145 = vmatprep.subr.mxu1 %v7997_v40 }
 0x5f3   :  { %13244 = vmatmul.mubr.msk.f32.vlgmr.msra.gmra.mrb[8].mxu1 %vm73_vm1, %v13242_v36  ;;  %v8467_v48 = vpop.permute.xlu0 %8466  ;;  %v8471_v7 = vpop.permute.xlu1 %8470 }
 0x5f4   :  { %8146 = vmatpush1.msra.mxu1 %v7992_v44  ;;  %8209 = vmatprep.mubr.f32.mxu1 %v13667_v4  ;;  %v8479_v11 = vsel %vm1957_vm8, %v8467_v48, %v8469_v52  ;;  %v8478_v15 = vsel %vm1957_vm8, %v8469_v52, %v8471_v7 }
 0x5f5   :  { %8245 = vmatprep.subr.mxu1 %v8237_v45 }
 0x5f7   :  { %13245 = vmatmul.mubr.msk.f32.vlgmr.msra.gmra.mrb[10].mxu1 %vm73_vm1, %v13242_v36  ;;  %v8465_v53 = vpop.permute.xlu0 %8464  ;;  %v8475_v0 = vpop.permute.xlu1 %8474 }
 0x5f8   :  { %8246 = vmatpush1.msra.mxu1 %v8238_v49  ;;  %8309 = vmatprep.mubr.f32.mxu1 %v13667_v4  ;;  %v8480_v1 = vsel %vm1957_vm8, %v8465_v53, %v8467_v48  ;;  %v8481_v16 = vsel %vm1957_vm8, %v8475_v0, %v8465_v53 }
 0x5f9   :  { %8316 = vmatprep.subr.mxu1 %v8235_v50 }
 0x5fb   :  { %13247 = vmatmul.mubr.msk.f32.vlgmr.msra.gmra.mrb[6].mxu1 %vm73_vm1, %v13246_v51  ;;  %v8473_v3 = vpop.permute.xlu0 %8472 }
 0x5fc   :  { %8317 = vmatpush1.msra.mxu1 %v8236_v56  ;;  %8380 = vmatprep.mubr.f32.mxu1 %v13667_v4  ;;  %v8477_v13 = vsel %vm1957_vm8, %v8471_v7, %v8473_v3  ;;  %v8476_v17 = vsel %vm1957_vm8, %v8473_v3, %v8475_v0 }
 0x5fd   :  { %8387 = vmatprep.subr.mxu1 %v8239_v63 }
 0x5ff   :  { %13248 = vmatmul.mubr.msk.f32.vlgmr.msra.gmra.mrb[8].mxu1 %vm73_vm1, %v13246_v51 }
 0x600   :  { %8388 = vmatpush1.msra.mxu1 %v8234_v8  ;;  %8451 = vmatprep.mubr.f32.mxu1 %v13667_v4  ;;  %v13255_v8 = vld [vmem:[%s15645_s1 + $0x120] sm:$0xff] }
 0x601   :  { %8487 = vmatprep.subr.mxu1 %v8479_v11 }
 0x603   :  { %13249 = vmatmul.mubr.msk.f32.vlgmr.msra.gmra.mrb[10].mxu1 %vm73_vm1, %v13246_v51 }
 0x604   :  { %8488 = vmatpush1.msra.mxu1 %v8480_v1  ;;  %8551 = vmatprep.mubr.f32.mxu1 %v13667_v4 }
 0x605   :  { %8558 = vmatprep.subr.mxu1 %v8477_v13 }
 0x607   :  { %13251 = vmatmul.mubr.msk.f32.vlgmr.msra.gmra.mrb[6].mxu1 %vm73_vm1, %v13250_v6 }
 0x608   :  { %8559 = vmatpush1.msra.mxu1 %v8478_v15  ;;  %8622 = vmatprep.mubr.f32.mxu1 %v13667_v4 }
 0x609   :  { %8629 = vmatprep.subr.mxu1 %v8481_v16 }
 0x60b   :  { %13252 = vmatmul.mubr.msk.f32.vlgmr.msra.gmra.mrb[8].mxu1 %vm73_vm1, %v13250_v6 }
 0x60c   :  { %8630 = vmatpush1.msra.mxu1 %v8476_v17  ;;  %8693 = vmatprep.mubr.f32.mxu1 %v13667_v4  ;;  %v8711_v23 = vpop.permute.xlu0 %8710 }
 0x60f   :  { %13253 = vmatmul.mubr.msk.f32.vlgmr.msra.gmra.mrb[10].mxu1 %vm73_vm1, %v13250_v6 }
 0x610   :  { %11017 = vmatprep.mubr.f32.mxu1 %v13667_v4 }
 0x6da   :  { %v8553_v24 = vpop.f32.mrb[6].mxu1 }
 0x6db   :  { %v8713_v25 = vadd.f32 %v8711_v23, %v8553_v24  ;;  %v8555_v26 = vpop.f32.mrb[7].mxu1 }
 0x6dc   :  { %v8714_v27 = vadd.f32 %v8711_v23, %v8555_v26  ;;  %v13263_v26 = vld [vmem:[%s15645_s1 + $0x130] sm:$0xff] }
 0x6dd   :  { %v8719_v43 = vadd.f32 %v8713_v25, %v14357_v31 }
 0x6de   :  { %v8720_v39 = vadd.f32 %v8714_v27, %v14360_v62  ;;  %v8624_v28 = vpop.f32.mrb[8].mxu1 }
 0x6df   :  { %v8725_v47 = vmax.f32 %v8719_v43, 0.0  ;;  %v8715_v61 = vadd.f32 %v8711_v23, %v8624_v28  ;;  %v8626_v59 = vpop.f32.mrb[9].mxu1 }
 0x6e0   :  { %v8726_v55 = vmax.f32 %v8720_v39, 0.0  ;;  %v8716_v12 = vadd.f32 %v8711_v23, %v8626_v59 }
 0x6e1   :  { %v14989_v29 = vmul.f32 %v14659_v20, %v8725_v47  ;;  %v8721_v30 = vadd.f32 %v8715_v61, %v14367_v34 }
 0x6e2   :  { %v14993_v32 = vmul.f32 %v14667_v42, %v8726_v55  ;;  %v8695_v33 = vpop.f32.mrb[10].mxu1  ;;  %v8722_v42 = vadd.f32 %v8716_v12, %v14382_v14 }
 0x6e3   :  { %v8727_v22 = vmax.f32 %v8721_v30, 0.0  ;;  %v8717_v5 = vadd.f32 %v8711_v23, %v8695_v33  ;;  %v8697_v31 = vpop.f32.mrb[11].mxu1  ;;  %8757 = vrot.lane.b32.xlu1 %v14989_v29, %s13666_s19 }
 0x6e4   :  { %v8718_v62 = vadd.f32 %v8711_v23, %v8697_v31  ;;  %8759 = vrot.lane.b32.xlu0 %v14993_v32, %s13666_s19  ;;  %v8728_v36 = vmax.f32 %v8722_v42, 0.0 }
 0x6e5   :  { %v15000_v20 = vmul.f32 %v14679_v46, %v8727_v22  ;;  %v8723_v34 = vadd.f32 %v8717_v5, %v14372_v9  ;;  %v13267_v5 = vld [vmem:[%s15645_s1 + $0x138] sm:$0xff] }
 0x6e6   :  { %v8724_v19 = vadd.f32 %v8718_v62, %v14375_v38  ;;  %v15018_v9 = vmul.f32 %v14709_v60, %v8728_v36  ;;  %v13291_v38 = vld [vmem:[%s15646_s2 + $0x20] sm:$0xff] }
 0x6e7   :  { %v8729_v58 = vmax.f32 %v8723_v34, 0.0 }
 0x6e8   :  { %v8730_v21 = vmax.f32 %v8724_v19, 0.0  ;;  %8761 = vrot.lane.b32.xlu0 %v15000_v20, %s13666_s19 }
 0x6e9   :  { %v15008_v35 = vmul.f32 %v14689_v54, %v8729_v58 }
 0x6ea   :  { %v15011_v37 = vmul.f32 %v14697_v57, %v8730_v21 }
 0x6ec   :  { %8765 = vrot.lane.b32.xlu0 %v15008_v35, %s13666_s19  ;;  %8767 = vrot.lane.b32.xlu1 %v15011_v37, %s13666_s19 }
 0x6f0   :  { %8739 = vrot.lane.b32.xlu0 %v14993_v32, %s13668_s28  ;;  %8763 = vrot.lane.b32.xlu1 %v15018_v9, %s13666_s19 }
 0x6f4   :  { %8741 = vrot.lane.b32.xlu0 %v15000_v20, %s13668_s28  ;;  %8737 = vrot.lane.b32.xlu1 %v14989_v29, %s13668_s28 }
 0x6f8   :  { %8745 = vrot.lane.b32.xlu0 %v15008_v35, %s13668_s28  ;;  %8747 = vrot.lane.b32.xlu1 %v15011_v37, %s13668_s28 }
 0x6fc   :  { %9211 = vrot.lane.b32.xlu0 %v14993_v32, %s13669_s0  ;;  %8743 = vrot.lane.b32.xlu1 %v15018_v9, %s13668_s28 }
 0x700   :  { %9213 = vrot.lane.b32.xlu0 %v15000_v20, %s13669_s0  ;;  %9209 = vrot.lane.b32.xlu1 %v14989_v29, %s13669_s0 }
 0x704   :  { %9217 = vrot.lane.b32.xlu0 %v15008_v35, %s13669_s0  ;;  %9219 = vrot.lane.b32.xlu1 %v15011_v37, %s13669_s0 }
 0x708   :  { %9453 = vrot.lane.b32.xlu0 %v14993_v32, %s13670_s29  ;;  %9215 = vrot.lane.b32.xlu1 %v15018_v9, %s13669_s0 }
 0x70c   :  { %9455 = vrot.lane.b32.xlu0 %v15000_v20, %s13670_s29  ;;  %9451 = vrot.lane.b32.xlu1 %v14989_v29, %s13670_s29 }
 0x710   :  { %9459 = vrot.lane.b32.xlu0 %v15008_v35, %s13670_s29  ;;  %9461 = vrot.lane.b32.xlu1 %v15011_v37, %s13670_s29 }
 0x714   :  { %9921 = vrot.lane.b32.xlu0 %v15000_v20, %s13671_s30  ;;  %9457 = vrot.lane.b32.xlu1 %v15018_v9, %s13670_s29 }
 0x718   :  { %9923 = vrot.lane.b32.xlu0 %v15018_v9, %s13671_s30  ;;  %9919 = vrot.lane.b32.xlu1 %v14993_v32, %s13671_s30 }
 0x71c   :  { %9927 = vrot.lane.b32.xlu0 %v15011_v37, %s13671_s30  ;;  %9917 = vrot.lane.b32.xlu1 %v14989_v29, %s13671_s30 }
 0x720   :  { %10163 = vrot.lane.b32.xlu0 %v15000_v20, %s13672_s5  ;;  %9925 = vrot.lane.b32.xlu1 %v15008_v35, %s13671_s30 }
 0x724   :  { %10165 = vrot.lane.b32.xlu0 %v15018_v9, %s13672_s5  ;;  %10161 = vrot.lane.b32.xlu1 %v14993_v32, %s13672_s5 }
 0x728   :  { %10169 = vrot.lane.b32.xlu0 %v15011_v37, %s13672_s5  ;;  %10159 = vrot.lane.b32.xlu1 %v14989_v29, %s13672_s5 }
 0x72c   :  { %10405 = vrot.lane.b32.xlu0 %v15000_v20, %s13673_s6  ;;  %10167 = vrot.lane.b32.xlu1 %v15008_v35, %s13672_s5 }
 0x730   :  { %10407 = vrot.lane.b32.xlu0 %v15018_v9, %s13673_s6  ;;  %10403 = vrot.lane.b32.xlu1 %v14993_v32, %s13673_s6 }
 0x734   :  { %10411 = vrot.lane.b32.xlu0 %v15011_v37, %s13673_s6  ;;  %10401 = vrot.lane.b32.xlu1 %v14989_v29, %s13673_s6 }
 0x738   :  { %10647 = vrot.lane.b32.xlu0 %v15000_v20, %s13674_s7  ;;  %10409 = vrot.lane.b32.xlu1 %v15008_v35, %s13673_s6 }
 0x73c   :  { %10649 = vrot.lane.b32.xlu0 %v15018_v9, %s13674_s7  ;;  %10645 = vrot.lane.b32.xlu1 %v14993_v32, %s13674_s7 }
 0x740   :  { %10653 = vrot.lane.b32.xlu0 %v15011_v37, %s13674_s7  ;;  %10643 = vrot.lane.b32.xlu1 %v14989_v29, %s13674_s7 }
 0x744   :  { %10651 = vrot.lane.b32.xlu1 %v15008_v35, %s13674_s7 }
 0x748   :  { %10889 = vperm.xlu1 %13629, %v13291_v38  }
 0x755   :  { %v8758_v14 = vpop.permute.xlu1 %8757 }
 0x756   :  { %v8760_v46 = vpop.permute.xlu0 %8759 }
 0x757   :  { %v8773_v54 = vsel %vm64_vm0, %v8758_v14, %v8760_v46 }
 0x758   :  { %8780 = vmatprep.subr.mxu0 %v8773_v54 }
 0x75a   :  { %v8762_v57 = vpop.permute.xlu0 %8761 }
 0x75b   :  { %v8772_v48 = vsel %vm64_vm0, %v8760_v46, %v8762_v57  ;;  %v13271_v46 = vld [vmem:[%s15645_s1 + $0x140] sm:$0xff] }
 0x75e   :  { %v8766_v60 = vpop.permute.xlu0 %8765  ;;  %v8768_v2 = vpop.permute.xlu1 %8767 }
 0x75f   :  { %v8774_v40 = vsel %vm64_vm0, %v8768_v2, %v8758_v14  ;;  %v8769_v49 = vsel %vm64_vm0, %v8766_v60, %v8768_v2 }
 0x760   :  { %8781 = vmatpush1.msra.mxu0 %v8774_v40 }
 0x761   :  { %13257 = vmatmul.mubr.msk.f32.vlgmr.msra.gmra.mrb[12].mxu0 %vm73_vm1, %v13256_v18 }
 0x762   :  { %v8740_v41 = vpop.permute.xlu0 %8739  ;;  %v8764_v44 = vpop.permute.xlu1 %8763  ;;  %8915 = vmatprep.mubr.f32.mxu0 %v13667_v4 }
 0x763   :  { %v8771_v45 = vsel %vm64_vm0, %v8762_v57, %v8764_v44  ;;  %v8770_v50 = vsel %vm64_vm0, %v8764_v44, %v8766_v60 }
 0x764   :  { %8851 = vmatprep.subr.mxu0 %v8771_v45  ;;  %v13275_v45 = vld [vmem:[%s15645_s1 + $0x148] sm:$0xff] }
 0x765   :  { %8852 = vmatpush1.msra.mxu0 %v8772_v48 }
 0x766   :  { %v8742_v51 = vpop.permute.xlu0 %8741  ;;  %13258 = vmatmul.mubr.msk.f32.vlgmr.msra.gmra.mrb[14].mxu0 %vm73_vm1, %v13256_v18  ;;  %8922 = vmatprep.subr.mxu0 %v8769_v49  ;;  %v8738_v52 = vpop.permute.xlu1 %8737 }
 0x767   :  { %8923 = vmatpush1.msra.mxu0 %v8770_v50  ;;  %v8753_v53 = vsel %vm44_vm2, %v8738_v52, %v8740_v41  ;;  %8986 = vmatprep.mubr.f32.mxu0 %v13667_v4  ;;  %v8752_v13 = vsel %vm44_vm2, %v8740_v41, %v8742_v51 }
 0x768   :  { %8996 = vmatprep.subr.mxu0 %v8753_v53 }
 0x76a   :  { %v8746_v56 = vpop.permute.xlu0 %8745  ;;  %13259 = vmatmul.mubr.msk.f32.vlgmr.msra.gmra.mrb[16].mxu0 %vm73_vm1, %v13256_v18  ;;  %v8748_v63 = vpop.permute.xlu1 %8747 }
 0x76b   :  { %v8754_v7 = vsel %vm44_vm2, %v8748_v63, %v8738_v52  ;;  %9060 = vmatprep.mubr.f32.mxu0 %v13667_v4  ;;  %v8749_v6 = vsel %vm44_vm2, %v8746_v56, %v8748_v63 }
 0x76c   :  { %8997 = vmatpush1.msra.mxu0 %v8754_v7 }
 0x76e   :  { %v9212_v11 = vpop.permute.xlu0 %9211  ;;  %13260 = vmatmul.mubr.msk.f32.vlgmr.msra.gmra.mrb[12].mxu0 %vm73_vm1, %v13255_v8  ;;  %v8744_v3 = vpop.permute.xlu1 %8743 }
 0x76f   :  { %v8751_v1 = vsel %vm44_vm2, %v8742_v51, %v8744_v3  ;;  %9131 = vmatprep.mubr.f32.mxu0 %v13667_v4  ;;  %v8750_v0 = vsel %vm44_vm2, %v8744_v3, %v8746_v56  ;;  %v13279_v3 = vld [vmem:[%s15645_s1 + $0x150] sm:$0xff] }
 0x770   :  { %9067 = vmatprep.subr.mxu0 %v8751_v1 }
 0x771   :  { %9068 = vmatpush1.msra.mxu0 %v8752_v13 }
 0x772   :  { %v9214_v15 = vpop.permute.xlu0 %9213  ;;  %13261 = vmatmul.mubr.msk.f32.vlgmr.msra.gmra.mrb[14].mxu0 %vm73_vm1, %v13255_v8  ;;  %9138 = vmatprep.subr.mxu0 %v8749_v6  ;;  %v9210_v16 = vpop.permute.xlu1 %9209 }
 0x773   :  { %9139 = vmatpush1.msra.mxu0 %v8750_v0  ;;  %v9225_v17 = vsel %vm518_vm3, %v9210_v16, %v9212_v11  ;;  %9202 = vmatprep.mubr.f32.mxu0 %v13667_v4  ;;  %v9224_v28 = vsel %vm518_vm3, %v9212_v11, %v9214_v15 }
 0x774   :  { %9232 = vmatprep.subr.mxu0 %v9225_v17 }
 0x776   :  { %v9218_v23 = vpop.permute.xlu0 %9217  ;;  %13262 = vmatmul.mubr.msk.f32.vlgmr.msra.gmra.mrb[16].mxu0 %vm73_vm1, %v13255_v8  ;;  %v9220_v24 = vpop.permute.xlu1 %9219 }
 0x777   :  { %v9226_v25 = vsel %vm518_vm3, %v9220_v24, %v9210_v16  ;;  %9296 = vmatprep.mubr.f32.mxu0 %v13667_v4  ;;  %v9221_v47 = vsel %vm518_vm3, %v9218_v23, %v9220_v24 }
 0x778   :  { %9233 = vmatpush1.msra.mxu0 %v9226_v25 }
 0x77a   :  { %v9454_v27 = vpop.permute.xlu0 %9453  ;;  %13264 = vmatmul.mubr.msk.f32.vlgmr.msra.gmra.mrb[12].mxu0 %vm73_vm1, %v13263_v26  ;;  %v9216_v43 = vpop.permute.xlu1 %9215 }
 0x77b   :  { %v9223_v39 = vsel %vm518_vm3, %v9214_v15, %v9216_v43  ;;  %9367 = vmatprep.mubr.f32.mxu0 %v13667_v4  ;;  %v9222_v61 = vsel %vm518_vm3, %v9216_v43, %v9218_v23 }
 0x77c   :  { %9303 = vmatprep.subr.mxu0 %v9223_v39 }
 0x77d   :  { %9304 = vmatpush1.msra.mxu0 %v9224_v28 }
 0x77e   :  { %v9456_v59 = vpop.permute.xlu0 %9455  ;;  %13265 = vmatmul.mubr.msk.f32.vlgmr.msra.gmra.mrb[14].mxu0 %vm73_vm1, %v13263_v26  ;;  %9374 = vmatprep.subr.mxu0 %v9221_v47  ;;  %v9452_v55 = vpop.permute.xlu1 %9451 }
 0x77f   :  { %9375 = vmatpush1.msra.mxu0 %v9222_v61  ;;  %v9467_v30 = vsel %vm761_vm4, %v9452_v55, %v9454_v27  ;;  %9438 = vmatprep.mubr.f32.mxu0 %v13667_v4  ;;  %v9466_v42 = vsel %vm761_vm4, %v9454_v27, %v9456_v59 }
 0x780   :  { %9474 = vmatprep.subr.mxu0 %v9467_v30 }
 0x782   :  { %v9460_v12 = vpop.permute.xlu0 %9459  ;;  %13266 = vmatmul.mubr.msk.f32.vlgmr.msra.gmra.mrb[16].mxu0 %vm73_vm1, %v13263_v26  ;;  %v9462_v33 = vpop.permute.xlu1 %9461  ;;  %v13283_v26 = vld [vmem:[%s15645_s1 + $0x158] sm:$0xff] }
 0x783   :  { %v9468_v22 = vsel %vm761_vm4, %v9462_v33, %v9452_v55  ;;  %9538 = vmatprep.mubr.f32.mxu0 %v13667_v4  ;;  %v9463_v19 = vsel %vm761_vm4, %v9460_v12, %v9462_v33  ;;  %v13287_v33 = vld [vmem:[%s15645_s1 + $0x160] sm:$0xff] }
 0x784   :  { %9475 = vmatpush1.msra.mxu0 %v9468_v22 }
 0x786   :  { %v9922_v31 = vpop.permute.xlu0 %9921  ;;  %13268 = vmatmul.mubr.msk.f32.vlgmr.msra.gmra.mrb[12].mxu0 %vm73_vm1, %v13267_v5  ;;  %v9458_v62 = vpop.permute.xlu1 %9457 }
 0x787   :  { %v9465_v34 = vsel %vm761_vm4, %v9456_v59, %v9458_v62  ;;  %9609 = vmatprep.mubr.f32.mxu0 %v13667_v4  ;;  %v9464_v58 = vsel %vm761_vm4, %v9458_v62, %v9460_v12 }
 0x788   :  { %9545 = vmatprep.subr.mxu0 %v9465_v34 }
 0x789   :  { %9546 = vmatpush1.msra.mxu0 %v9466_v42 }
 0x78a   :  { %v9924_v21 = vpop.permute.xlu0 %9923  ;;  %13269 = vmatmul.mubr.msk.f32.vlgmr.msra.gmra.mrb[14].mxu0 %vm73_vm1, %v13267_v5  ;;  %9616 = vmatprep.subr.mxu0 %v9463_v19  ;;  %v9920_v36 = vpop.permute.xlu1 %9919 }
 0x78b   :  { %9617 = vmatpush1.msra.mxu0 %v9464_v58  ;;  %9680 = vmatprep.mubr.f32.mxu0 %v13667_v4  ;;  %v9932_v18 = vsel %vm1228_vm5, %v9920_v36, %v9922_v31  ;;  %v9931_v49 = vsel %vm1228_vm5, %v9922_v31, %v9924_v21 }
 0x78c   :  { %9698 = vmatprep.subr.mxu0 %v14993_v32 }
 0x78e   :  { %v9928_v38 = vpop.permute.xlu0 %9927  ;;  %13270 = vmatmul.mubr.msk.f32.vlgmr.msra.gmra.mrb[16].mxu0 %vm73_vm1, %v13267_v5  ;;  %v9918_v14 = vpop.permute.xlu1 %9917 }
 0x78f   :  { %9699 = vmatpush1.msra.mxu0 %v14989_v29  ;;  %9762 = vmatprep.mubr.f32.mxu0 %v13667_v4  ;;  %v9933_v40 = vsel %vm1228_vm5, %v9918_v14, %v9920_v36  ;;  %v9934_v51 = vsel %vm1228_vm5, %v9928_v38, %v9918_v14 }
 0x790   :  { %9769 = vmatprep.subr.mxu0 %v15018_v9 }
 0x792   :  { %v10164_v54 = vpop.permute.xlu0 %10163  ;;  %13272 = vmatmul.mubr.msk.f32.vlgmr.msra.gmra.mrb[12].mxu0 %vm73_vm1, %v13271_v46  ;;  %v9926_v57 = vpop.permute.xlu1 %9925 }
 0x793   :  { %9770 = vmatpush1.msra.mxu0 %v15000_v20  ;;  %9833 = vmatprep.mubr.f32.mxu0 %v13667_v4  ;;  %v9930_v44 = vsel %vm1228_vm5, %v9924_v21, %v9926_v57  ;;  %v9929_v52 = vsel %vm1228_vm5, %v9926_v57, %v9928_v38 }
 0x794   :  { %9840 = vmatprep.subr.mxu0 %v15011_v37 }
 0x796   :  { %v10166_v60 = vpop.permute.xlu0 %10165  ;;  %13273 = vmatmul.mubr.msk.f32.vlgmr.msra.gmra.mrb[14].mxu0 %vm73_vm1, %v13271_v46  ;;  %v10162_v2 = vpop.permute.xlu1 %10161 }
 0x797   :  { %9841 = vmatpush1.msra.mxu0 %v15008_v35  ;;  %9904 = vmatprep.mubr.f32.mxu0 %v13667_v4  ;;  %v10174_v63 = vsel %vm1471_vm6, %v10162_v2, %v10164_v54  ;;  %v10173_v13 = vsel %vm1471_vm6, %v10164_v54, %v10166_v60 }
 0x798   :  { %9940 = vmatprep.subr.mxu0 %v9932_v18 }
 0x79a   :  { %13274 = vmatmul.mubr.msk.f32.vlgmr.msra.gmra.mrb[16].mxu0 %vm73_vm1, %v13271_v46  ;;  %v10160_v41 = vpop.permute.xlu1 %10159  ;;  %v10170_v48 = vpop.permute.xlu0 %10169  ;;  %v15294_v46 = vld [vmem:[%s15647_s3] sm:$0xff] }
 0x79b   :  { %9941 = vmatpush1.msra.mxu0 %v9933_v40  ;;  %10004 = vmatprep.mubr.f32.mxu0 %v13667_v4  ;;  %v10175_v7 = vsel %vm1471_vm6, %v10160_v41, %v10162_v2  ;;  %v10176_v0 = vsel %vm1471_vm6, %v10170_v48, %v10160_v41  ;;  %v15302_v2 = vld [vmem:[%s15647_s3 + $0x8] sm:$0xff] }
 0x79c   :  { %10011 = vmatprep.subr.mxu0 %v9930_v44  ;;  %v15314_v44 = vld [vmem:[%s15647_s3 + $0x10] sm:$0xff] }
 0x79e   :  { %13276 = vmatmul.mubr.msk.f32.vlgmr.msra.gmra.mrb[12].mxu0 %vm73_vm1, %v13275_v45  ;;  %v10168_v50 = vpop.permute.xlu1 %10167  ;;  %v10406_v53 = vpop.permute.xlu0 %10405 }
 0x79f   :  { %10012 = vmatpush1.msra.mxu0 %v9931_v49  ;;  %10075 = vmatprep.mubr.f32.mxu0 %v13667_v4  ;;  %v10172_v11 = vsel %vm1471_vm6, %v10166_v60, %v10168_v50  ;;  %v10171_v15 = vsel %vm1471_vm6, %v10168_v50, %v10170_v48 }
 0x7a0   :  { %10082 = vmatprep.subr.mxu0 %v9934_v51 }
 0x7a2   :  { %13277 = vmatmul.mubr.msk.f32.vlgmr.msra.gmra.mrb[14].mxu0 %vm73_vm1, %v13275_v45  ;;  %v10404_v56 = vpop.permute.xlu1 %10403  ;;  %v10408_v1 = vpop.permute.xlu0 %10407 }
 0x7a3   :  { %10083 = vmatpush1.msra.mxu0 %v9929_v52  ;;  %10146 = vmatprep.mubr.f32.mxu0 %v13667_v4  ;;  %v10416_v17 = vsel %vm1714_vm7, %v10404_v56, %v10406_v53  ;;  %v10415_v43 = vsel %vm1714_vm7, %v10406_v53, %v10408_v1 }
 0x7a4   :  { %10182 = vmatprep.subr.mxu0 %v10174_v63 }
 0x7a6   :  { %13278 = vmatmul.mubr.msk.f32.vlgmr.msra.gmra.mrb[16].mxu0 %vm73_vm1, %v13275_v45  ;;  %v10402_v8 = vpop.permute.xlu1 %10401  ;;  %v10412_v16 = vpop.permute.xlu0 %10411 }
 0x7a7   :  { %10183 = vmatpush1.msra.mxu0 %v10175_v7  ;;  %10246 = vmatprep.mubr.f32.mxu0 %v13667_v4  ;;  %v10417_v24 = vsel %vm1714_vm7, %v10402_v8, %v10404_v56  ;;  %v10418_v28 = vsel %vm1714_vm7, %v10412_v16, %v10402_v8  ;;  %v15324_v56 = vld [vmem:[%s15647_s3 + $0x20] sm:$0xff]  ;;  %v15332_v8 = vld [vmem:[%s15647_s3 + $0x28] sm:$0xff] }
 0x7a8   :  { %10253 = vmatprep.subr.mxu0 %v10172_v11 }
 0x7aa   :  { %13280 = vmatmul.mubr.msk.f32.vlgmr.msra.gmra.mrb[12].mxu0 %vm73_vm1, %v13279_v3  ;;  %v10410_v6 = vpop.permute.xlu1 %10409  ;;  %v10648_v27 = vpop.permute.xlu0 %10647 }
 0x7ab   :  { %10254 = vmatpush1.msra.mxu0 %v10173_v13  ;;  %10317 = vmatprep.mubr.f32.mxu0 %v13667_v4  ;;  %v10414_v25 = vsel %vm1714_vm7, %v10408_v1, %v10410_v6  ;;  %v10413_v47 = vsel %vm1714_vm7, %v10410_v6, %v10412_v16  ;;  %v13328_v13 = vld [vmem:[%s15646_s2 + $0x28] sm:$0xff] }
 0x7ac   :  { %10324 = vmatprep.subr.mxu0 %v10176_v0 }
 0x7ae   :  { %13281 = vmatmul.mubr.msk.f32.vlgmr.msra.gmra.mrb[14].mxu0 %vm73_vm1, %v13279_v3  ;;  %v10646_v23 = vpop.permute.xlu1 %10645  ;;  %v10650_v61 = vpop.permute.xlu0 %10649 }
 0x7af   :  { %10325 = vmatpush1.msra.mxu0 %v10171_v15  ;;  %10388 = vmatprep.mubr.f32.mxu0 %v13667_v4  ;;  %v10658_v59 = vsel %vm1957_vm8, %v10646_v23, %v10648_v27  ;;  %v10657_v5 = vsel %vm1957_vm8, %v10648_v27, %v10650_v61 }
 0x7b0   :  { %10424 = vmatprep.subr.mxu0 %v10416_v17 }
 0x7b2   :  { %13282 = vmatmul.mubr.msk.f32.vlgmr.msra.gmra.mrb[16].mxu0 %vm73_vm1, %v13279_v3  ;;  %v10644_v39 = vpop.permute.xlu1 %10643  ;;  %v10654_v22 = vpop.permute.xlu0 %10653  ;;  %v15344_v3 = vld [vmem:[%s15647_s3 + $0x18] sm:$0xff] }
 0x7b3   :  { %10425 = vmatpush1.msra.mxu0 %v10417_v24  ;;  %10488 = vmatprep.mubr.f32.mxu0 %v13667_v4  ;;  %v10659_v30 = vsel %vm1957_vm8, %v10644_v39, %v10646_v23  ;;  %v10660_v31 = vsel %vm1957_vm8, %v10654_v22, %v10644_v39  ;;  %v13293_v24 = vld [vmem:[%s15645_s1 + $0x170] sm:$0xff] }
 0x7b4   :  { %10495 = vmatprep.subr.mxu0 %v10414_v25 }
 0x7b6   :  { %13284 = vmatmul.mubr.msk.f32.vlgmr.msra.gmra.mrb[12].mxu0 %vm73_vm1, %v13283_v26  ;;  %v10652_v55 = vpop.permute.xlu1 %10651 }
 0x7b7   :  { %10496 = vmatpush1.msra.mxu0 %v10415_v43  ;;  %10559 = vmatprep.mubr.f32.mxu0 %v13667_v4  ;;  %v10656_v12 = vsel %vm1957_vm8, %v10650_v61, %v10652_v55  ;;  %v10655_v62 = vsel %vm1957_vm8, %v10652_v55, %v10654_v22  ;;  %v13292_v22 = vld [vmem:[%s15645_s1 + $0x168] sm:$0xff] }
 0x7b8   :  { %10566 = vmatprep.subr.mxu0 %v10418_v28 }
 0x7ba   :  { %13285 = vmatmul.mubr.msk.f32.vlgmr.msra.gmra.mrb[14].mxu0 %vm73_vm1, %v13283_v26 }
 0x7bb   :  { %10567 = vmatpush1.msra.mxu0 %v10413_v47  ;;  %10630 = vmatprep.mubr.f32.mxu0 %v13667_v4 }
 0x7bc   :  { %10666 = vmatprep.subr.mxu0 %v10658_v59 }
 0x7be   :  { %13286 = vmatmul.mubr.msk.f32.vlgmr.msra.gmra.mrb[16].mxu0 %vm73_vm1, %v13283_v26 }
 0x7bf   :  { %10667 = vmatpush1.msra.mxu0 %v10659_v30  ;;  %10730 = vmatprep.mubr.f32.mxu0 %v13667_v4 }
 0x7c0   :  { %10737 = vmatprep.subr.mxu0 %v10656_v12 }
 0x7c2   :  { %13288 = vmatmul.mubr.msk.f32.vlgmr.msra.gmra.mrb[12].mxu0 %vm73_vm1, %v13287_v33 }
 0x7c3   :  { %10738 = vmatpush1.msra.mxu0 %v10657_v5  ;;  %10801 = vmatprep.mubr.f32.mxu0 %v13667_v4 }
 0x7c4   :  { %10808 = vmatprep.subr.mxu0 %v10660_v31 }
 0x7c6   :  { %13289 = vmatmul.mubr.msk.f32.vlgmr.msra.gmra.mrb[14].mxu0 %vm73_vm1, %v13287_v33 }
 0x7c7   :  { %10809 = vmatpush1.msra.mxu0 %v10655_v62  ;;  %10872 = vmatprep.mubr.f32.mxu0 %v13667_v4  ;;  %v10890_v34 = vpop.permute.xlu1 %10889 }
 0x7ca   :  { %13290 = vmatmul.mubr.msk.f32.vlgmr.msra.gmra.mrb[16].mxu0 %vm73_vm1, %v13287_v33 }
 0x895   :  { %v10732_v42 = vpop.f32.mrb[12].mxu0 }
 0x896   :  { %v10892_v19 = vadd.f32 %v10890_v34, %v10732_v42  ;;  %v10734_v58 = vpop.f32.mrb[13].mxu0 }
 0x897   :  { %v10893_v21 = vadd.f32 %v10890_v34, %v10734_v58 }
 0x898   :  { %v10898_v36 = vmax.f32 %v10892_v19, 0.0 }
 0x899   :  { %v10899_v38 = vmax.f32 %v10893_v21, 0.0  ;;  %v10803_v14 = vpop.f32.mrb[14].mxu0 }
 0x89a   :  { %v15297_v54 = vmul.f32 %v15294_v46, %v10898_v36  ;;  %v10894_v57 = vadd.f32 %v10890_v34, %v10803_v14  ;;  %v10805_v60 = vpop.f32.mrb[15].mxu0 }
 0x89b   :  { %v15305_v18 = vmul.f32 %v15302_v2, %v10899_v38  ;;  %v10895_v50 = vadd.f32 %v10890_v34, %v10805_v60  ;;  %v13300_v60 = vld [vmem:[%s15645_s1 + $0x178] sm:$0xff] }
 0x89c   :  { %v10900_v40 = vmax.f32 %v10894_v57, 0.0  ;;  %10930 = vrot.lane.b32.xlu0 %v15297_v54, %s13666_s19 }
 0x89d   :  { %v10874_v41 = vpop.f32.mrb[16].mxu0  ;;  %10932 = vrot.lane.b32.xlu1 %v15305_v18, %s13666_s19  ;;  %v10901_v7 = vmax.f32 %v10895_v50, 0.0 }
 0x89e   :  { %v15317_v45 = vmul.f32 %v15314_v44, %v10900_v40  ;;  %v10896_v48 = vadd.f32 %v10890_v34, %v10874_v41  ;;  %v10876_v49 = vpop.f32.mrb[17].mxu0 }
 0x89f   :  { %v10897_v51 = vadd.f32 %v10890_v34, %v10876_v49  ;;  %v15347_v1 = vmul.f32 %v15344_v3, %v10901_v7 }
 0x8a0   :  { %v10902_v52 = vmax.f32 %v10896_v48, 0.0 }
 0x8a1   :  { %v10903_v53 = vmax.f32 %v10897_v51, 0.0  ;;  %10934 = vrot.lane.b32.xlu1 %v15317_v45, %s13666_s19 }
 0x8a2   :  { %v15327_v63 = vmul.f32 %v15324_v56, %v10902_v52 }
 0x8a3   :  { %v15335_v11 = vmul.f32 %v15332_v8, %v10903_v53 }
 0x8a5   :  { %10938 = vrot.lane.b32.xlu1 %v15327_v63, %s13666_s19  ;;  %10940 = vrot.lane.b32.xlu0 %v15335_v11, %s13666_s19 }
 0x8a9   :  { %10912 = vrot.lane.b32.xlu1 %v15305_v18, %s13668_s28  ;;  %10936 = vrot.lane.b32.xlu0 %v15347_v1, %s13666_s19 }
 0x8ad   :  { %10914 = vrot.lane.b32.xlu1 %v15317_v45, %s13668_s28  ;;  %10910 = vrot.lane.b32.xlu0 %v15297_v54, %s13668_s28 }
 0x8b1   :  { %10918 = vrot.lane.b32.xlu1 %v15327_v63, %s13668_s28  ;;  %10920 = vrot.lane.b32.xlu0 %v15335_v11, %s13668_s28 }
 0x8b5   :  { %11384 = vrot.lane.b32.xlu1 %v15305_v18, %s13669_s0  ;;  %10916 = vrot.lane.b32.xlu0 %v15347_v1, %s13668_s28 }
 0x8b9   :  { %11386 = vrot.lane.b32.xlu1 %v15317_v45, %s13669_s0  ;;  %11382 = vrot.lane.b32.xlu0 %v15297_v54, %s13669_s0 }
 0x8bd   :  { %11390 = vrot.lane.b32.xlu1 %v15327_v63, %s13669_s0  ;;  %11392 = vrot.lane.b32.xlu0 %v15335_v11, %s13669_s0 }
 0x8c1   :  { %11626 = vrot.lane.b32.xlu1 %v15305_v18, %s13670_s29  ;;  %11388 = vrot.lane.b32.xlu0 %v15347_v1, %s13669_s0 }
 0x8c5   :  { %11628 = vrot.lane.b32.xlu1 %v15317_v45, %s13670_s29  ;;  %11624 = vrot.lane.b32.xlu0 %v15297_v54, %s13670_s29 }
 0x8c9   :  { %11632 = vrot.lane.b32.xlu1 %v15327_v63, %s13670_s29  ;;  %11634 = vrot.lane.b32.xlu0 %v15335_v11, %s13670_s29 }
 0x8cd   :  { %12094 = vrot.lane.b32.xlu1 %v15317_v45, %s13671_s30  ;;  %11630 = vrot.lane.b32.xlu0 %v15347_v1, %s13670_s29 }
 0x8d1   :  { %12096 = vrot.lane.b32.xlu1 %v15347_v1, %s13671_s30  ;;  %12092 = vrot.lane.b32.xlu0 %v15305_v18, %s13671_s30 }
 0x8d5   :  { %12100 = vrot.lane.b32.xlu1 %v15335_v11, %s13671_s30  ;;  %12090 = vrot.lane.b32.xlu0 %v15297_v54, %s13671_s30 }
 0x8d9   :  { %12336 = vrot.lane.b32.xlu1 %v15317_v45, %s13672_s5  ;;  %12098 = vrot.lane.b32.xlu0 %v15327_v63, %s13671_s30 }
 0x8dd   :  { %12338 = vrot.lane.b32.xlu1 %v15347_v1, %s13672_s5  ;;  %12334 = vrot.lane.b32.xlu0 %v15305_v18, %s13672_s5 }
 0x8e1   :  { %12342 = vrot.lane.b32.xlu1 %v15335_v11, %s13672_s5  ;;  %12332 = vrot.lane.b32.xlu0 %v15297_v54, %s13672_s5 }
 0x8e5   :  { %12578 = vrot.lane.b32.xlu1 %v15317_v45, %s13673_s6  ;;  %12340 = vrot.lane.b32.xlu0 %v15327_v63, %s13672_s5 }
 0x8e9   :  { %12580 = vrot.lane.b32.xlu1 %v15347_v1, %s13673_s6  ;;  %12576 = vrot.lane.b32.xlu0 %v15305_v18, %s13673_s6 }
 0x8ed   :  { %12584 = vrot.lane.b32.xlu1 %v15335_v11, %s13673_s6  ;;  %12574 = vrot.lane.b32.xlu0 %v15297_v54, %s13673_s6 }
 0x8f1   :  { %12820 = vrot.lane.b32.xlu1 %v15317_v45, %s13674_s7  ;;  %12582 = vrot.lane.b32.xlu0 %v15327_v63, %s13673_s6 }
 0x8f5   :  { %12822 = vrot.lane.b32.xlu1 %v15347_v1, %s13674_s7  ;;  %12818 = vrot.lane.b32.xlu0 %v15305_v18, %s13674_s7 }
 0x8f9   :  { %12826 = vrot.lane.b32.xlu1 %v15335_v11, %s13674_s7  ;;  %12816 = vrot.lane.b32.xlu0 %v15297_v54, %s13674_s7 }
 0x8fd   :  { %12824 = vrot.lane.b32.xlu0 %v15327_v63, %s13674_s7 }
 0x901   :  { %13062 = vperm.xlu0 %13628, %v13328_v13  }
 0x90e   :  { %v10931_v6 = vpop.permute.xlu0 %10930 }
 0x90f   :  { %v10933_v0 = vpop.permute.xlu1 %10932 }
 0x910   :  { %v10946_v15 = vsel %vm64_vm0, %v10931_v6, %v10933_v0 }
 0x911   :  { %10953 = vmatprep.subr.mxu1 %v10946_v15  ;;  %v13304_v15 = vld [vmem:[%s15645_s1 + $0x180] sm:$0xff] }
 0x913   :  { %v10935_v16 = vpop.permute.xlu1 %10934 }
 0x914   :  { %v10945_v39 = vsel %vm64_vm0, %v10933_v0, %v10935_v16 }
 0x917   :  { %v10939_v17 = vpop.permute.xlu1 %10938  ;;  %v10941_v23 = vpop.permute.xlu0 %10940 }
 0x918   :  { %v10947_v25 = vsel %vm64_vm0, %v10941_v23, %v10931_v6  ;;  %v10942_v28 = vsel %vm64_vm0, %v10939_v17, %v10941_v23 }
 0x919   :  { %10954 = vmatpush1.msra.mxu1 %v10947_v25 }
 0x91a   :  { %13294 = vmatmul.mubr.msk.f32.vlgmr.msra.gmra.mrb[12].mxu1 %vm73_vm1, %v13293_v24 }
 0x91b   :  { %v10913_v26 = vpop.permute.xlu1 %10912  ;;  %v10937_v27 = vpop.permute.xlu0 %10936  ;;  %11088 = vmatprep.mubr.f32.mxu1 %v13667_v4 }
 0x91c   :  { %v10944_v43 = vsel %vm64_vm0, %v10935_v16, %v10937_v27  ;;  %v10943_v47 = vsel %vm64_vm0, %v10937_v27, %v10939_v17 }
 0x91d   :  { %11024 = vmatprep.subr.mxu1 %v10944_v43 }
 0x91e   :  { %11025 = vmatpush1.msra.mxu1 %v10945_v39 }
 0x91f   :  { %v10915_v61 = vpop.permute.xlu1 %10914  ;;  %13295 = vmatmul.mubr.msk.f32.vlgmr.msra.gmra.mrb[14].mxu1 %vm73_vm1, %v13293_v24  ;;  %11095 = vmatprep.subr.mxu1 %v10942_v28  ;;  %v10911_v59 = vpop.permute.xlu0 %10910 }
 0x920   :  { %11096 = vmatpush1.msra.mxu1 %v10943_v47  ;;  %v10926_v55 = vsel %vm44_vm2, %v10911_v59, %v10913_v26  ;;  %11159 = vmatprep.mubr.f32.mxu1 %v13667_v4  ;;  %v10925_v34 = vsel %vm44_vm2, %v10913_v26, %v10915_v61  ;;  %v13308_v47 = vld [vmem:[%s15645_s1 + $0x188] sm:$0xff] }
 0x921   :  { %11169 = vmatprep.subr.mxu1 %v10926_v55 }
 0x923   :  { %v10919_v30 = vpop.permute.xlu1 %10918  ;;  %13296 = vmatmul.mubr.msk.f32.vlgmr.msra.gmra.mrb[16].mxu1 %vm73_vm1, %v13293_v24  ;;  %v10921_v12 = vpop.permute.xlu0 %10920 }
 0x924   :  { %v10927_v33 = vsel %vm44_vm2, %v10921_v12, %v10911_v59  ;;  %11233 = vmatprep.mubr.f32.mxu1 %v13667_v4  ;;  %v10922_v42 = vsel %vm44_vm2, %v10919_v30, %v10921_v12 }
 0x925   :  { %11170 = vmatpush1.msra.mxu1 %v10927_v33 }
 0x927   :  { %v11385_v5 = vpop.permute.xlu1 %11384  ;;  %13297 = vmatmul.mubr.msk.f32.vlgmr.msra.gmra.mrb[12].mxu1 %vm73_vm1, %v13292_v22  ;;  %v10917_v31 = vpop.permute.xlu0 %10916 }
 0x928   :  { %v10924_v62 = vsel %vm44_vm2, %v10915_v61, %v10917_v31  ;;  %11304 = vmatprep.mubr.f32.mxu1 %v13667_v4  ;;  %v10923_v19 = vsel %vm44_vm2, %v10917_v31, %v10919_v30 }
 0x929   :  { %11240 = vmatprep.subr.mxu1 %v10924_v62 }
 0x92a   :  { %11241 = vmatpush1.msra.mxu1 %v10925_v34 }
 0x92b   :  { %v11387_v58 = vpop.permute.xlu1 %11386  ;;  %13298 = vmatmul.mubr.msk.f32.vlgmr.msra.gmra.mrb[14].mxu1 %vm73_vm1, %v13292_v22  ;;  %11311 = vmatprep.subr.mxu1 %v10922_v42  ;;  %v11383_v21 = vpop.permute.xlu0 %11382 }
 0x92c   :  { %11312 = vmatpush1.msra.mxu1 %v10923_v19  ;;  %v11398_v36 = vsel %vm518_vm3, %v11383_v21, %v11385_v5  ;;  %11375 = vmatprep.mubr.f32.mxu1 %v13667_v4  ;;  %v11397_v49 = vsel %vm518_vm3, %v11385_v5, %v11387_v58 }
 0x92d   :  { %11405 = vmatprep.subr.mxu1 %v11398_v36 }
 0x92f   :  { %v11391_v38 = vpop.permute.xlu1 %11390  ;;  %13299 = vmatmul.mubr.msk.f32.vlgmr.msra.gmra.mrb[16].mxu1 %vm73_vm1, %v13292_v22  ;;  %v11393_v14 = vpop.permute.xlu0 %11392 }
 0x930   :  { %v11399_v57 = vsel %vm518_vm3, %v11393_v14, %v11383_v21  ;;  %11469 = vmatprep.mubr.f32.mxu1 %v13667_v4  ;;  %v11394_v50 = vsel %vm518_vm3, %v11391_v38, %v11393_v14  ;;  %v13316_v21 = vld [vmem:[%s15645_s1 + $0x198] sm:$0xff] }
 0x931   :  { %11406 = vmatpush1.msra.mxu1 %v11399_v57 }
 0x933   :  { %v11627_v40 = vpop.permute.xlu1 %11626  ;;  %13301 = vmatmul.mubr.msk.f32.vlgmr.msra.gmra.mrb[12].mxu1 %vm73_vm1, %v13300_v60  ;;  %v11389_v41 = vpop.permute.xlu0 %11388 }
 0x934   :  { %v11396_v48 = vsel %vm518_vm3, %v11387_v58, %v11389_v41  ;;  %11540 = vmatprep.mubr.f32.mxu1 %v13667_v4  ;;  %v11395_v51 = vsel %vm518_vm3, %v11389_v41, %v11391_v38 }
 0x935   :  { %11476 = vmatprep.subr.mxu1 %v11396_v48 }
 0x936   :  { %11477 = vmatpush1.msra.mxu1 %v11397_v49 }
 0x937   :  { %v11629_v52 = vpop.permute.xlu1 %11628  ;;  %13302 = vmatmul.mubr.msk.f32.vlgmr.msra.gmra.mrb[14].mxu1 %vm73_vm1, %v13300_v60  ;;  %11547 = vmatprep.subr.mxu1 %v11394_v50  ;;  %v11625_v53 = vpop.permute.xlu0 %11624 }
 0x938   :  { %11548 = vmatpush1.msra.mxu1 %v11395_v51  ;;  %v11640_v7 = vsel %vm761_vm4, %v11625_v53, %v11627_v40  ;;  %11611 = vmatprep.mubr.f32.mxu1 %v13667_v4  ;;  %v11639_v24 = vsel %vm761_vm4, %v11627_v40, %v11629_v52  ;;  %v13320_v51 = vld [vmem:[%s15645_s1 + $0x1a0] sm:$0xff] }
 0x939   :  { %11647 = vmatprep.subr.mxu1 %v11640_v7 }
 0x93b   :  { %v11633_v13 = vpop.permute.xlu1 %11632  ;;  %13303 = vmatmul.mubr.msk.f32.vlgmr.msra.gmra.mrb[16].mxu1 %vm73_vm1, %v13300_v60  ;;  %v11635_v6 = vpop.permute.xlu0 %11634 }
 0x93c   :  { %v11641_v0 = vsel %vm761_vm4, %v11635_v6, %v11625_v53  ;;  %11711 = vmatprep.mubr.f32.mxu1 %v13667_v4  ;;  %v11636_v25 = vsel %vm761_vm4, %v11633_v13, %v11635_v6 }
 0x93d   :  { %11648 = vmatpush1.msra.mxu1 %v11641_v0 }
 0x93f   :  { %v12095_v16 = vpop.permute.xlu1 %12094  ;;  %13305 = vmatmul.mubr.msk.f32.vlgmr.msra.gmra.mrb[12].mxu1 %vm73_vm1, %v13304_v15  ;;  %v11631_v17 = vpop.permute.xlu0 %11630 }
 0x940   :  { %v11638_v23 = vsel %vm761_vm4, %v11629_v52, %v11631_v17  ;;  %11782 = vmatprep.mubr.f32.mxu1 %v13667_v4  ;;  %v11637_v26 = vsel %vm761_vm4, %v11631_v17, %v11633_v13 }
 0x941   :  { %11718 = vmatprep.subr.mxu1 %v11638_v23 }
 0x942   :  { %11719 = vmatpush1.msra.mxu1 %v11639_v24  ;;  %v13324_v24 = vld [vmem:[%s15645_s1 + $0x1a8] sm:$0xff] }
 0x943   :  { %v12097_v27 = vpop.permute.xlu1 %12096  ;;  %13306 = vmatmul.mubr.msk.f32.vlgmr.msra.gmra.mrb[14].mxu1 %vm73_vm1, %v13304_v15  ;;  %11789 = vmatprep.subr.mxu1 %v11636_v25  ;;  %v12093_v43 = vpop.permute.xlu0 %12092 }
 0x944   :  { %11790 = vmatpush1.msra.mxu1 %v11637_v26  ;;  %11853 = vmatprep.mubr.f32.mxu1 %v13667_v4  ;;  %v12105_v55 = vsel %vm1228_vm5, %v12093_v43, %v12095_v16  ;;  %v12104_v12 = vsel %vm1228_vm5, %v12095_v16, %v12097_v27 }
 0x945   :  { %11871 = vmatprep.subr.mxu1 %v15305_v18 }
 0x947   :  { %v12101_v39 = vpop.permute.xlu1 %12100  ;;  %13307 = vmatmul.mubr.msk.f32.vlgmr.msra.gmra.mrb[16].mxu1 %vm73_vm1, %v13304_v15  ;;  %v12091_v28 = vpop.permute.xlu0 %12090 }
 0x948   :  { %11872 = vmatpush1.msra.mxu1 %v15297_v54  ;;  %11935 = vmatprep.mubr.f32.mxu1 %v13667_v4  ;;  %v12107_v22 = vsel %vm1228_vm5, %v12101_v39, %v12091_v28 }
 0x949   :  { %11942 = vmatprep.subr.mxu1 %v15347_v1  ;;  %v12106_v1 = vsel %vm1228_vm5, %v12091_v28, %v12093_v43 }
 0x94b   :  { %v12337_v61 = vpop.permute.xlu1 %12336  ;;  %13309 = vmatmul.mubr.msk.f32.vlgmr.msra.gmra.mrb[12].mxu1 %vm73_vm1, %v13308_v47  ;;  %v12099_v59 = vpop.permute.xlu0 %12098 }
 0x94c   :  { %11943 = vmatpush1.msra.mxu1 %v15317_v45  ;;  %12006 = vmatprep.mubr.f32.mxu1 %v13667_v4  ;;  %v12102_v5 = vsel %vm1228_vm5, %v12099_v59, %v12101_v39 }
 0x94d   :  { %12013 = vmatprep.subr.mxu1 %v15335_v11  ;;  %v12103_v11 = vsel %vm1228_vm5, %v12097_v27, %v12099_v59 }
 0x94f   :  { %v12339_v18 = vpop.permute.xlu1 %12338  ;;  %13310 = vmatmul.mubr.msk.f32.vlgmr.msra.gmra.mrb[14].mxu1 %vm73_vm1, %v13308_v47  ;;  %v12335_v54 = vpop.permute.xlu0 %12334 }
 0x950   :  { %12014 = vmatpush1.msra.mxu1 %v15327_v63  ;;  %12077 = vmatprep.mubr.f32.mxu1 %v13667_v4  ;;  %v13312_v63 = vld [vmem:[%s15645_s1 + $0x190] sm:$0xff]  ;;  %v12347_v34 = vsel %vm1471_vm6, %v12335_v54, %v12337_v61  ;;  %v12346_v38 = vsel %vm1471_vm6, %v12337_v61, %v12339_v18  ;;  %s13676_s1 = smov [#allocation2]  }
 0x951   :  { %12113 = vmatprep.subr.mxu1 %v12105_v55  ;;  %s13101_s22 = sshll.u32 %s13676_s1, 4  ;;  %s13102_s22 = int_to_ptr.vmem [resolvable:$true] %s13101_s22 }
 0x952   :  { %s13642_s23 = scalar_lea.vmem %s13102_s22, 768  ;;  %p13647_p1 = scmp.lt.s32.totalorder %s13102_s22, %s13102_s22 }
 0x953   :  { %13311 = vmatmul.mubr.msk.f32.vlgmr.msra.gmra.mrb[16].mxu1 %vm73_vm1, %v13308_v47  ;;  %v12333_v45 = vpop.permute.xlu0 %12332  ;;  %v12343_v30 = vpop.permute.xlu1 %12342  ;;  %p13643_p0 = scmp.ne.s32.totalorder %s13102_s22, %s13642_s23  ;;  %p13648_p2 = scmp.lt.s32.totalorder %s13642_s23, %s13642_s23 }
 0x954   :  { %12114 = vmatpush1.msra.mxu1 %v12106_v1  ;;  %12177 = vmatprep.mubr.f32.mxu1 %v13667_v4  ;;  %v12348_v42 = vsel %vm1471_vm6, %v12333_v45, %v12335_v54  ;;  %v12349_v57 = vsel %vm1471_vm6, %v12343_v30, %v12333_v45 }
 0x955   :  { %12184 = vmatprep.subr.mxu1 %v12103_v11  ;;  %p13649_p3 = por %p13648_p2, %p13647_p1 }
 0x957   :  { %13313 = vmatmul.mubr.msk.f32.vlgmr.msra.gmra.mrb[12].mxu1 %vm73_vm1, %v13312_v63  ;;  %v12341_v33 = vpop.permute.xlu0 %12340  ;;  %v12579_v31 = vpop.permute.xlu1 %12578  ;;  %p13650_p4 = pnand %p13649_p3, %p13643_p0 }
 0x958   :  { %12185 = vmatpush1.msra.mxu1 %v12104_v12  ;;  %12248 = vmatprep.mubr.f32.mxu1 %v13667_v4  ;;  %v12345_v58 = vsel %vm1471_vm6, %v12339_v18, %v12341_v33  ;;  %v12344_v60 = vsel %vm1471_vm6, %v12341_v33, %v12343_v30 }
 0x959   :  { %12255 = vmatprep.subr.mxu1 %v12107_v22 }
 0x95b   :  { %13314 = vmatmul.mubr.msk.f32.vlgmr.msra.gmra.mrb[14].mxu1 %vm73_vm1, %v13312_v63  ;;  %v12577_v62 = vpop.permute.xlu0 %12576  ;;  %v12581_v36 = vpop.permute.xlu1 %12580 }
 0x95c   :  { %12256 = vmatpush1.msra.mxu1 %v12102_v5  ;;  %12319 = vmatprep.mubr.f32.mxu1 %v13667_v4  ;;  %v12589_v41 = vsel %vm1714_vm7, %v12577_v62, %v12579_v31  ;;  %v12588_v53 = vsel %vm1714_vm7, %v12579_v31, %v12581_v36 }
 0x95d   :  { %12355 = vmatprep.subr.mxu1 %v12347_v34 }
 0x95f   :  { %13315 = vmatmul.mubr.msk.f32.vlgmr.msra.gmra.mrb[16].mxu1 %vm73_vm1, %v13312_v63  ;;  %v12575_v19 = vpop.permute.xlu0 %12574  ;;  %v12585_v40 = vpop.permute.xlu1 %12584 }
 0x960   :  { %12356 = vmatpush1.msra.mxu1 %v12348_v42  ;;  %12419 = vmatprep.mubr.f32.mxu1 %v13667_v4  ;;  %v12590_v49 = vsel %vm1714_vm7, %v12575_v19, %v12577_v62  ;;  %v12591_v13 = vsel %vm1714_vm7, %v12585_v40, %v12575_v19 }
 0x961   :  { %12426 = vmatprep.subr.mxu1 %v12345_v58 }
 0x963   :  { %13317 = vmatmul.mubr.msk.f32.vlgmr.msra.gmra.mrb[12].mxu1 %vm73_vm1, %v13316_v21  ;;  %v12583_v14 = vpop.permute.xlu0 %12582  ;;  %v12821_v52 = vpop.permute.xlu1 %12820 }
 0x964   :  { %12427 = vmatpush1.msra.mxu1 %v12346_v38  ;;  %12490 = vmatprep.mubr.f32.mxu1 %v13667_v4  ;;  %v12587_v50 = vsel %vm1714_vm7, %v12581_v36, %v12583_v14  ;;  %v12586_v6 = vsel %vm1714_vm7, %v12583_v14, %v12585_v40 }
 0x965   :  { %12497 = vmatprep.subr.mxu1 %v12349_v57 }
 0x967   :  { %13318 = vmatmul.mubr.msk.f32.vlgmr.msra.gmra.mrb[14].mxu1 %vm73_vm1, %v13316_v21  ;;  %v12819_v48 = vpop.permute.xlu0 %12818  ;;  %v12823_v0 = vpop.permute.xlu1 %12822 }
 0x968   :  { %12498 = vmatpush1.msra.mxu1 %v12344_v60  ;;  %12561 = vmatprep.mubr.f32.mxu1 %v13667_v4  ;;  %v12831_v15 = vsel %vm1957_vm8, %v12819_v48, %v12821_v52  ;;  %v12830_v26 = vsel %vm1957_vm8, %v12821_v52, %v12823_v0 }
 0x969   :  { %12597 = vmatprep.subr.mxu1 %v12589_v41 }
 0x96b   :  { %13319 = vmatmul.mubr.msk.f32.vlgmr.msra.gmra.mrb[16].mxu1 %vm73_vm1, %v13316_v21  ;;  %v12817_v7 = vpop.permute.xlu0 %12816  ;;  %v12827_v25 = vpop.permute.xlu1 %12826 }
 0x96c   :  { %12598 = vmatpush1.msra.mxu1 %v12590_v49  ;;  %12661 = vmatprep.mubr.f32.mxu1 %v13667_v4  ;;  %v12832_v17 = vsel %vm1957_vm8, %v12817_v7, %v12819_v48  ;;  %v12833_v27 = vsel %vm1957_vm8, %v12827_v25, %v12817_v7 }
 0x96d   :  { %12668 = vmatprep.subr.mxu1 %v12587_v50 }
 0x96f   :  { %13321 = vmatmul.mubr.msk.f32.vlgmr.msra.gmra.mrb[12].mxu1 %vm73_vm1, %v13320_v51  ;;  %v12825_v16 = vpop.permute.xlu0 %12824 }
 0x970   :  { %12669 = vmatpush1.msra.mxu1 %v12588_v53  ;;  %12732 = vmatprep.mubr.f32.mxu1 %v13667_v4  ;;  %v12829_v23 = vsel %vm1957_vm8, %v12823_v0, %v12825_v16  ;;  %v12828_v43 = vsel %vm1957_vm8, %v12825_v16, %v12827_v25 }
 0x971   :  { %12739 = vmatprep.subr.mxu1 %v12591_v13 }
 0x973   :  { %13322 = vmatmul.mubr.msk.f32.vlgmr.msra.gmra.mrb[14].mxu1 %vm73_vm1, %v13320_v51 }
 0x974   :  { %12740 = vmatpush1.msra.mxu1 %v12586_v6  ;;  %12803 = vmatprep.mubr.f32.mxu1 %v13667_v4 }
 0x975   :  { %12839 = vmatprep.subr.mxu1 %v12831_v15 }
 0x977   :  { %13323 = vmatmul.mubr.msk.f32.vlgmr.msra.gmra.mrb[16].mxu1 %vm73_vm1, %v13320_v51 }
 0x978   :  { %12840 = vmatpush1.msra.mxu1 %v12832_v17  ;;  %12903 = vmatprep.mubr.f32.mxu1 %v13667_v4 }
 0x979   :  { %12910 = vmatprep.subr.mxu1 %v12829_v23 }
 0x97b   :  { %13325 = vmatmul.mubr.msk.f32.vlgmr.msra.gmra.mrb[12].mxu1 %vm73_vm1, %v13324_v24 }
 0x97c   :  { %12911 = vmatpush1.msra.mxu1 %v12830_v26  ;;  %12974 = vmatprep.mubr.f32.mxu1 %v13667_v4 }
 0x97d   :  { %12981 = vmatprep.subr.mxu1 %v12833_v27 }
 0x97f   :  { %13326 = vmatmul.mubr.msk.f32.vlgmr.msra.gmra.mrb[14].mxu1 %vm73_vm1, %v13324_v24 }
 0x980   :  { %12982 = vmatpush1.msra.mxu1 %v12828_v43  ;;  %13045 = vmatprep.mubr.f32.mxu1 %v13667_v4  ;;  %v13063_v39 = vpop.permute.xlu0 %13062 }
 0x983   :  { %13327 = vmatmul.mubr.msk.f32.vlgmr.msra.gmra.mrb[16].mxu1 %vm73_vm1, %v13324_v24 }
 0xa4e   :  { %v12905_v28 = vpop.f32.mrb[12].mxu1 }
 0xa4f   :  { %v13065_v47 = vadd.f32 %v13063_v39, %v12905_v28  ;;  %v12907_v61 = vpop.f32.mrb[13].mxu1 }
 0xa50   :  { %v13066_v59 = vadd.f32 %v13063_v39, %v12907_v61 }
 0xa51   :  { %v13071_v18 = vadd.f32 %v13065_v47, %v14989_v29 }
 0xa52   :  { %v13072_v54 = vadd.f32 %v13066_v59, %v14993_v32  ;;  %v12976_v55 = vpop.f32.mrb[14].mxu1 }
 0xa53   :  { %v13077_v1 = vmax.f32 %v13071_v18, 0.0  ;;  %v13067_v10 = vadd.f32 %v13063_v39, %v12976_v55  ;;  %v12978_v45 = vpop.f32.mrb[15].mxu1 }
 0xa54   :  { %v13078_v11 = vmax.f32 %v13072_v54, 0.0  ;;  %v13068_v63 = vadd.f32 %v13063_v39, %v12978_v45 }
 0xa55   :  { %v13083_v30 = vmul.f32 %v15294_v46, %v13077_v1  ;;  %v13073_v4 = vadd.f32 %v13067_v10, %v15000_v20 }
 0xa56   :  { %v13084_v12 = vmul.f32 %v15302_v2, %v13078_v11  ;;  %v13074_v33 = vadd.f32 %v13068_v63, %v15018_v9  ;;  %v13047_v22 = vpop.f32.mrb[16].mxu1 }
 0xa57   :  { %13089 = vst [vmem:[#allocation2] sm:$0xff] %v13083_v30  ;;  %v13079_v5 = vmax.f32 %v13073_v4, 0.0  ;;  %v13069_v29 = vadd.f32 %v13063_v39, %v13047_v22  ;;  %v13049_v31 = vpop.f32.mrb[17].mxu1 }
 0xa58   :  { %13090 = vst [vmem:[#allocation2 + $0x8] sm:$0xff] %v13084_v12  ;;  %v13080_v32 = vmax.f32 %v13074_v33, 0.0  ;;  %v13070_v62 = vadd.f32 %v13063_v39, %v13049_v31 }
 0xa59   :  { %v13085_v34 = vmul.f32 %v15314_v44, %v13079_v5  ;;  %v13075_v42 = vadd.f32 %v13069_v29, %v15008_v35 }
 0xa5a   :  { %v13086_v46 = vmul.f32 %v15344_v3, %v13080_v32  ;;  %v13076_v20 = vadd.f32 %v13070_v62, %v15011_v37 }
 0xa5b   :  { %13091 = vst [vmem:[#allocation2 + $0x10] sm:$0xff] %v13085_v34  ;;  %v13081_v2 = vmax.f32 %v13075_v42, 0.0 }
 0xa5c   :  { %13092 = vst [vmem:[#allocation2 + $0x18] sm:$0xff] %v13086_v46  ;;  %v13082_v9 = vmax.f32 %v13076_v20, 0.0 }
 0xa5d   :  { %v13087_v19 = vmul.f32 %v15324_v56, %v13081_v2 }
 0xa5e   :  { %v13088_v58 = vmul.f32 %v15332_v8, %v13082_v9 }
 0xa5f   :  { %13093 = vst [vmem:[#allocation2 + $0x20] sm:$0xff] %v13087_v19 }
 0xa60   :  { %13094 = vst [vmem:[#allocation2 + $0x28] sm:$0xff] %v13088_v58 }
 0xa61   :  { %13653 = shalt.err (!%p13650_p4)
}
 0xa62   :  { %s13654_s26 = scalar_lea.hbm %s15648_s4, 768 }
 0xa63   :  { %p13655_p5 = scmp.ne.s32.totalorder %s15648_s4, %s13654_s26  ;;  %p13658_p6 = scmp.lt.u32.totalorder %s13654_s26, %s15648_s4 }
 0xa65   :  { %p13660_p7 = pnand %p13658_p6, %p13655_p5 }
 0xa67   :  { %13663 = shalt.err (!%p13660_p7)
}
 0xa68   :  { %13104 = dma.vmem_to_hbm [thread:$0]  %s13102_s22, 768, %s15648_s4, [#allocation3]  }
 0xa69   :  { %13664 = dma.done.wait [#allocation3], 768  }
 0xa6a   :  { %13665 = vsyncadd [#allocation3], 4294966528 }
 0xa6b   :  { %13108 = vsyncpa [#allocation3], 1 }

</bundles_post_ra>
